<compile_context>
chip_gen: v5e
topology: v5e:2x2
jax: 0.10.0
libtpu: 0.0.40
codegen_flags: <defaults>
</compile_context>

<pallas_src>
import jax
import jax.numpy as jnp
import numpy as np
from jax.experimental import pallas as pl
from jax.experimental.pallas import tpu as pltpu


def _conv_out(size, k, s):
    return (size - k) // s + 1


# ---------------------------------------------------------------------------
# conv1 im2col (XLA glue, bf16).  Block decomposition when stride divides the
# kernel and spatial dims: 4 wide slices + 1 concat instead of kh*kw lane-sparse
# strided slices.  Returns patches with rows ordered (n, oh, ow) and a weight
# matrix with a matching K ordering.
# ---------------------------------------------------------------------------
def _conv1_patches_and_weight(x_nhwc, w_oihw, stride):
    N, H, W, C = x_nhwc.shape
    Co, Ci, kh, kw = w_oihw.shape
    assert Ci == C
    Ho, Wo = _conv_out(H, kh, stride), _conv_out(W, kw, stride)
    s = stride
    xb = x_nhwc.astype(jnp.bfloat16)
    wkf = jnp.transpose(w_oihw, (2, 3, 1, 0))               # (kh, kw, Ci, Co)
    if kh % s == 0 and kw % s == 0 and H % s == 0 and W % s == 0:
        bh, bw = kh // s, kw // s
        nh, nw = H // s, W // s
        xblk = (xb.reshape(N, nh, s, nw, s, C)
                  .transpose(0, 1, 3, 2, 4, 5)
                  .reshape(N, nh, nw, s * s * C))
        parts = [xblk[:, br:br + Ho, bc:bc + Wo, :]
                 for br in range(bh) for bc in range(bw)]
        patches = jnp.concatenate(parts, axis=-1).reshape(N * Ho * Wo, kh * kw * C)
        wmat = (wkf.reshape(bh, s, bw, s, Ci, Co)
                   .transpose(0, 2, 1, 3, 4, 5)
                   .reshape(kh * kw * Ci, Co))
    else:  # generic fallback ordering (ki, kj, ci)
        patches = jnp.stack(
            [xb[:, i:i + s * Ho:s, j:j + s * Wo:s, :]
             for i in range(kh) for j in range(kw)], axis=3,
        ).reshape(N * Ho * Wo, kh * kw * C)
        wmat = wkf.reshape(kh * kw * Ci, Co)
    return patches, wmat.astype(jnp.bfloat16), Ho, Wo


# ---------------------------------------------------------------------------
# Fused kernel: conv1 GEMM -> in-kernel im2col + conv2 -> conv3 -> flatten rows.
# All intermediates live in VMEM; only conv1 patches (bf16) are read from HBM
# and only the final (rows, C3) features are written back.
# ---------------------------------------------------------------------------
def _make_fused_kernel(NB, Ho1, Wo1, C1, kh2, kw2, s2, Ho2, Wo2, C2,
                       kh3, kw3, s3, Ho3, Wo3, C3):
    def kernel(p1_ref, w1_ref, b1_ref, w2_ref, b2_ref, w3_ref, b3_ref, o_ref):
        # ---- conv1: one bf16 GEMM over im2col patches, f32 accumulation ----
        y1 = jnp.dot(p1_ref[...], w1_ref[...], preferred_element_type=jnp.float32)
        y1 = jnp.maximum(y1 + b1_ref[...], 0.0)            # (NB*Ho1*Wo1, C1) f32
        y1 = y1.reshape(NB, Ho1, Wo1, C1)                   # rows were (n, oh, ow)

        # ---- conv2: in-kernel im2col via contiguous per-output-position slices.
        # rows of patches2 / y2 are ordered (position p2, image n).
        patches2 = jnp.concatenate(
            [y1[:, s2 * oh:s2 * oh + kh2, s2 * ow:s2 * ow + kw2, :]
             for oh in range(Ho2) for ow in range(Wo2)], axis=0,
        )                                                   # (Ho2*Wo2*NB, kh2, kw2, C1)
        m2 = Ho2 * Wo2 * NB
        acc2 = jnp.zeros((m2, C2), jnp.float32)
        for ki in range(kh2):
            for kj in range(kw2):
                acc2 = acc2 + jnp.dot(patches2[:, ki, kj, :],
                                      w2_ref[ki * kw2 + kj],
                                      preferred_element_type=jnp.float32)
        y2 = jnp.maximum(acc2 + b2_ref[...], 0.0)           # (Ho2*Wo2*NB, C2) f32

        # ---- conv3: gather the NB-row blocks of y2 per output position ----
        out_rows = []
        for oh in range(Ho3):
            for ow in range(Wo3):
                acc3 = jnp.zeros((NB, C3), jnp.float32)
                for ki in range(kh3):
                    for kj in range(kw3):
                        p2 = (s3 * oh + ki) * Wo2 + (s3 * ow + kj)
                        acc3 = acc3 + jnp.dot(y2[p2 * NB:(p2 + 1) * NB, :],
                                              w3_ref[ki * kw3 + kj],
                                              preferred_element_type=jnp.float32)
                out_rows.append(jnp.maximum(acc3 + b3_ref[...], 0.0))
        out = out_rows[0] if len(out_rows) == 1 else jnp.concatenate(out_rows, axis=0)
        o_ref[0] = out.astype(o_ref.dtype)                  # (Ho3*Wo3*NB, C3)
    return kernel


def cnn_feature_extractor(x_nchw, params):
    """Forward pass: x is NCHW float32, returns (N, feature_size) float32."""
    (w1, b1), (w2, b2), (w3, b3) = params
    s1, s2, s3 = 4, 2, 1
    N = x_nchw.shape[0]
    x = jnp.transpose(x_nchw, (0, 2, 3, 1))                 # NCHW -> NHWC

    patches1, w1mat, Ho1, Wo1 = _conv1_patches_and_weight(x, w1, s1)
    C1, K1 = w1.shape[0], w1mat.shape[0]
    kh2, kw2, C2 = w2.shape[2], w2.shape[3], w2.shape[0]
    Ho2, Wo2 = _conv_out(Ho1, kh2, s2), _conv_out(Wo1, kw2, s2)
    kh3, kw3, C3 = w3.shape[2], w3.shape[3], w3.shape[0]
    Ho3, Wo3 = _conv_out(Ho2, kh3, s3), _conv_out(Wo2, kw3, s3)

    # weight / bias layouts consumed by the kernel (real, unpadded K everywhere)
    w2mat = jnp.transpose(w2, (2, 3, 1, 0)).reshape(kh2 * kw2, C1, C2).astype(jnp.float32)
    w3mat = jnp.transpose(w3, (2, 3, 1, 0)).reshape(kh3 * kw3, C2, C3).astype(jnp.float32)
    b1m = b1.reshape(1, C1).astype(jnp.float32)
    b2m = b2.reshape(1, C2).astype(jnp.float32)
    b3m = b3.reshape(1, C3).astype(jnp.float32)

    # Two "parallel" batch groups keep both v7x TensorCores busy (free on v5e/v6e).
    # TODO(synk): pick more groups / tile M further for large batches or inputs.
    G = 2 if (N >= 2 and N % 2 == 0) else 1
    NB = N // G
    tm1 = NB * Ho1 * Wo1
    m_out = Ho3 * Wo3 * NB

    kernel = _make_fused_kernel(NB, Ho1, Wo1, C1, kh2, kw2, s2, Ho2, Wo2, C2,
                                kh3, kw3, s3, Ho3, Wo3, C3)

    m1, m2t, m3t = N * Ho1 * Wo1, N * Ho2 * Wo2, N * Ho3 * Wo3
    k2, k3 = kh2 * kw2 * C1, kh3 * kw3 * C2
    cost = pl.CostEstimate(
        flops=2 * (m1 * K1 * C1 + m2t * k2 * C2 + m3t * k3 * C3),
        transcendentals=0,
        bytes_accessed=(patches1.size * 2 + w1mat.size * 2
                        + (w2mat.size + w3mat.size + b1m.size + b2m.size + b3m.size) * 4
                        + G * m_out * C3 * 4),
    )

    out = pl.pallas_call(
        kernel,
        out_shape=jax.ShapeDtypeStruct((G, m_out, C3), jnp.float32),
        grid=(G,),
        in_specs=[
            pl.BlockSpec((tm1, K1), lambda g: (g, 0)),
            pl.BlockSpec((K1, C1), lambda g: (0, 0)),
            pl.BlockSpec((1, C1), lambda g: (0, 0)),
            pl.BlockSpec((kh2 * kw2, C1, C2), lambda g: (0, 0, 0)),
            pl.BlockSpec((1, C2), lambda g: (0, 0)),
            pl.BlockSpec((kh3 * kw3, C2, C3), lambda g: (0, 0, 0)),
            pl.BlockSpec((1, C3), lambda g: (0, 0)),
        ],
        out_specs=pl.BlockSpec((1, m_out, C3), lambda g: (g, 0, 0)),
        compiler_params=pltpu.CompilerParams(dimension_semantics=("parallel",)),
        cost_estimate=cost,
    )(patches1, w1mat, b1m, w2mat, b2m, w3mat, b3m)

    # rows inside each group are ordered (spatial position, image); rearrange to
    # match torch.nn.Flatten over NCHW.
    out = out.reshape(G, Ho3, Wo3, NB, C3).transpose(0, 3, 4, 1, 2)
    return out.reshape(N, C3 * Ho3 * Wo3)


# ---------------------------------------------------------------------------
# Safety-net path: unfused per-layer Pallas GEMMs (unpadded K, bf16 intermediates).
# Only used if the fused kernel fails to lower on this toolchain.
# ---------------------------------------------------------------------------
def _gemm_bias_relu_kernel(p_ref, w_ref, b_ref, o_ref):
    acc = jnp.dot(p_ref[...], w_ref[...], preferred_element_type=jnp.float32)
    o_ref[...] = jnp.maximum(acc + b_ref[...], 0.0).astype(o_ref.dtype)


def _conv2d_relu_gemm(x_nhwc, w_oihw, b, stride, out_dtype):
    N, H, W, C = x_nhwc.shape
    Co, Ci, kh, kw = w_oihw.shape
    Ho, Wo = _conv_out(H, kh, stride), _conv_out(W, kw, stride)
    xb = x_nhwc.astype(jnp.bfloat16)
    patches = jnp.stack(
        [xb[:, i:i + stride * Ho:stride, j:j + stride * Wo:stride, :]
         for i in range(kh) for j in range(kw)], axis=3,
    ).reshape(N * Ho * Wo, kh * kw * C)
    wmat = jnp.transpose(w_oihw, (2, 3, 1, 0)).reshape(kh * kw * Ci, Co).astype(jnp.bfloat16)
    bmat = b.reshape(1, Co).astype(jnp.float32)
    M, K = patches.shape
    TM = min(256, max(16, ((M + 15) // 16) * 16))
    Mp = ((M + TM - 1) // TM) * TM
    patches = jnp.pad(patches, ((0, Mp - M), (0, 0)))
    out = pl.pallas_call(
        _gemm_bias_relu_kernel,
        out_shape=jax.ShapeDtypeStruct((Mp, Co), out_dtype),
        grid=(Mp // TM,),
        in_specs=[pl.BlockSpec((TM, K), lambda m: (m, 0)),
                  pl.BlockSpec((K, Co), lambda m: (0, 0)),
                  pl.BlockSpec((1, Co), lambda m: (0, 0))],
        out_specs=pl.BlockSpec((TM, Co), lambda m: (m, 0)),
        compiler_params=pltpu.CompilerParams(dimension_semantics=("parallel",)),
    )(patches, wmat, bmat)
    return out[:M].reshape(N, Ho, Wo, Co)


def _cnn_forward_unfused(x_nchw, params):
    (w1, b1), (w2, b2), (w3, b3) = params
    x = jnp.transpose(x_nchw, (0, 2, 3, 1))
    x = _conv2d_relu_gemm(x, w1, b1, 4, jnp.bfloat16)
    x = _conv2d_relu_gemm(x, w2, b2, 2, jnp.bfloat16)
    x = _conv2d_relu_gemm(x, w3, b3, 1, jnp.float32)
    N = x.shape[0]
    x = jnp.transpose(x, (0, 3, 1, 2)).astype(jnp.float32)  # match NCHW flatten
    return x.reshape(N, -1)


# ---------------------------------------------------------------------------
# Params / reference
# ---------------------------------------------------------------------------
def init_params(key, in_channels):
    """Deterministic init mimicking PyTorch Conv2d default (uniform +-1/sqrt(fan_in))."""
    specs = [(32, in_channels, 8, 8), (64, 32, 4, 4), (64, 64, 3, 3)]
    params = []
    for i, (co, ci, kh, kw) in enumerate(specs):
        k_w, k_b = jax.random.split(jax.random.fold_in(key, i))
        bound = 1.0 / np.sqrt(ci * kh * kw)
        w = jax.random.uniform(k_w, (co, ci, kh, kw), jnp.float32, -bound, bound)
        b = jax.random.uniform(k_b, (co,), jnp.float32, -bound, bound)
        params.append((w, b))
    return params


def reference_forward(x_nchw, params):
    """Pure-JAX f32 reference (lax conv) for correctness checking."""
    strides = (4, 2, 1)
    x = x_nchw
    for (w, b), s in zip(params, strides):
        x = jax.lax.conv_general_dilated(
            x, w, (s, s), 'VALID', dimension_numbers=('NCHW', 'OIHW', 'NCHW'))
        x = jnp.maximum(x + b.reshape(1, -1, 1, 1), 0.0)
    return x.reshape(x.shape[0], -1)


if __name__ == "__main__":
    key = jax.random.PRNGKey(0)
    kx, kp = jax.random.split(key)

    # (channels, height, width) = (4, 36, 36) is the smallest spatial size the
    # 8/4 -> 4/2 -> 3/1 conv stack admits; batch=8 gives two parallel batch groups.
    input_shape = (4, 36, 36)
    batch = 8
    x = jax.random.normal(kx, (batch,) + input_shape, jnp.float32)
    params = init_params(kp, input_shape[0])

    try:
        out = jax.block_until_ready(jax.jit(cnn_feature_extractor)(x, params))
    except Exception:
        # Safety net: unfused per-layer Pallas GEMM path.
        out = jax.block_until_ready(jax.jit(_cnn_forward_unfused)(x, params))

    ref = reference_forward(x, params)
    assert out.shape == ref.shape == (batch, 64), out.shape
    np.testing.assert_allclose(np.asarray(out), np.asarray(ref), rtol=2e-2, atol=2e-2)
    print("KERNEL_OK")
</pallas_src>

<mosaic_0001>
module attributes {stable_mosaic.version = 11 : i64} {
  func.func @kernel(%arg0: i32, %arg1: memref<256x256xbf16, #tpu.memory_space<vmem>>, %arg2: memref<256x32xbf16, #tpu.memory_space<vmem>>, %arg3: memref<1x32xf32, #tpu.memory_space<vmem>>, %arg4: memref<16x32x64xf32, #tpu.memory_space<vmem>>, %arg5: memref<1x64xf32, #tpu.memory_space<vmem>>, %arg6: memref<9x64x64xf32, #tpu.memory_space<vmem>>, %arg7: memref<1x64xf32, #tpu.memory_space<vmem>>, %arg8: memref<1x4x64xf32, #tpu.memory_space<vmem>>) attributes {dimension_semantics = [#tpu.dimension_semantics<parallel>], iteration_bounds = array<i64: 2>, scalar_prefetch = 0 : i64, scratch_operands = 0 : i64, tpu.core_type = #tpu.core_type<tc>, window_params = [{transform_indices = @transform_0, window_bounds = array<i64: 256, 256>}, {pipeline_mode = #tpu.pipeline_mode<synchronous>, transform_indices = @transform_1, window_bounds = array<i64: 256, 32>}, {pipeline_mode = #tpu.pipeline_mode<synchronous>, transform_indices = @transform_2, window_bounds = array<i64: 1, 32>}, {pipeline_mode = #tpu.pipeline_mode<synchronous>, transform_indices = @transform_3, window_bounds = array<i64: 16, 32, 64>}, {pipeline_mode = #tpu.pipeline_mode<synchronous>, transform_indices = @transform_4, window_bounds = array<i64: 1, 64>}, {pipeline_mode = #tpu.pipeline_mode<synchronous>, transform_indices = @transform_5, window_bounds = array<i64: 9, 64, 64>}, {pipeline_mode = #tpu.pipeline_mode<synchronous>, transform_indices = @transform_6, window_bounds = array<i64: 1, 64>}, {transform_indices = @transform_7, window_bounds = array<i64: 1, 4, 64>}]} {
    %c0 = arith.constant 0 : index
    %c0_0 = arith.constant 0 : index
    %0 = vector.load %arg1[%c0, %c0_0] : memref<256x256xbf16, #tpu.memory_space<vmem>>, vector<256x256xbf16>
    %c0_1 = arith.constant 0 : index
    %c0_2 = arith.constant 0 : index
    %1 = vector.load %arg2[%c0_1, %c0_2] : memref<256x32xbf16, #tpu.memory_space<vmem>>, vector<256x32xbf16>
    %cst = arith.constant dense<0.000000e+00> : vector<256x32xf32>
    %2 = tpu.matmul %0, %1, %cst {dimension_numbers = #tpu.dot_dimension_numbers<[1], [0], [0], [1], [0, 0, 1, 1], [], []>} : vector<256x256xbf16>, vector<256x32xbf16>, vector<256x32xf32> -> vector<256x32xf32>
    %c0_3 = arith.constant 0 : index
    %c0_4 = arith.constant 0 : index
    %3 = vector.load %arg3[%c0_3, %c0_4] : memref<1x32xf32, #tpu.memory_space<vmem>>, vector<1x32xf32>
    %4 = vector.broadcast %3 : vector<1x32xf32> to vector<256x32xf32>
    %5 = arith.addf %2, %4 : vector<256x32xf32>
    %cst_5 = arith.constant 0.000000e+00 : f32
    %6 = vector.broadcast %cst_5 : f32 to vector<256x32xf32>
    %7 = arith.maximumf %5, %6 : vector<256x32xf32>
    %8 = vector.shape_cast %7 : vector<256x32xf32> to vector<4x8x8x32xf32>
    %9 = vector.extract_strided_slice %8 {offsets = [0, 0, 0, 0], sizes = [4, 4, 4, 32], strides = [1, 1, 1, 1]} : vector<4x8x8x32xf32> to vector<4x4x4x32xf32>
    %10 = vector.extract_strided_slice %8 {offsets = [0, 0, 2, 0], sizes = [4, 4, 4, 32], strides = [1, 1, 1, 1]} : vector<4x8x8x32xf32> to vector<4x4x4x32xf32>
    %11 = vector.extract_strided_slice %8 {offsets = [0, 0, 4, 0], sizes = [4, 4, 4, 32], strides = [1, 1, 1, 1]} : vector<4x8x8x32xf32> to vector<4x4x4x32xf32>
    %12 = vector.extract_strided_slice %8 {offsets = [0, 2, 0, 0], sizes = [4, 4, 4, 32], strides = [1, 1, 1, 1]} : vector<4x8x8x32xf32> to vector<4x4x4x32xf32>
    %13 = vector.extract_strided_slice %8 {offsets = [0, 2, 2, 0], sizes = [4, 4, 4, 32], strides = [1, 1, 1, 1]} : vector<4x8x8x32xf32> to vector<4x4x4x32xf32>
    %14 = vector.extract_strided_slice %8 {offsets = [0, 2, 4, 0], sizes = [4, 4, 4, 32], strides = [1, 1, 1, 1]} : vector<4x8x8x32xf32> to vector<4x4x4x32xf32>
    %15 = vector.extract_strided_slice %8 {offsets = [0, 4, 0, 0], sizes = [4, 4, 4, 32], strides = [1, 1, 1, 1]} : vector<4x8x8x32xf32> to vector<4x4x4x32xf32>
    %16 = vector.extract_strided_slice %8 {offsets = [0, 4, 2, 0], sizes = [4, 4, 4, 32], strides = [1, 1, 1, 1]} : vector<4x8x8x32xf32> to vector<4x4x4x32xf32>
    %17 = vector.extract_strided_slice %8 {offsets = [0, 4, 4, 0], sizes = [4, 4, 4, 32], strides = [1, 1, 1, 1]} : vector<4x8x8x32xf32> to vector<4x4x4x32xf32>
    %18 = tpu.concatenate %9, %10, %11, %12, %13, %14, %15, %16, %17 in 0 : vector<4x4x4x32xf32>, vector<4x4x4x32xf32>, vector<4x4x4x32xf32>, vector<4x4x4x32xf32>, vector<4x4x4x32xf32>, vector<4x4x4x32xf32>, vector<4x4x4x32xf32>, vector<4x4x4x32xf32>, vector<4x4x4x32xf32> -> vector<36x4x4x32xf32>
    %cst_6 = arith.constant 0.000000e+00 : f32
    %19 = vector.broadcast %cst_6 : f32 to vector<36x64xf32>
    %20 = vector.extract_strided_slice %18 {offsets = [0, 0, 0, 0], sizes = [36, 1, 1, 32], strides = [1, 1, 1, 1]} : vector<36x4x4x32xf32> to vector<36x1x1x32xf32>
    %21 = vector.shape_cast %20 : vector<36x1x1x32xf32> to vector<36x32xf32>
    %c0_7 = arith.constant 0 : index
    %c0_8 = arith.constant 0 : index
    %c0_9 = arith.constant 0 : index
    %22 = vector.load %arg4[%c0_7, %c0_8, %c0_9] : memref<16x32x64xf32, #tpu.memory_space<vmem>>, vector<1x32x64xf32>
    %23 = vector.shape_cast %22 : vector<1x32x64xf32> to vector<32x64xf32>
    %cst_10 = arith.constant dense<0.000000e+00> : vector<36x64xf32>
    %24 = tpu.matmul %21, %23, %cst_10 {dimension_numbers = #tpu.dot_dimension_numbers<[1], [0], [0], [1], [0, 0, 1, 1], [], []>} : vector<36x32xf32>, vector<32x64xf32>, vector<36x64xf32> -> vector<36x64xf32>
    %25 = arith.addf %19, %24 : vector<36x64xf32>
    %26 = vector.extract_strided_slice %18 {offsets = [0, 0, 1, 0], sizes = [36, 1, 1, 32], strides = [1, 1, 1, 1]} : vector<36x4x4x32xf32> to vector<36x1x1x32xf32>
    %27 = vector.shape_cast %26 : vector<36x1x1x32xf32> to vector<36x32xf32>
    %c1 = arith.constant 1 : index
    %c0_11 = arith.constant 0 : index
    %c0_12 = arith.constant 0 : index
    %28 = vector.load %arg4[%c1, %c0_11, %c0_12] : memref<16x32x64xf32, #tpu.memory_space<vmem>>, vector<1x32x64xf32>
    %29 = vector.shape_cast %28 : vector<1x32x64xf32> to vector<32x64xf32>
    %cst_13 = arith.constant dense<0.000000e+00> : vector<36x64xf32>
    %30 = tpu.matmul %27, %29, %cst_13 {dimension_numbers = #tpu.dot_dimension_numbers<[1], [0], [0], [1], [0, 0, 1, 1], [], []>} : vector<36x32xf32>, vector<32x64xf32>, vector<36x64xf32> -> vector<36x64xf32>
    %31 = arith.addf %25, %30 : vector<36x64xf32>
    %32 = vector.extract_strided_slice %18 {offsets = [0, 0, 2, 0], sizes = [36, 1, 1, 32], strides = [1, 1, 1, 1]} : vector<36x4x4x32xf32> to vector<36x1x1x32xf32>
    %33 = vector.shape_cast %32 : vector<36x1x1x32xf32> to vector<36x32xf32>
    %c2 = arith.constant 2 : index
    %c0_14 = arith.constant 0 : index
    %c0_15 = arith.constant 0 : index
    %34 = vector.load %arg4[%c2, %c0_14, %c0_15] : memref<16x32x64xf32, #tpu.memory_space<vmem>>, vector<1x32x64xf32>
    %35 = vector.shape_cast %34 : vector<1x32x64xf32> to vector<32x64xf32>
    %cst_16 = arith.constant dense<0.000000e+00> : vector<36x64xf32>
    %36 = tpu.matmul %33, %35, %cst_16 {dimension_numbers = #tpu.dot_dimension_numbers<[1], [0], [0], [1], [0, 0, 1, 1], [], []>} : vector<36x32xf32>, vector<32x64xf32>, vector<36x64xf32> -> vector<36x64xf32>
    %37 = arith.addf %31, %36 : vector<36x64xf32>
    %38 = vector.extract_strided_slice %18 {offsets = [0, 0, 3, 0], sizes = [36, 1, 1, 32], strides = [1, 1, 1, 1]} : vector<36x4x4x32xf32> to vector<36x1x1x32xf32>
    %39 = vector.shape_cast %38 : vector<36x1x1x32xf32> to vector<36x32xf32>
    %c3 = arith.constant 3 : index
    %c0_17 = arith.constant 0 : index
    %c0_18 = arith.constant 0 : index
    %40 = vector.load %arg4[%c3, %c0_17, %c0_18] : memref<16x32x64xf32, #tpu.memory_space<vmem>>, vector<1x32x64xf32>
    %41 = vector.shape_cast %40 : vector<1x32x64xf32> to vector<32x64xf32>
    %cst_19 = arith.constant dense<0.000000e+00> : vector<36x64xf32>
    %42 = tpu.matmul %39, %41, %cst_19 {dimension_numbers = #tpu.dot_dimension_numbers<[1], [0], [0], [1], [0, 0, 1, 1], [], []>} : vector<36x32xf32>, vector<32x64xf32>, vector<36x64xf32> -> vector<36x64xf32>
    %43 = arith.addf %37, %42 : vector<36x64xf32>
    %44 = vector.extract_strided_slice %18 {offsets = [0, 1, 0, 0], sizes = [36, 1, 1, 32], strides = [1, 1, 1, 1]} : vector<36x4x4x32xf32> to vector<36x1x1x32xf32>
    %45 = vector.shape_cast %44 : vector<36x1x1x32xf32> to vector<36x32xf32>
    %c4 = arith.constant 4 : index
    %c0_20 = arith.constant 0 : index
    %c0_21 = arith.constant 0 : index
    %46 = vector.load %arg4[%c4, %c0_20, %c0_21] : memref<16x32x64xf32, #tpu.memory_space<vmem>>, vector<1x32x64xf32>
    %47 = vector.shape_cast %46 : vector<1x32x64xf32> to vector<32x64xf32>
    %cst_22 = arith.constant dense<0.000000e+00> : vector<36x64xf32>
    %48 = tpu.matmul %45, %47, %cst_22 {dimension_numbers = #tpu.dot_dimension_numbers<[1], [0], [0], [1], [0, 0, 1, 1], [], []>} : vector<36x32xf32>, vector<32x64xf32>, vector<36x64xf32> -> vector<36x64xf32>
    %49 = arith.addf %43, %48 : vector<36x64xf32>
    %50 = vector.extract_strided_slice %18 {offsets = [0, 1, 1, 0], sizes = [36, 1, 1, 32], strides = [1, 1, 1, 1]} : vector<36x4x4x32xf32> to vector<36x1x1x32xf32>
    %51 = vector.shape_cast %50 : vector<36x1x1x32xf32> to vector<36x32xf32>
    %c5 = arith.constant 5 : index
    %c0_23 = arith.constant 0 : index
    %c0_24 = arith.constant 0 : index
    %52 = vector.load %arg4[%c5, %c0_23, %c0_24] : memref<16x32x64xf32, #tpu.memory_space<vmem>>, vector<1x32x64xf32>
    %53 = vector.shape_cast %52 : vector<1x32x64xf32> to vector<32x64xf32>
    %cst_25 = arith.constant dense<0.000000e+00> : vector<36x64xf32>
    %54 = tpu.matmul %51, %53, %cst_25 {dimension_numbers = #tpu.dot_dimension_numbers<[1], [0], [0], [1], [0, 0, 1, 1], [], []>} : vector<36x32xf32>, vector<32x64xf32>, vector<36x64xf32> -> vector<36x64xf32>
    %55 = arith.addf %49, %54 : vector<36x64xf32>
    %56 = vector.extract_strided_slice %18 {offsets = [0, 1, 2, 0], sizes = [36, 1, 1, 32], strides = [1, 1, 1, 1]} : vector<36x4x4x32xf32> to vector<36x1x1x32xf32>
    %57 = vector.shape_cast %56 : vector<36x1x1x32xf32> to vector<36x32xf32>
    %c6 = arith.constant 6 : index
    %c0_26 = arith.constant 0 : index
    %c0_27 = arith.constant 0 : index
    %58 = vector.load %arg4[%c6, %c0_26, %c0_27] : memref<16x32x64xf32, #tpu.memory_space<vmem>>, vector<1x32x64xf32>
    %59 = vector.shape_cast %58 : vector<1x32x64xf32> to vector<32x64xf32>
    %cst_28 = arith.constant dense<0.000000e+00> : vector<36x64xf32>
    %60 = tpu.matmul %57, %59, %cst_28 {dimension_numbers = #tpu.dot_dimension_numbers<[1], [0], [0], [1], [0, 0, 1, 1], [], []>} : vector<36x32xf32>, vector<32x64xf32>, vector<36x64xf32> -> vector<36x64xf32>
    %61 = arith.addf %55, %60 : vector<36x64xf32>
    %62 = vector.extract_strided_slice %18 {offsets = [0, 1, 3, 0], sizes = [36, 1, 1, 32], strides = [1, 1, 1, 1]} : vector<36x4x4x32xf32> to vector<36x1x1x32xf32>
    %63 = vector.shape_cast %62 : vector<36x1x1x32xf32> to vector<36x32xf32>
    %c7 = arith.constant 7 : index
    %c0_29 = arith.constant 0 : index
    %c0_30 = arith.constant 0 : index
    %64 = vector.load %arg4[%c7, %c0_29, %c0_30] : memref<16x32x64xf32, #tpu.memory_space<vmem>>, vector<1x32x64xf32>
    %65 = vector.shape_cast %64 : vector<1x32x64xf32> to vector<32x64xf32>
    %cst_31 = arith.constant dense<0.000000e+00> : vector<36x64xf32>
    %66 = tpu.matmul %63, %65, %cst_31 {dimension_numbers = #tpu.dot_dimension_numbers<[1], [0], [0], [1], [0, 0, 1, 1], [], []>} : vector<36x32xf32>, vector<32x64xf32>, vector<36x64xf32> -> vector<36x64xf32>
    %67 = arith.addf %61, %66 : vector<36x64xf32>
    %68 = vector.extract_strided_slice %18 {offsets = [0, 2, 0, 0], sizes = [36, 1, 1, 32], strides = [1, 1, 1, 1]} : vector<36x4x4x32xf32> to vector<36x1x1x32xf32>
    %69 = vector.shape_cast %68 : vector<36x1x1x32xf32> to vector<36x32xf32>
    %c8 = arith.constant 8 : index
    %c0_32 = arith.constant 0 : index
    %c0_33 = arith.constant 0 : index
    %70 = vector.load %arg4[%c8, %c0_32, %c0_33] : memref<16x32x64xf32, #tpu.memory_space<vmem>>, vector<1x32x64xf32>
    %71 = vector.shape_cast %70 : vector<1x32x64xf32> to vector<32x64xf32>
    %cst_34 = arith.constant dense<0.000000e+00> : vector<36x64xf32>
    %72 = tpu.matmul %69, %71, %cst_34 {dimension_numbers = #tpu.dot_dimension_numbers<[1], [0], [0], [1], [0, 0, 1, 1], [], []>} : vector<36x32xf32>, vector<32x64xf32>, vector<36x64xf32> -> vector<36x64xf32>
    %73 = arith.addf %67, %72 : vector<36x64xf32>
    %74 = vector.extract_strided_slice %18 {offsets = [0, 2, 1, 0], sizes = [36, 1, 1, 32], strides = [1, 1, 1, 1]} : vector<36x4x4x32xf32> to vector<36x1x1x32xf32>
    %75 = vector.shape_cast %74 : vector<36x1x1x32xf32> to vector<36x32xf32>
    %c9 = arith.constant 9 : index
    %c0_35 = arith.constant 0 : index
    %c0_36 = arith.constant 0 : index
    %76 = vector.load %arg4[%c9, %c0_35, %c0_36] : memref<16x32x64xf32, #tpu.memory_space<vmem>>, vector<1x32x64xf32>
    %77 = vector.shape_cast %76 : vector<1x32x64xf32> to vector<32x64xf32>
    %cst_37 = arith.constant dense<0.000000e+00> : vector<36x64xf32>
    %78 = tpu.matmul %75, %77, %cst_37 {dimension_numbers = #tpu.dot_dimension_numbers<[1], [0], [0], [1], [0, 0, 1, 1], [], []>} : vector<36x32xf32>, vector<32x64xf32>, vector<36x64xf32> -> vector<36x64xf32>
    %79 = arith.addf %73, %78 : vector<36x64xf32>
    %80 = vector.extract_strided_slice %18 {offsets = [0, 2, 2, 0], sizes = [36, 1, 1, 32], strides = [1, 1, 1, 1]} : vector<36x4x4x32xf32> to vector<36x1x1x32xf32>
    %81 = vector.shape_cast %80 : vector<36x1x1x32xf32> to vector<36x32xf32>
    %c10 = arith.constant 10 : index
    %c0_38 = arith.constant 0 : index
    %c0_39 = arith.constant 0 : index
    %82 = vector.load %arg4[%c10, %c0_38, %c0_39] : memref<16x32x64xf32, #tpu.memory_space<vmem>>, vector<1x32x64xf32>
    %83 = vector.shape_cast %82 : vector<1x32x64xf32> to vector<32x64xf32>
    %cst_40 = arith.constant dense<0.000000e+00> : vector<36x64xf32>
    %84 = tpu.matmul %81, %83, %cst_40 {dimension_numbers = #tpu.dot_dimension_numbers<[1], [0], [0], [1], [0, 0, 1, 1], [], []>} : vector<36x32xf32>, vector<32x64xf32>, vector<36x64xf32> -> vector<36x64xf32>
    %85 = arith.addf %79, %84 : vector<36x64xf32>
    %86 = vector.extract_strided_slice %18 {offsets = [0, 2, 3, 0], sizes = [36, 1, 1, 32], strides = [1, 1, 1, 1]} : vector<36x4x4x32xf32> to vector<36x1x1x32xf32>
    %87 = vector.shape_cast %86 : vector<36x1x1x32xf32> to vector<36x32xf32>
    %c11 = arith.constant 11 : index
    %c0_41 = arith.constant 0 : index
    %c0_42 = arith.constant 0 : index
    %88 = vector.load %arg4[%c11, %c0_41, %c0_42] : memref<16x32x64xf32, #tpu.memory_space<vmem>>, vector<1x32x64xf32>
    %89 = vector.shape_cast %88 : vector<1x32x64xf32> to vector<32x64xf32>
    %cst_43 = arith.constant dense<0.000000e+00> : vector<36x64xf32>
    %90 = tpu.matmul %87, %89, %cst_43 {dimension_numbers = #tpu.dot_dimension_numbers<[1], [0], [0], [1], [0, 0, 1, 1], [], []>} : vector<36x32xf32>, vector<32x64xf32>, vector<36x64xf32> -> vector<36x64xf32>
    %91 = arith.addf %85, %90 : vector<36x64xf32>
    %92 = vector.extract_strided_slice %18 {offsets = [0, 3, 0, 0], sizes = [36, 1, 1, 32], strides = [1, 1, 1, 1]} : vector<36x4x4x32xf32> to vector<36x1x1x32xf32>
    %93 = vector.shape_cast %92 : vector<36x1x1x32xf32> to vector<36x32xf32>
    %c12 = arith.constant 12 : index
    %c0_44 = arith.constant 0 : index
    %c0_45 = arith.constant 0 : index
    %94 = vector.load %arg4[%c12, %c0_44, %c0_45] : memref<16x32x64xf32, #tpu.memory_space<vmem>>, vector<1x32x64xf32>
    %95 = vector.shape_cast %94 : vector<1x32x64xf32> to vector<32x64xf32>
    %cst_46 = arith.constant dense<0.000000e+00> : vector<36x64xf32>
    %96 = tpu.matmul %93, %95, %cst_46 {dimension_numbers = #tpu.dot_dimension_numbers<[1], [0], [0], [1], [0, 0, 1, 1], [], []>} : vector<36x32xf32>, vector<32x64xf32>, vector<36x64xf32> -> vector<36x64xf32>
    %97 = arith.addf %91, %96 : vector<36x64xf32>
    %98 = vector.extract_strided_slice %18 {offsets = [0, 3, 1, 0], sizes = [36, 1, 1, 32], strides = [1, 1, 1, 1]} : vector<36x4x4x32xf32> to vector<36x1x1x32xf32>
    %99 = vector.shape_cast %98 : vector<36x1x1x32xf32> to vector<36x32xf32>
    %c13 = arith.constant 13 : index
    %c0_47 = arith.constant 0 : index
    %c0_48 = arith.constant 0 : index
    %100 = vector.load %arg4[%c13, %c0_47, %c0_48] : memref<16x32x64xf32, #tpu.memory_space<vmem>>, vector<1x32x64xf32>
    %101 = vector.shape_cast %100 : vector<1x32x64xf32> to vector<32x64xf32>
    %cst_49 = arith.constant dense<0.000000e+00> : vector<36x64xf32>
    %102 = tpu.matmul %99, %101, %cst_49 {dimension_numbers = #tpu.dot_dimension_numbers<[1], [0], [0], [1], [0, 0, 1, 1], [], []>} : vector<36x32xf32>, vector<32x64xf32>, vector<36x64xf32> -> vector<36x64xf32>
    %103 = arith.addf %97, %102 : vector<36x64xf32>
    %104 = vector.extract_strided_slice %18 {offsets = [0, 3, 2, 0], sizes = [36, 1, 1, 32], strides = [1, 1, 1, 1]} : vector<36x4x4x32xf32> to vector<36x1x1x32xf32>
    %105 = vector.shape_cast %104 : vector<36x1x1x32xf32> to vector<36x32xf32>
    %c14 = arith.constant 14 : index
    %c0_50 = arith.constant 0 : index
    %c0_51 = arith.constant 0 : index
    %106 = vector.load %arg4[%c14, %c0_50, %c0_51] : memref<16x32x64xf32, #tpu.memory_space<vmem>>, vector<1x32x64xf32>
    %107 = vector.shape_cast %106 : vector<1x32x64xf32> to vector<32x64xf32>
    %cst_52 = arith.constant dense<0.000000e+00> : vector<36x64xf32>
    %108 = tpu.matmul %105, %107, %cst_52 {dimension_numbers = #tpu.dot_dimension_numbers<[1], [0], [0], [1], [0, 0, 1, 1], [], []>} : vector<36x32xf32>, vector<32x64xf32>, vector<36x64xf32> -> vector<36x64xf32>
    %109 = arith.addf %103, %108 : vector<36x64xf32>
    %110 = vector.extract_strided_slice %18 {offsets = [0, 3, 3, 0], sizes = [36, 1, 1, 32], strides = [1, 1, 1, 1]} : vector<36x4x4x32xf32> to vector<36x1x1x32xf32>
    %111 = vector.shape_cast %110 : vector<36x1x1x32xf32> to vector<36x32xf32>
    %c15 = arith.constant 15 : index
    %c0_53 = arith.constant 0 : index
    %c0_54 = arith.constant 0 : index
    %112 = vector.load %arg4[%c15, %c0_53, %c0_54] : memref<16x32x64xf32, #tpu.memory_space<vmem>>, vector<1x32x64xf32>
    %113 = vector.shape_cast %112 : vector<1x32x64xf32> to vector<32x64xf32>
    %cst_55 = arith.constant dense<0.000000e+00> : vector<36x64xf32>
    %114 = tpu.matmul %111, %113, %cst_55 {dimension_numbers = #tpu.dot_dimension_numbers<[1], [0], [0], [1], [0, 0, 1, 1], [], []>} : vector<36x32xf32>, vector<32x64xf32>, vector<36x64xf32> -> vector<36x64xf32>
    %115 = arith.addf %109, %114 : vector<36x64xf32>
    %c0_56 = arith.constant 0 : index
    %c0_57 = arith.constant 0 : index
    %116 = vector.load %arg5[%c0_56, %c0_57] : memref<1x64xf32, #tpu.memory_space<vmem>>, vector<1x64xf32>
    %117 = vector.broadcast %116 : vector<1x64xf32> to vector<36x64xf32>
    %118 = arith.addf %115, %117 : vector<36x64xf32>
    %cst_58 = arith.constant 0.000000e+00 : f32
    %119 = vector.broadcast %cst_58 : f32 to vector<36x64xf32>
    %120 = arith.maximumf %118, %119 : vector<36x64xf32>
    %cst_59 = arith.constant 0.000000e+00 : f32
    %121 = vector.broadcast %cst_59 : f32 to vector<4x64xf32>
    %122 = vector.extract_strided_slice %120 {offsets = [0, 0], sizes = [4, 64], strides = [1, 1]} : vector<36x64xf32> to vector<4x64xf32>
    %c0_60 = arith.constant 0 : index
    %c0_61 = arith.constant 0 : index
    %c0_62 = arith.constant 0 : index
    %123 = vector.load %arg6[%c0_60, %c0_61, %c0_62] : memref<9x64x64xf32, #tpu.memory_space<vmem>>, vector<1x64x64xf32>
    %124 = vector.shape_cast %123 : vector<1x64x64xf32> to vector<64x64xf32>
    %cst_63 = arith.constant dense<0.000000e+00> : vector<4x64xf32>
    %125 = tpu.matmul %122, %124, %cst_63 {dimension_numbers = #tpu.dot_dimension_numbers<[1], [0], [0], [1], [0, 0, 1, 1], [], []>} : vector<4x64xf32>, vector<64x64xf32>, vector<4x64xf32> -> vector<4x64xf32>
    %126 = arith.addf %121, %125 : vector<4x64xf32>
    %127 = vector.extract_strided_slice %120 {offsets = [4, 0], sizes = [4, 64], strides = [1, 1]} : vector<36x64xf32> to vector<4x64xf32>
    %c1_64 = arith.constant 1 : index
    %c0_65 = arith.constant 0 : index
    %c0_66 = arith.constant 0 : index
    %128 = vector.load %arg6[%c1_64, %c0_65, %c0_66] : memref<9x64x64xf32, #tpu.memory_space<vmem>>, vector<1x64x64xf32>
    %129 = vector.shape_cast %128 : vector<1x64x64xf32> to vector<64x64xf32>
    %cst_67 = arith.constant dense<0.000000e+00> : vector<4x64xf32>
    %130 = tpu.matmul %127, %129, %cst_67 {dimension_numbers = #tpu.dot_dimension_numbers<[1], [0], [0], [1], [0, 0, 1, 1], [], []>} : vector<4x64xf32>, vector<64x64xf32>, vector<4x64xf32> -> vector<4x64xf32>
    %131 = arith.addf %126, %130 : vector<4x64xf32>
    %132 = vector.extract_strided_slice %120 {offsets = [8, 0], sizes = [4, 64], strides = [1, 1]} : vector<36x64xf32> to vector<4x64xf32>
    %c2_68 = arith.constant 2 : index
    %c0_69 = arith.constant 0 : index
    %c0_70 = arith.constant 0 : index
    %133 = vector.load %arg6[%c2_68, %c0_69, %c0_70] : memref<9x64x64xf32, #tpu.memory_space<vmem>>, vector<1x64x64xf32>
    %134 = vector.shape_cast %133 : vector<1x64x64xf32> to vector<64x64xf32>
    %cst_71 = arith.constant dense<0.000000e+00> : vector<4x64xf32>
    %135 = tpu.matmul %132, %134, %cst_71 {dimension_numbers = #tpu.dot_dimension_numbers<[1], [0], [0], [1], [0, 0, 1, 1], [], []>} : vector<4x64xf32>, vector<64x64xf32>, vector<4x64xf32> -> vector<4x64xf32>
    %136 = arith.addf %131, %135 : vector<4x64xf32>
    %137 = vector.extract_strided_slice %120 {offsets = [12, 0], sizes = [4, 64], strides = [1, 1]} : vector<36x64xf32> to vector<4x64xf32>
    %c3_72 = arith.constant 3 : index
    %c0_73 = arith.constant 0 : index
    %c0_74 = arith.constant 0 : index
    %138 = vector.load %arg6[%c3_72, %c0_73, %c0_74] : memref<9x64x64xf32, #tpu.memory_space<vmem>>, vector<1x64x64xf32>
    %139 = vector.shape_cast %138 : vector<1x64x64xf32> to vector<64x64xf32>
    %cst_75 = arith.constant dense<0.000000e+00> : vector<4x64xf32>
    %140 = tpu.matmul %137, %139, %cst_75 {dimension_numbers = #tpu.dot_dimension_numbers<[1], [0], [0], [1], [0, 0, 1, 1], [], []>} : vector<4x64xf32>, vector<64x64xf32>, vector<4x64xf32> -> vector<4x64xf32>
    %141 = arith.addf %136, %140 : vector<4x64xf32>
    %142 = vector.extract_strided_slice %120 {offsets = [16, 0], sizes = [4, 64], strides = [1, 1]} : vector<36x64xf32> to vector<4x64xf32>
    %c4_76 = arith.constant 4 : index
    %c0_77 = arith.constant 0 : index
    %c0_78 = arith.constant 0 : index
    %143 = vector.load %arg6[%c4_76, %c0_77, %c0_78] : memref<9x64x64xf32, #tpu.memory_space<vmem>>, vector<1x64x64xf32>
    %144 = vector.shape_cast %143 : vector<1x64x64xf32> to vector<64x64xf32>
    %cst_79 = arith.constant dense<0.000000e+00> : vector<4x64xf32>
    %145 = tpu.matmul %142, %144, %cst_79 {dimension_numbers = #tpu.dot_dimension_numbers<[1], [0], [0], [1], [0, 0, 1, 1], [], []>} : vector<4x64xf32>, vector<64x64xf32>, vector<4x64xf32> -> vector<4x64xf32>
    %146 = arith.addf %141, %145 : vector<4x64xf32>
    %147 = vector.extract_strided_slice %120 {offsets = [20, 0], sizes = [4, 64], strides = [1, 1]} : vector<36x64xf32> to vector<4x64xf32>
    %c5_80 = arith.constant 5 : index
    %c0_81 = arith.constant 0 : index
    %c0_82 = arith.constant 0 : index
    %148 = vector.load %arg6[%c5_80, %c0_81, %c0_82] : memref<9x64x64xf32, #tpu.memory_space<vmem>>, vector<1x64x64xf32>
    %149 = vector.shape_cast %148 : vector<1x64x64xf32> to vector<64x64xf32>
    %cst_83 = arith.constant dense<0.000000e+00> : vector<4x64xf32>
    %150 = tpu.matmul %147, %149, %cst_83 {dimension_numbers = #tpu.dot_dimension_numbers<[1], [0], [0], [1], [0, 0, 1, 1], [], []>} : vector<4x64xf32>, vector<64x64xf32>, vector<4x64xf32> -> vector<4x64xf32>
    %151 = arith.addf %146, %150 : vector<4x64xf32>
    %152 = vector.extract_strided_slice %120 {offsets = [24, 0], sizes = [4, 64], strides = [1, 1]} : vector<36x64xf32> to vector<4x64xf32>
    %c6_84 = arith.constant 6 : index
    %c0_85 = arith.constant 0 : index
    %c0_86 = arith.constant 0 : index
    %153 = vector.load %arg6[%c6_84, %c0_85, %c0_86] : memref<9x64x64xf32, #tpu.memory_space<vmem>>, vector<1x64x64xf32>
    %154 = vector.shape_cast %153 : vector<1x64x64xf32> to vector<64x64xf32>
    %cst_87 = arith.constant dense<0.000000e+00> : vector<4x64xf32>
    %155 = tpu.matmul %152, %154, %cst_87 {dimension_numbers = #tpu.dot_dimension_numbers<[1], [0], [0], [1], [0, 0, 1, 1], [], []>} : vector<4x64xf32>, vector<64x64xf32>, vector<4x64xf32> -> vector<4x64xf32>
    %156 = arith.addf %151, %155 : vector<4x64xf32>
    %157 = vector.extract_strided_slice %120 {offsets = [28, 0], sizes = [4, 64], strides = [1, 1]} : vector<36x64xf32> to vector<4x64xf32>
    %c7_88 = arith.constant 7 : index
    %c0_89 = arith.constant 0 : index
    %c0_90 = arith.constant 0 : index
    %158 = vector.load %arg6[%c7_88, %c0_89, %c0_90] : memref<9x64x64xf32, #tpu.memory_space<vmem>>, vector<1x64x64xf32>
    %159 = vector.shape_cast %158 : vector<1x64x64xf32> to vector<64x64xf32>
    %cst_91 = arith.constant dense<0.000000e+00> : vector<4x64xf32>
    %160 = tpu.matmul %157, %159, %cst_91 {dimension_numbers = #tpu.dot_dimension_numbers<[1], [0], [0], [1], [0, 0, 1, 1], [], []>} : vector<4x64xf32>, vector<64x64xf32>, vector<4x64xf32> -> vector<4x64xf32>
    %161 = arith.addf %156, %160 : vector<4x64xf32>
    %162 = vector.extract_strided_slice %120 {offsets = [32, 0], sizes = [4, 64], strides = [1, 1]} : vector<36x64xf32> to vector<4x64xf32>
    %c8_92 = arith.constant 8 : index
    %c0_93 = arith.constant 0 : index
    %c0_94 = arith.constant 0 : index
    %163 = vector.load %arg6[%c8_92, %c0_93, %c0_94] : memref<9x64x64xf32, #tpu.memory_space<vmem>>, vector<1x64x64xf32>
    %164 = vector.shape_cast %163 : vector<1x64x64xf32> to vector<64x64xf32>
    %cst_95 = arith.constant dense<0.000000e+00> : vector<4x64xf32>
    %165 = tpu.matmul %162, %164, %cst_95 {dimension_numbers = #tpu.dot_dimension_numbers<[1], [0], [0], [1], [0, 0, 1, 1], [], []>} : vector<4x64xf32>, vector<64x64xf32>, vector<4x64xf32> -> vector<4x64xf32>
    %166 = arith.addf %161, %165 : vector<4x64xf32>
    %c0_96 = arith.constant 0 : index
    %c0_97 = arith.constant 0 : index
    %167 = vector.load %arg7[%c0_96, %c0_97] : memref<1x64xf32, #tpu.memory_space<vmem>>, vector<1x64xf32>
    %168 = vector.broadcast %167 : vector<1x64xf32> to vector<4x64xf32>
    %169 = arith.addf %166, %168 : vector<4x64xf32>
    %cst_98 = arith.constant 0.000000e+00 : f32
    %170 = vector.broadcast %cst_98 : f32 to vector<4x64xf32>
    %171 = arith.maximumf %169, %170 : vector<4x64xf32>
    %c0_99 = arith.constant 0 : index
    %c0_100 = arith.constant 0 : index
    %c0_101 = arith.constant 0 : index
    %172 = vector.load %arg8[%c0_99, %c0_100, %c0_101] : memref<1x4x64xf32, #tpu.memory_space<vmem>>, vector<1x4x64xf32>
    %173 = vector.shape_cast %172 : vector<1x4x64xf32> to vector<4x64xf32>
    %174 = vector.shape_cast %171 : vector<4x64xf32> to vector<1x4x64xf32>
    tpu.vector_store %arg8[%c0_99, %c0_100, %c0_101], %174 {strides = array<i32>} : memref<1x4x64xf32, #tpu.memory_space<vmem>>, vector<1x4x64xf32>,
    return
  }
  func.func @transform_0(%arg0: i32) -> (i32, i32) {
    %c0_i32 = arith.constant 0 : i32
    %c0_i32_0 = arith.constant 0 : i32
    return %arg0, %c0_i32 : i32, i32
  }
  func.func @transform_1(%arg0: i32) -> (i32, i32) {
    %c0_i32 = arith.constant 0 : i32
    %c0_i32_0 = arith.constant 0 : i32
    %c0_i32_1 = arith.constant 0 : i32
    return %c0_i32, %c0_i32_0 : i32, i32
  }
  func.func @transform_2(%arg0: i32) -> (i32, i32) {
    %c0_i32 = arith.constant 0 : i32
    %c0_i32_0 = arith.constant 0 : i32
    %c0_i32_1 = arith.constant 0 : i32
    return %c0_i32, %c0_i32_0 : i32, i32
  }
  func.func @transform_3(%arg0: i32) -> (i32, i32, i32) {
    %c0_i32 = arith.constant 0 : i32
    %c0_i32_0 = arith.constant 0 : i32
    %c0_i32_1 = arith.constant 0 : i32
    %c0_i32_2 = arith.constant 0 : i32
    return %c0_i32, %c0_i32_0, %c0_i32_1 : i32, i32, i32
  }
  func.func @transform_4(%arg0: i32) -> (i32, i32) {
    %c0_i32 = arith.constant 0 : i32
    %c0_i32_0 = arith.constant 0 : i32
    %c0_i32_1 = arith.constant 0 : i32
    return %c0_i32, %c0_i32_0 : i32, i32
  }
  func.func @transform_5(%arg0: i32) -> (i32, i32, i32) {
    %c0_i32 = arith.constant 0 : i32
    %c0_i32_0 = arith.constant 0 : i32
    %c0_i32_1 = arith.constant 0 : i32
    %c0_i32_2 = arith.constant 0 : i32
    return %c0_i32, %c0_i32_0, %c0_i32_1 : i32, i32, i32
  }
  func.func @transform_6(%arg0: i32) -> (i32, i32) {
    %c0_i32 = arith.constant 0 : i32
    %c0_i32_0 = arith.constant 0 : i32
    %c0_i32_1 = arith.constant 0 : i32
    return %c0_i32, %c0_i32_0 : i32, i32
  }
  func.func @transform_7(%arg0: i32) -> (i32, i32, i32) {
    %c0_i32 = arith.constant 0 : i32
    %c0_i32_0 = arith.constant 0 : i32
    %c0_i32_1 = arith.constant 0 : i32
    return %arg0, %c0_i32, %c0_i32_0 : i32, i32, i32
  }
}

module attributes {stable_mosaic.version = 11 : i64} {
  func.func @_gemm_bias_relu_kernel(%arg0: i32, %arg1: memref<256x256xbf16, #tpu.memory_space<vmem>>, %arg2: memref<256x32xbf16, #tpu.memory_space<vmem>>, %arg3: memref<1x32xf32, #tpu.memory_space<vmem>>, %arg4: memref<256x32xbf16, #tpu.memory_space<vmem>>) attributes {dimension_semantics = [#tpu.dimension_semantics<parallel>], iteration_bounds = array<i64: 2>, scalar_prefetch = 0 : i64, scratch_operands = 0 : i64, tpu.core_type = #tpu.core_type<tc>, window_params = [{transform_indices = @transform_0, window_bounds = array<i64: 256, 256>}, {pipeline_mode = #tpu.pipeline_mode<synchronous>, transform_indices = @transform_1, window_bounds = array<i64: 256, 32>}, {pipeline_mode = #tpu.pipeline_mode<synchronous>, transform_indices = @transform_2, window_bounds = array<i64: 1, 32>}, {transform_indices = @transform_3, window_bounds = array<i64: 256, 32>}]} {
    %c0 = arith.constant 0 : index
    %c0_0 = arith.constant 0 : index
    %0 = vector.load %arg1[%c0, %c0_0] : memref<256x256xbf16, #tpu.memory_space<vmem>>, vector<256x256xbf16>
    %c0_1 = arith.constant 0 : index
    %c0_2 = arith.constant 0 : index
    %1 = vector.load %arg2[%c0_1, %c0_2] : memref<256x32xbf16, #tpu.memory_space<vmem>>, vector<256x32xbf16>
    %cst = arith.constant dense<0.000000e+00> : vector<256x32xf32>
    %2 = tpu.matmul %0, %1, %cst {dimension_numbers = #tpu.dot_dimension_numbers<[1], [0], [0], [1], [0, 0, 1, 1], [], []>} : vector<256x256xbf16>, vector<256x32xbf16>, vector<256x32xf32> -> vector<256x32xf32>
    %c0_3 = arith.constant 0 : index
    %c0_4 = arith.constant 0 : index
    %3 = vector.load %arg3[%c0_3, %c0_4] : memref<1x32xf32, #tpu.memory_space<vmem>>, vector<1x32xf32>
    %4 = vector.broadcast %3 : vector<1x32xf32> to vector<256x32xf32>
    %5 = arith.addf %2, %4 : vector<256x32xf32>
    %cst_5 = arith.constant 0.000000e+00 : f32
    %6 = vector.broadcast %cst_5 : f32 to vector<256x32xf32>
    %7 = arith.maximumf %5, %6 : vector<256x32xf32>
    %8 = arith.truncf %7 : vector<256x32xf32> to vector<256x32xbf16>
    %c0_6 = arith.constant 0 : index
    %c0_7 = arith.constant 0 : index
    %9 = vector.load %arg4[%c0_6, %c0_7] : memref<256x32xbf16, #tpu.memory_space<vmem>>, vector<256x32xbf16>
    tpu.vector_store %arg4[%c0_6, %c0_7], %8 {strides = array<i32>} : memref<256x32xbf16, #tpu.memory_space<vmem>>, vector<256x32xbf16>,
    return
  }
  func.func @transform_0(%arg0: i32) -> (i32, i32) {
    %c0_i32 = arith.constant 0 : i32
    %c0_i32_0 = arith.constant 0 : i32
    return %arg0, %c0_i32 : i32, i32
  }
  func.func @transform_1(%arg0: i32) -> (i32, i32) {
    %c0_i32 = arith.constant 0 : i32
    %c0_i32_0 = arith.constant 0 : i32
    %c0_i32_1 = arith.constant 0 : i32
    return %c0_i32, %c0_i32_0 : i32, i32
  }
  func.func @transform_2(%arg0: i32) -> (i32, i32) {
    %c0_i32 = arith.constant 0 : i32
    %c0_i32_0 = arith.constant 0 : i32
    %c0_i32_1 = arith.constant 0 : i32
    return %c0_i32, %c0_i32_0 : i32, i32
  }
  func.func @transform_3(%arg0: i32) -> (i32, i32) {
    %c0_i32 = arith.constant 0 : i32
    %c0_i32_0 = arith.constant 0 : i32
    return %arg0, %c0_i32 : i32, i32
  }
}

module attributes {stable_mosaic.version = 11 : i64} {
  func.func @_gemm_bias_relu_kernel(%arg0: i32, %arg1: memref<80x512xbf16, #tpu.memory_space<vmem>>, %arg2: memref<512x64xbf16, #tpu.memory_space<vmem>>, %arg3: memref<1x64xf32, #tpu.memory_space<vmem>>, %arg4: memref<80x64xbf16, #tpu.memory_space<vmem>>) attributes {dimension_semantics = [#tpu.dimension_semantics<parallel>], iteration_bounds = array<i64: 1>, scalar_prefetch = 0 : i64, scratch_operands = 0 : i64, tpu.core_type = #tpu.core_type<tc>, window_params = [{transform_indices = @transform_0, window_bounds = array<i64: 80, 512>}, {pipeline_mode = #tpu.pipeline_mode<synchronous>, transform_indices = @transform_1, window_bounds = array<i64: 512, 64>}, {pipeline_mode = #tpu.pipeline_mode<synchronous>, transform_indices = @transform_2, window_bounds = array<i64: 1, 64>}, {transform_indices = @transform_3, window_bounds = array<i64: 80, 64>}]} {
    %c0 = arith.constant 0 : index
    %c0_0 = arith.constant 0 : index
    %0 = vector.load %arg1[%c0, %c0_0] : memref<80x512xbf16, #tpu.memory_space<vmem>>, vector<80x512xbf16>
    %c0_1 = arith.constant 0 : index
    %c0_2 = arith.constant 0 : index
    %1 = vector.load %arg2[%c0_1, %c0_2] : memref<512x64xbf16, #tpu.memory_space<vmem>>, vector<512x64xbf16>
    %cst = arith.constant dense<0.000000e+00> : vector<80x64xf32>
    %2 = tpu.matmul %0, %1, %cst {dimension_numbers = #tpu.dot_dimension_numbers<[1], [0], [0], [1], [0, 0, 1, 1], [], []>} : vector<80x512xbf16>, vector<512x64xbf16>, vector<80x64xf32> -> vector<80x64xf32>
    %c0_3 = arith.constant 0 : index
    %c0_4 = arith.constant 0 : index
    %3 = vector.load %arg3[%c0_3, %c0_4] : memref<1x64xf32, #tpu.memory_space<vmem>>, vector<1x64xf32>
    %4 = vector.broadcast %3 : vector<1x64xf32> to vector<80x64xf32>
    %5 = arith.addf %2, %4 : vector<80x64xf32>
    %cst_5 = arith.constant 0.000000e+00 : f32
    %6 = vector.broadcast %cst_5 : f32 to vector<80x64xf32>
    %7 = arith.maximumf %5, %6 : vector<80x64xf32>
    %8 = arith.truncf %7 : vector<80x64xf32> to vector<80x64xbf16>
    %c0_6 = arith.constant 0 : index
    %c0_7 = arith.constant 0 : index
    %9 = vector.load %arg4[%c0_6, %c0_7] : memref<80x64xbf16, #tpu.memory_space<vmem>>, vector<80x64xbf16>
    tpu.vector_store %arg4[%c0_6, %c0_7], %8 {strides = array<i32>} : memref<80x64xbf16, #tpu.memory_space<vmem>>, vector<80x64xbf16>,
    return
  }
  func.func @transform_0(%arg0: i32) -> (i32, i32) {
    %c0_i32 = arith.constant 0 : i32
    %c0_i32_0 = arith.constant 0 : i32
    return %arg0, %c0_i32 : i32, i32
  }
  func.func @transform_1(%arg0: i32) -> (i32, i32) {
    %c0_i32 = arith.constant 0 : i32
    %c0_i32_0 = arith.constant 0 : i32
    %c0_i32_1 = arith.constant 0 : i32
    return %c0_i32, %c0_i32_0 : i32, i32
  }
  func.func @transform_2(%arg0: i32) -> (i32, i32) {
    %c0_i32 = arith.constant 0 : i32
    %c0_i32_0 = arith.constant 0 : i32
    %c0_i32_1 = arith.constant 0 : i32
    return %c0_i32, %c0_i32_0 : i32, i32
  }
  func.func @transform_3(%arg0: i32) -> (i32, i32) {
    %c0_i32 = arith.constant 0 : i32
    %c0_i32_0 = arith.constant 0 : i32
    return %arg0, %c0_i32 : i32, i32
  }
}

module attributes {stable_mosaic.version = 11 : i64} {
  func.func @_gemm_bias_relu_kernel(%arg0: i32, %arg1: memref<16x576xbf16, #tpu.memory_space<vmem>>, %arg2: memref<576x64xbf16, #tpu.memory_space<vmem>>, %arg3: memref<1x64xf32, #tpu.memory_space<vmem>>, %arg4: memref<16x64xf32, #tpu.memory_space<vmem>>) attributes {dimension_semantics = [#tpu.dimension_semantics<parallel>], iteration_bounds = array<i64: 1>, scalar_prefetch = 0 : i64, scratch_operands = 0 : i64, tpu.core_type = #tpu.core_type<tc>, window_params = [{transform_indices = @transform_0, window_bounds = array<i64: 16, 576>}, {pipeline_mode = #tpu.pipeline_mode<synchronous>, transform_indices = @transform_1, window_bounds = array<i64: 576, 64>}, {pipeline_mode = #tpu.pipeline_mode<synchronous>, transform_indices = @transform_2, window_bounds = array<i64: 1, 64>}, {transform_indices = @transform_3, window_bounds = array<i64: 16, 64>}]} {
    %c0 = arith.constant 0 : index
    %c0_0 = arith.constant 0 : index
    %0 = vector.load %arg1[%c0, %c0_0] : memref<16x576xbf16, #tpu.memory_space<vmem>>, vector<16x576xbf16>
    %c0_1 = arith.constant 0 : index
    %c0_2 = arith.constant 0 : index
    %1 = vector.load %arg2[%c0_1, %c0_2] : memref<576x64xbf16, #tpu.memory_space<vmem>>, vector<576x64xbf16>
    %cst = arith.constant dense<0.000000e+00> : vector<16x64xf32>
    %2 = tpu.matmul %0, %1, %cst {dimension_numbers = #tpu.dot_dimension_numbers<[1], [0], [0], [1], [0, 0, 1, 1], [], []>} : vector<16x576xbf16>, vector<576x64xbf16>, vector<16x64xf32> -> vector<16x64xf32>
    %c0_3 = arith.constant 0 : index
    %c0_4 = arith.constant 0 : index
    %3 = vector.load %arg3[%c0_3, %c0_4] : memref<1x64xf32, #tpu.memory_space<vmem>>, vector<1x64xf32>
    %4 = vector.broadcast %3 : vector<1x64xf32> to vector<16x64xf32>
    %5 = arith.addf %2, %4 : vector<16x64xf32>
    %cst_5 = arith.constant 0.000000e+00 : f32
    %6 = vector.broadcast %cst_5 : f32 to vector<16x64xf32>
    %7 = arith.maximumf %5, %6 : vector<16x64xf32>
    %c0_6 = arith.constant 0 : index
    %c0_7 = arith.constant 0 : index
    %8 = vector.load %arg4[%c0_6, %c0_7] : memref<16x64xf32, #tpu.memory_space<vmem>>, vector<16x64xf32>
    tpu.vector_store %arg4[%c0_6, %c0_7], %7 {strides = array<i32>} : memref<16x64xf32, #tpu.memory_space<vmem>>, vector<16x64xf32>,
    return
  }
  func.func @transform_0(%arg0: i32) -> (i32, i32) {
    %c0_i32 = arith.constant 0 : i32
    %c0_i32_0 = arith.constant 0 : i32
    return %arg0, %c0_i32 : i32, i32
  }
  func.func @transform_1(%arg0: i32) -> (i32, i32) {
    %c0_i32 = arith.constant 0 : i32
    %c0_i32_0 = arith.constant 0 : i32
    %c0_i32_1 = arith.constant 0 : i32
    return %c0_i32, %c0_i32_0 : i32, i32
  }
  func.func @transform_2(%arg0: i32) -> (i32, i32) {
    %c0_i32 = arith.constant 0 : i32
    %c0_i32_0 = arith.constant 0 : i32
    %c0_i32_1 = arith.constant 0 : i32
    return %c0_i32, %c0_i32_0 : i32, i32
  }
  func.func @transform_3(%arg0: i32) -> (i32, i32) {
    %c0_i32 = arith.constant 0 : i32
    %c0_i32_0 = arith.constant 0 : i32
    return %arg0, %c0_i32 : i32, i32
  }
}

</mosaic_0001>

<bundles_post_ra>
// kernel: cnn_feature_extractor.1
= control target key start
LH: loop header
LB: loop body
LE: loop exit
PB: predicated region body
PF: predicated region fallthrough
CT: control target
= control target key end

     0   :  { %12 = vsyncpa [#allocation3], 0  ;;  %s6350_s0 = inlined_call_operand.vmem [shape: bf16[512,256], index: 0, kind: input, shape index: {}]   ;;  %s6351_s1 = inlined_call_operand.vmem [shape: bf16[256,32], index: 1, kind: input, shape index: {}]   ;;  %s6352_s2 = inlined_call_operand.vmem [shape: f32[1,32], index: 2, kind: input, shape index: {}]   ;;  %s6353_s3 = inlined_call_operand.vmem [shape: f32[16,32,64], index: 3, kind: input, shape index: {}]   ;;  %s6354_s4 = inlined_call_operand.vmem [shape: f32[1,64], index: 4, kind: input, shape index: {}]   ;;  %s6355_s5 = inlined_call_operand.vmem [shape: f32[9,64,64], index: 5, kind: input, shape index: {}]   ;;  %s6356_s6 = inlined_call_operand.vmem [shape: f32[1,64], index: 6, kind: input, shape index: {}]   ;;  %s6357_s7 = inlined_call_operand.hbm [shape: f32[2,4,64], index: 7, kind: output, shape index: {}]  }
   0x1   :  { %14 = vsyncpa [#allocation3 + $0x1], 0  ;;  %s3702_s24 = smov 0   ;;  %s3704_s25 = smov 0  }
   0x2   :  { %s3706_s26 = smov 0   ;;  %s3708_s27 = smov 0  }
   0x3 LB: > { %s3723_s28 = sadd.s32 4294967295, %s3660_s27   ;;  %s3085_s29 = sadd.s32 4294967294, %s3660_s27   ;;  %s3660_s27 = sphi %s3708_s27, %s6720_s27   ;;  %s3656_s26 = sphi %s3706_s26, %s6719_s26   ;;  %s3652_s25 = sphi %s3704_s25, %s6718_s25   ;;  %s3648_s24 = sphi %s3702_s24, %s6717_s24  }
   0x4   : > { %s3727_s30 = sadd.s32 1, %s3660_s27   ;;  %s179_s8 = sadd.s32 1, %s3656_s26 }
   0x5   : > { %s176_s9 = ssub.s32 %s3660_s27, %s3727_s30  ;;  %p189_p0 = scmp.ne.s32.totalorder %s3656_s26, %s3652_s25 }
   0x6   : > { %p177_p1 = scmp.eq.s32.totalorder %s176_s9, 0  ;;  %p190_p2 = scmp.eq.s32.totalorder %s3723_s28, 1 }
   0x7   : > { %p195_p3 = scmp.ne.s32.totalorder %s3652_s25, %s3648_s24  ;;  %p196_p4 = scmp.eq.s32.totalorder %s3085_s29, 1 }
   0x8   : > { %s3738_s10 = scalar_select %p177_p1, %s3656_s26, %s179_s8  }
   0x9   : > { %p3740_p5 = por %p190_p2, %p189_p0  ;;  %p3744_p6 = por %p196_p4, %p195_p3 }
   0xa   : > { %p3088_p7 = scmp.ge.s32.totalorder %s3660_s27, 1  ;;  %p242_p8 = scmp.lt.s32.totalorder %s3660_s27, 3 }
   0xc   : > { %p243_p9 = pnand %p3088_p7, %p242_p8 }
   0xe   : > { %246 = sbr.rel (%p243_p9) target bundleno = 987 (0x3db), region = 48 }
  0x13   : > { %v3542_v0 = vld [vmem:[%s6351_s1 + $0x38] sm:$0xff]  ;;  %v3541_v2 = vld [vmem:[%s6351_s1 + $0x30] sm:$0xff]  ;;  %v3540_v4 = vld [vmem:[%s6351_s1 + $0x28] sm:$0xff]  ;;  %s3090_s8 = sshll.u32 %s3723_s28, 5  ;;  %vm922_vm0 = vcmask 1041409   ;;  %vm925_vm1 = vcmask 1042434  }
  0x14   : > { %v3550_v1 = vld [vmem:[%s6351_s1 + $0x78] sm:$0xff]  ;;  %606 = vmatpush.bf16.msra.mxu0 %v3542_v0  ;;  %v3549_v3 = vld [vmem:[%s6351_s1 + $0x70] sm:$0xff]  ;;  %v3548_v5 = vld [vmem:[%s6351_s1 + $0x68] sm:$0xff]  ;;  %p276_p10 = scmp.lt.s32.totalorder %s3090_s8, 63  ;;  %vm928_vm2 = vcmask 1043459   ;;  %vm931_vm3 = vcmask 1044484  }
  0x15   : > { %695 = vmatpush.bf16.msra.mxu1 %v3550_v1  ;;  %v3539_v6 = vld [vmem:[%s6351_s1 + $0x20] sm:$0xff]  ;;  %v3538_v8 = vld [vmem:[%s6351_s1 + $0x18] sm:$0xff]  ;;  %v3537_v10 = vld [vmem:[%s6351_s1 + $0x10] sm:$0xff]  ;;  %vm934_vm4 = vcmask 1045509   ;;  %vm937_vm5 = vcmask 1046534   ;;  %vm988_vm6 = vcmask 261120  }
  0x16   : > { %v3547_v7 = vld [vmem:[%s6351_s1 + $0x60] sm:$0xff]  ;;  %v3546_v9 = vld [vmem:[%s6351_s1 + $0x58] sm:$0xff]  ;;  %s6722_s8 = smov (!%p276_p10, %s3090_s8), 63  ;;  %v3545_v11 = vld [vmem:[%s6351_s1 + $0x50] sm:$0xff]  ;;  %vm940_vm7 = vcmask 1047559   ;;  %vm2726_vm8 = vcmask 523264  }
  0x17   : > { %s3502_s29 = sshll.u32 %s6722_s8, 3  ;;  %v3536_v12 = vld [vmem:[%s6351_s1 + $0x8] sm:$0xff]  ;;  %v3535_v14 = vld [vmem:[%s6351_s1] sm:$0xff]  ;;  %s272_s8 = sand.u32 1, %s3652_s25   ;;  %vm3008_vm9 = vcmask 519168  }
  0x18   : > { %607 = vmatpush.bf16.msra.mxu0 %v3541_v2  ;;  %v3544_v13 = vld [vmem:[%s6351_s1 + $0x48] sm:$0xff]  ;;  %s3796_s18 = scalar_lea.vmem %s6350_s0, %s3502_s29  ;;  %v3543_v15 = vld [vmem:[%s6351_s1 + $0x40] sm:$0xff]  ;;  %s3089_s21 = sshll.u32 %s272_s8, 2 }
  0x19   : > { %696 = vmatpush.bf16.msra.mxu1 %v3549_v3  ;;  %v3095_v16 = vld [vmem:[%s3796_s18] sm:$0xf]  ;;  %v3504_v17 = vld [vmem:[%s3796_s18 + $0x4] sm:$0xf0]  ;;  %v3503_v18 = vld [vmem:[%s3796_s18 + $0x4] sm:$0xf] }
  0x1a   : > { %v3097_v19 = vld [vmem:[%s3796_s18 + $0x8] sm:$0xf0]  ;;  %v3096_v20 = vor.u32 %v3504_v17, %v3095_v16  ;;  %v3103_v22 = vld [vmem:[%s3796_s18 + $0x10] sm:$0xf]  ;;  %v3506_v23 = vld [vmem:[%s3796_s18 + $0x14] sm:$0xf0] }
  0x1b   : > { %v3100_v21 = vor.u32 %v3503_v18, %v3097_v19  ;;  %v3505_v24 = vld [vmem:[%s3796_s18 + $0x14] sm:$0xf]  ;;  %v3105_v25 = vld [vmem:[%s3796_s18 + $0x18] sm:$0xf0]  ;;  %v3104_v26 = vor.u32 %v3506_v23, %v3103_v22  ;;  %v3111_v28 = vld [vmem:[%s3796_s18 + $0x20] sm:$0xf] }
  0x1c   : > { %608 = vmatpush.bf16.msra.mxu0 %v3540_v4  ;;  %v3108_v27 = vor.u32 %v3505_v24, %v3105_v25  ;;  %v3508_v29 = vld [vmem:[%s3796_s18 + $0x24] sm:$0xf0]  ;;  %v3507_v30 = vld [vmem:[%s3796_s18 + $0x24] sm:$0xf]  ;;  %v3113_v31 = vld [vmem:[%s3796_s18 + $0x28] sm:$0xf0] }
  0x1d   : > { %697 = vmatpush.bf16.msra.mxu1 %v3548_v5  ;;  %v3112_v32 = vor.u32 %v3508_v29, %v3111_v28  ;;  %v3116_v33 = vor.u32 %v3507_v30, %v3113_v31  ;;  %v3119_v34 = vld [vmem:[%s3796_s18 + $0x30] sm:$0xf]  ;;  %v3510_v35 = vld [vmem:[%s3796_s18 + $0x34] sm:$0xf0]  ;;  %v3509_v36 = vld [vmem:[%s3796_s18 + $0x34] sm:$0xf] }
  0x1e   : > { %v3121_v37 = vld [vmem:[%s3796_s18 + $0x38] sm:$0xf0]  ;;  %v3120_v38 = vor.u32 %v3510_v35, %v3119_v34  ;;  %v3127_v40 = vld [vmem:[%s3796_s18 + $0x40] sm:$0xf]  ;;  %v3512_v41 = vld [vmem:[%s3796_s18 + $0x44] sm:$0xf0] }
  0x1f   : > { %v3124_v39 = vor.u32 %v3509_v36, %v3121_v37  ;;  %v3511_v42 = vld [vmem:[%s3796_s18 + $0x44] sm:$0xf]  ;;  %v3129_v43 = vld [vmem:[%s3796_s18 + $0x48] sm:$0xf0]  ;;  %v3128_v44 = vor.u32 %v3512_v41, %v3127_v40  ;;  %v3135_v46 = vld [vmem:[%s3796_s18 + $0x50] sm:$0xf] }
  0x20   : > { %609 = vmatpush.bf16.msra.mxu0 %v3539_v6  ;;  %v3132_v45 = vor.u32 %v3511_v42, %v3129_v43  ;;  %v3514_v47 = vld [vmem:[%s3796_s18 + $0x54] sm:$0xf0]  ;;  %v3513_v48 = vld [vmem:[%s3796_s18 + $0x54] sm:$0xf]  ;;  %v3137_v49 = vld [vmem:[%s3796_s18 + $0x58] sm:$0xf0] }
  0x21   : > { %698 = vmatpush.bf16.msra.mxu1 %v3547_v7  ;;  %v3136_v50 = vor.u32 %v3514_v47, %v3135_v46  ;;  %v3140_v51 = vor.u32 %v3513_v48, %v3137_v49  ;;  %v3143_v52 = vld [vmem:[%s3796_s18 + $0x60] sm:$0xf]  ;;  %v3516_v53 = vld [vmem:[%s3796_s18 + $0x64] sm:$0xf0]  ;;  %v3515_v54 = vld [vmem:[%s3796_s18 + $0x64] sm:$0xf] }
  0x22   : > { %v3145_v55 = vld [vmem:[%s3796_s18 + $0x68] sm:$0xf0]  ;;  %v3144_v56 = vor.u32 %v3516_v53, %v3143_v52  ;;  %v3151_v58 = vld [vmem:[%s3796_s18 + $0x70] sm:$0xf]  ;;  %v3518_v59 = vld [vmem:[%s3796_s18 + $0x74] sm:$0xf0] }
  0x23   : > { %v3148_v57 = vor.u32 %v3515_v54, %v3145_v55  ;;  %v3517_v60 = vld [vmem:[%s3796_s18 + $0x74] sm:$0xf]  ;;  %v3153_v61 = vld [vmem:[%s3796_s18 + $0x78] sm:$0xf0]  ;;  %v3152_v62 = vor.u32 %v3518_v59, %v3151_v58  ;;  %v3159_v0 = vld [vmem:[%s3796_s18 + $0x80] sm:$0xf] }
  0x24   : > { %610 = vmatpush.bf16.msra.mxu0 %v3538_v8  ;;  %v3156_v63 = vor.u32 %v3517_v60, %v3153_v61  ;;  %v3520_v1 = vld [vmem:[%s3796_s18 + $0x84] sm:$0xf0]  ;;  %v3519_v2 = vld [vmem:[%s3796_s18 + $0x84] sm:$0xf]  ;;  %v3161_v3 = vld [vmem:[%s3796_s18 + $0x88] sm:$0xf0] }
  0x25   : > { %699 = vmatpush.bf16.msra.mxu1 %v3546_v9  ;;  %v3843_v4 = vld [vmem:[%s6352_s2] ss:$0 sm:$0xff]  ;;  %v3160_v5 = vor.u32 %v3520_v1, %v3159_v0  ;;  %v3164_v6 = vor.u32 %v3519_v2, %v3161_v3  ;;  %v3522_v16 = vld [vmem:[%s3796_s18 + $0x94] sm:$0xf0]  ;;  %v3521_v17 = vld [vmem:[%s3796_s18 + $0x94] sm:$0xf] }
  0x26   : > { %v3169_v18 = vld [vmem:[%s3796_s18 + $0x98] sm:$0xf0]  ;;  %v3175_v29 = vld [vmem:[%s3796_s18 + $0xa0] sm:$0xf]  ;;  %v3524_v30 = vld [vmem:[%s3796_s18 + $0xa4] sm:$0xf0] }
  0x27   : > { %v3523_v31 = vld [vmem:[%s3796_s18 + $0xa4] sm:$0xf]  ;;  %v3183_v43 = vld [vmem:[%s3796_s18 + $0xb0] sm:$0xf]  ;;  %v3185_v46 = vld [vmem:[%s3796_s18 + $0xb8] sm:$0xf0] }
  0x28   : > { %611 = vmatpush.bf16.msra.mxu0 %v3537_v10  ;;  %v3528_v58 = vld [vmem:[%s3796_s18 + $0xc4] sm:$0xf0]  ;;  %v3527_v59 = vld [vmem:[%s3796_s18 + $0xc4] sm:$0xf]  ;;  %v3193_v60 = vld [vmem:[%s3796_s18 + $0xc8] sm:$0xf0] }
  0x29   : > { %700 = vmatpush.bf16.msra.mxu1 %v3545_v11  ;;  %v3199_v3 = vld [vmem:[%s3796_s18 + $0xd0] sm:$0xf]  ;;  %s3499_s22 = sshll.u32 %s3723_s28, 2  ;;  %s274_s15 = scalar_lea.vmem [#allocation2], %s3089_s21 }
  0x2a   : > { %s3021_s14 = scalar_lea.hbm %s6357_s7, %s3499_s22  ;;  %s3023_s16 = sshll.u32 %s274_s15, 4  ;;  %s3024_s16 = int_to_ptr.vmem [resolvable:$true] %s3023_s16 }
  0x2b   : > { %s3025_s17 = sshll.u32 %s3021_s14, 4  ;;  %s3011_s28 = scalar_lea.sflag [#allocation3], %s272_s8  ;;  %s3026_s17 = int_to_ptr.hbm [resolvable:$true] %s3025_s17 }
  0x2c   : > { %612 = vmatpush.bf16.msra.mxu0 %v3536_v12  ;;  %s3618_s21 = scalar_lea.hbm %s6357_s7, 8 }
  0x2d   : > { %701 = vmatpush.bf16.msra.mxu1 %v3544_v13 }
  0x30   : > { %613 = vmatpush.bf16.msra.mxu0 %v3535_v14 }
  0x31   : > { %702 = vmatpush.bf16.msra.mxu1 %v3543_v15  ;;  %v3167_v15 = vld [vmem:[%s3796_s18 + $0x90] sm:$0xf] }
  0x32   : > { %v3168_v19 = vor.u32 %v3522_v16, %v3167_v15  ;;  %v3207_v16 = vld [vmem:[%s3796_s18 + $0xe0] sm:$0xf] }
  0x33   : > { %614 = vmatmul.bf16.vlgmr.msra.gmra.mxu0 %v3096_v20  ;;  %v3172_v20 = vor.u32 %v3521_v17, %v3169_v18  ;;  %v3532_v17 = vld [vmem:[%s3796_s18 + $0xe4] sm:$0xf0]  ;;  %v3531_v18 = vld [vmem:[%s3796_s18 + $0xe4] sm:$0xf] }
  0x34   : > { %703 = vmatmul.bf16.vlgmr.msra.gmra.mxu1 %v3100_v21 }
  0x43   : > { %619 = vmatmul.bf16.gmra.mxu0 %v3104_v26 }
  0x44   : > { %708 = vmatmul.bf16.gmra.mxu1 %v3108_v27 }
  0x53   : > { %624 = vmatmul.bf16.gmra.mxu0 %v3112_v32  ;;  %v3177_v32 = vld [vmem:[%s3796_s18 + $0xa8] sm:$0xf0] }
  0x54   : > { %713 = vmatmul.bf16.gmra.mxu1 %v3116_v33  ;;  %v3176_v33 = vor.u32 %v3524_v30, %v3175_v29  ;;  %v3180_v34 = vor.u32 %v3523_v31, %v3177_v32  ;;  %v3215_v32 = vld [vmem:[%s3796_s18 + $0xf0] sm:$0xf] }
  0x63   : > { %629 = vmatmul.bf16.gmra.mxu0 %v3120_v38 }
  0x64   : > { %718 = vmatmul.bf16.gmra.mxu1 %v3124_v39 }
  0x73   : > { %634 = vmatmul.bf16.gmra.mxu0 %v3128_v44  ;;  %v3526_v44 = vld [vmem:[%s3796_s18 + $0xb4] sm:$0xf0] }
  0x74   : > { %723 = vmatmul.bf16.gmra.mxu1 %v3132_v45  ;;  %v3525_v45 = vld [vmem:[%s3796_s18 + $0xb4] sm:$0xf]  ;;  %v3184_v47 = vor.u32 %v3526_v44, %v3183_v43 }
  0x75   : > { %v3188_v48 = vor.u32 %v3525_v45, %v3185_v46 }
  0x83   : > { %639 = vmatmul.bf16.gmra.mxu0 %v3136_v50 }
  0x84   : > { %728 = vmatmul.bf16.gmra.mxu1 %v3140_v51 }
  0x93   : > { %644 = vmatmul.bf16.gmra.mxu0 %v3144_v56 }
  0x94   : > { %733 = vmatmul.bf16.gmra.mxu1 %v3148_v57  ;;  %v3191_v57 = vld [vmem:[%s3796_s18 + $0xc0] sm:$0xf] }
  0x95   : > { %v3192_v61 = vor.u32 %v3528_v58, %v3191_v57 }
  0xa3   : > { %649 = vmatmul.bf16.gmra.mxu0 %v3152_v62  ;;  %v3196_v62 = vor.u32 %v3527_v59, %v3193_v60 }
  0xa4   : > { %738 = vmatmul.bf16.gmra.mxu1 %v3156_v63 }
  0xb0   : > { %v615_v7 = vpop.f32.mrf.mxu0 }
  0xb1   : > { %v704_v8 = vpop.f32.mrf.mxu1  ;;  %v616_v9 = vadd.f32 %v3843_v4, %v615_v7  ;;  %v3201_v7 = vld [vmem:[%s3796_s18 + $0xd8] sm:$0xf0] }
  0xb3   : > { %v3846_v10 = vadd.f32 %v704_v8, %v616_v9  ;;  %654 = vmatmul.bf16.gmra.mxu0 %v3160_v5  ;;  %v3530_v5 = vld [vmem:[%s3796_s18 + $0xd4] sm:$0xf0] }
  0xb4   : > { %743 = vmatmul.bf16.gmra.mxu1 %v3164_v6  ;;  %v3529_v6 = vld [vmem:[%s3796_s18 + $0xd4] sm:$0xf]  ;;  %v3200_v8 = vor.u32 %v3530_v5, %v3199_v3 }
  0xb5   : > { %v3204_v9 = vor.u32 %v3529_v6, %v3201_v7  ;;  %v3941_v60 = vmax.f32 %v3846_v10, 0.0 }
  0xb7   : > { %v1249_v3 = vrot.slane %v3941_v60, 3 }
  0xb8   : > { %v617_v11 = vpop.f32.mrf.mxu0 }
  0xb9   : > { %v706_v12 = vpop.f32.mrf.mxu1  ;;  %v618_v13 = vadd.f32 %v3843_v4, %v617_v11 }
  0xbb   : > { %v3849_v14 = vadd.f32 %v706_v12, %v618_v13 }
  0xbd   : > { %v3913_v31 = vmax.f32 %v3849_v14, 0.0 }
  0xc0   : > { %v620_v21 = vpop.f32.mrf.mxu0 }
  0xc1   : > { %v709_v22 = vpop.f32.mrf.mxu1  ;;  %v621_v23 = vadd.f32 %v3843_v4, %v620_v21 }
  0xc3   : > { %v3856_v24 = vadd.f32 %v709_v22, %v621_v23  ;;  %659 = vmatmul.bf16.gmra.mxu0 %v3168_v19  ;;  %v3209_v19 = vld [vmem:[%s3796_s18 + $0xe8] sm:$0xf0] }
  0xc4   : > { %748 = vmatmul.bf16.gmra.mxu1 %v3172_v20  ;;  %v3208_v20 = vor.u32 %v3532_v17, %v3207_v16  ;;  %v3212_v21 = vor.u32 %v3531_v18, %v3209_v19 }
  0xc8   : > { %v622_v25 = vpop.f32.mrf.mxu0 }
  0xc9   : > { %v711_v26 = vpop.f32.mrf.mxu1  ;;  %v623_v27 = vadd.f32 %v3843_v4, %v622_v25 }
  0xcb   : > { %v3859_v28 = vadd.f32 %v711_v26, %v623_v27 }
  0xd0   : > { %v625_v35 = vpop.f32.mrf.mxu0 }
  0xd1   : > { %v714_v36 = vpop.f32.mrf.mxu1  ;;  %v626_v37 = vadd.f32 %v3843_v4, %v625_v35  ;;  %v3217_v35 = vld [vmem:[%s3796_s18 + $0xf8] sm:$0xf0] }
  0xd3   : > { %v3866_v38 = vadd.f32 %v714_v36, %v626_v37  ;;  %664 = vmatmul.bf16.gmra.mxu0 %v3176_v33  ;;  %v3534_v33 = vld [vmem:[%s3796_s18 + $0xf4] sm:$0xf0]  ;;  %v3923_v37 = vrot.slane %v3913_v31, 4 }
  0xd4   : > { %753 = vmatmul.bf16.gmra.mxu1 %v3180_v34  ;;  %v3533_v34 = vld [vmem:[%s3796_s18 + $0xf4] sm:$0xf]  ;;  %s3612_s18 = sshra.s32 %s3026_s17, 4  ;;  %s3613_s18 = int_to_ptr.hbm [resolvable:$true] %s3612_s18 }
  0xd5   : > { %v1708_v46 = vrot.slane %v3923_v37, 3  ;;  %s3614_s19 = scalar_lea.hbm %s3613_s18, 4  ;;  %p3619_p0 = scmp.lt.s32.totalorder %s3613_s18, %s6357_s7 }
  0xd6   : > { %p3615_p11 = scmp.ne.s32.totalorder %s3613_s18, %s3614_s19  ;;  %p3620_p1 = scmp.lt.s32.totalorder %s3618_s21, %s3614_s19 }
  0xd8   : > { %v627_v39 = vpop.f32.mrf.mxu0  ;;  %p3616_p12 = pnand %p3615_p11, %p3740_p5  ;;  %p3621_p2 = por %p3620_p1, %p3619_p0 }
  0xd9   : > { %v716_v40 = vpop.f32.mrf.mxu1  ;;  %v628_v41 = vadd.f32 %v3843_v4, %v627_v39  ;;  %v3216_v39 = vor.u32 %v3534_v33, %v3215_v32  ;;  %v3977_v32 = vrot.slane %v3941_v60, 2  ;;  %v3980_v33 = vmax.f32 %v3856_v24, 0.0 }
  0xda   : > { %p3617_p13 = pneg %p3616_p12 }
  0xdb   : > { %v3869_v42 = vadd.f32 %v716_v40, %v628_v41  ;;  %v3220_v40 = vor.u32 %v3533_v34, %v3217_v35  ;;  %v3983_v34 = vrot.slane %v3913_v31, 2  ;;  %v921_v35 = vrot.slane %v3941_v60, 1 }
  0xdc   : > { %p3622_p3 = pnand %p3621_p2, %p3617_p13 }
  0xe0   : > { %v630_v49 = vpop.f32.mrf.mxu0 }
  0xe1   : > { %v719_v50 = vpop.f32.mrf.mxu1  ;;  %v631_v51 = vadd.f32 %v3843_v4, %v630_v49 }
  0xe3   : > { %v3876_v52 = vadd.f32 %v719_v50, %v631_v51  ;;  %669 = vmatmul.bf16.gmra.mxu0 %v3184_v47 }
  0xe4   : > { %758 = vmatmul.bf16.gmra.mxu1 %v3188_v48 }
  0xe5   : > { %6481 = vst [vmem:[#allocation5_spill] sm:$0xff] %v3876_v52 }
  0xe8   : > { %v632_v53 = vpop.f32.mrf.mxu0 }
  0xe9   : > { %v721_v54 = vpop.f32.mrf.mxu1  ;;  %v633_v55 = vadd.f32 %v3843_v4, %v632_v53 }
  0xeb   : > { %v3879_v56 = vadd.f32 %v721_v54, %v633_v55 }
  0xf0   : > { %v635_v63 = vpop.f32.mrf.mxu0 }
  0xf1   : > { %v724_v0 = vpop.f32.mrf.mxu1  ;;  %v636_v50 = vadd.f32 %v3843_v4, %v635_v63 }
  0xf3   : > { %674 = vmatmul.bf16.gmra.mxu0 %v3192_v61  ;;  %v725_v54 = vadd.f32 %v724_v0, %v636_v50  ;;  %v3952_v0 = vrot.slane %v3941_v60, 4  ;;  %v4004_v50 = vmax.f32 %v3866_v38, 0.0  ;;  %v4021_v38 = vmax.f32 %v3869_v42, 0.0 }
  0xf4   : > { %763 = vmatmul.bf16.gmra.mxu1 %v3196_v62 }
  0xf5   : > { %v3937_v58 = vmax.f32 %v725_v54, 0.0  ;;  %v1262_v18 = vrot.slane %v3952_v0, 3  ;;  %6487 = vst [vmem:[#allocation11_spill] sm:$0xff] %v4004_v50  ;;  %v4035_v42 = vrot.slane %v4004_v50, 4  ;;  %v4050_v24 = vrot.slane %v4021_v38, 4 }
  0xf6   : > { %6490 = vst [vmem:[#allocation14_spill] sm:$0xff] %v4021_v38 }
  0xf7   : > { %v3944_v62 = vrot.slane %v3937_v58, 4  ;;  %v3949_v63 = vrot.slane %v3937_v58, 2  ;;  %6491 = vst [vmem:[#allocation15_spill] sm:$0xff] %v4035_v42 }
  0xf8   : > { %v637_v1 = vpop.f32.mrf.mxu0  ;;  %6494 = vst [vmem:[#allocation18_spill] sm:$0xff] %v4050_v24 }
  0xf9   : > { %v726_v2 = vpop.f32.mrf.mxu1  ;;  %v638_v25 = vadd.f32 %v3843_v4, %v637_v1 }
  0xfb   : > { %v727_v26 = vadd.f32 %v726_v2, %v638_v25 }
  0xfd   : > { %v3910_v30 = vmax.f32 %v727_v26, 0.0 }
  0xff   : > { %v3920_v36 = vrot.slane %v3910_v30, 4 }
 0x100   : > { %v3889_v11 = vpop.f32.mrf.mxu0 }
 0x101   : > { %v3891_v12 = vpop.f32.mrf.mxu1  ;;  %v1709_v45 = vrot.slane %v3920_v36, 2 }
 0x103   : > { %679 = vmatmul.bf16.gmra.mxu0 %v3200_v8  ;;  %v3931_v47 = vsel %vm922_vm0, %v1709_v45, %v1708_v46  ;;  %v1263_v8 = vrot.slane %v3944_v62, 2  ;;  %v1138_v46 = vrot.slane %v3937_v58, 1 }
 0x104   : > { %768 = vmatmul.bf16.gmra.mxu1 %v3204_v9  ;;  %v1250_v9 = vsel %vm922_vm0, %v3949_v63, %v1249_v3 }
 0x108   : > { %v3893_v13 = vpop.f32.mrf.mxu0 }
 0x109   : > { %v3895_v15 = vpop.f32.mrf.mxu1 }
 0x110   : > { %v3901_v22 = vpop.f32.mrf.mxu0 }
 0x111   : > { %v3903_v23 = vpop.f32.mrf.mxu1 }
 0x113   : > { %684 = vmatmul.bf16.gmra.mxu0 %v3208_v20  ;;  %v1264_v20 = vsel %vm922_vm0, %v1263_v8, %v1262_v18  ;;  %v641_v8 = vadd.f32 %v3843_v4, %v3889_v11  ;;  %v6502_v11 = vrot.slane %v3913_v31, 1 }
 0x114   : > { %773 = vmatmul.bf16.gmra.mxu1 %v3212_v21 }
 0x118   : > { %v3906_v27 = vpop.f32.mrf.mxu0 }
 0x119   : > { %v3908_v29 = vpop.f32.mrf.mxu1 }
 0x120   : > { %v650_v41 = vpop.f32.mrf.mxu0 }
 0x121   : > { %v739_v43 = vpop.f32.mrf.mxu1  ;;  %v651_v44 = vadd.f32 %v3843_v4, %v650_v41  ;;  %v3991_v41 = vrot.slane %v3980_v33, 2 }
 0x123   : > { %v3927_v14 = vadd.f32 %v739_v43, %v651_v44  ;;  %689 = vmatmul.bf16.gmra.mxu0 %v3216_v39  ;;  %v3987_v39 = vmax.f32 %v3859_v28, 0.0  ;;  %6485 = vst [vmem:[#allocation9_spill] sm:$0xff] %v3991_v41  ;;  %v3994_v43 = vrot.slane %v3980_v33, 4  ;;  %v942_v44 = vrot.slane %v3952_v0, 1 }
 0x124   : > { %778 = vmatmul.bf16.gmra.mxu1 %v3220_v40 }
 0x125   : > { %6482 = vst [vmem:[#allocation6_spill] sm:$0xff] %v3927_v14 }
 0x126   : > { %6484 = vst [vmem:[#allocation8_spill] sm:$0xff] %v3987_v39 }
 0x127   : > { %6486 = vst [vmem:[#allocation10_spill] sm:$0xff] %v3994_v43 }
 0x128   : > { %v652_v48 = vpop.f32.mrf.mxu0 }
 0x129   : > { %v741_v49 = vpop.f32.mrf.mxu1  ;;  %v653_v51 = vadd.f32 %v3843_v4, %v652_v48  ;;  %v646_v48 = vadd.f32 %v3843_v4, %v3901_v22  ;;  %v4133_v22 = vsel %vm922_vm0, %v1138_v46, %v3977_v32  ;;  %v4151_v46 = vsel %vm922_vm0, %v3910_v30, %v6502_v11 }
 0x12b   : > { %v3935_v53 = vadd.f32 %v741_v49, %v653_v51  ;;  %v1695_v49 = vrot.slane %v3913_v31, 3 }
 0x130   : > { %v655_v55 = vpop.f32.mrf.mxu0 }
 0x131   : > { %v744_v57 = vpop.f32.mrf.mxu1  ;;  %v656_v59 = vadd.f32 %v3843_v4, %v655_v55  ;;  %v4055_v55 = vrot.slane %v3910_v30, 2 }
 0x133   : > { %v745_v61 = vadd.f32 %v744_v57, %v656_v59  ;;  %v4013_v59 = vrot.slane %v3987_v39, 2  ;;  %6495 = vst [vmem:[#allocation19_spill] sm:$0xff] %v4055_v55 }
 0x135   : > { %v3946_v1 = vmax.f32 %v745_v61, 0.0  ;;  %6488 = vst [vmem:[#allocation12_spill] sm:$0xff] %v4013_v59  ;;  %v4016_v61 = vrot.slane %v3987_v39, 4 }
 0x137   : > { %v1251_v2 = vrot.slane %v3946_v1, 1  ;;  %v3957_v5 = vrot.slane %v3946_v1, 4  ;;  %6489 = vst [vmem:[#allocation13_spill] sm:$0xff] %v4016_v61 }
 0x138   : > { %v657_v10 = vpop.f32.mrf.mxu0 }
 0x139   : > { %v746_v6 = vpop.f32.mrf.mxu1  ;;  %v658_v7 = vadd.f32 %v3843_v4, %v657_v10  ;;  %v3964_v17 = vsel %vm925_vm1, %v1251_v2, %v1250_v9  ;;  %v1265_v19 = vrot.slane %v3957_v5, 1 }
 0x13b   : > { %v747_v16 = vadd.f32 %v746_v6, %v658_v7  ;;  %v3970_v21 = vsel %vm925_vm1, %v1265_v19, %v1264_v20  ;;  %v4032_v20 = vrot.slane %v4004_v50, 2  ;;  %v4041_v7 = vmax.f32 %v3879_v56, 0.0 }
 0x13c   : > { %6483 = vst [vmem:[#allocation7_spill] sm:$0xff] %v3970_v21  ;;  %v4047_v19 = vrot.slane %v4021_v38, 2  ;;  %v730_v56 = vadd.f32 %v3891_v12, %v641_v8  ;;  %v643_v12 = vadd.f32 %v3843_v4, %v3893_v13  ;;  %v1031_v6 = vrot.slane %v3937_v58, 7 }
 0x13d   : > { %v4037_v57 = vmax.f32 %v747_v16, 0.0  ;;  %6492 = vst [vmem:[#allocation16_spill] sm:$0xff] %v4041_v7  ;;  %v4069_v3 = vrot.slane %v4041_v7, 2  ;;  %v1696_v13 = vsel %vm922_vm0, %v4055_v55, %v1695_v49  ;;  %v4086_v8 = vrot.slane %v4041_v7, 4 }
 0x13e   : > { %6493 = vst [vmem:[#allocation17_spill] sm:$0xff] %v4047_v19  ;;  %v4080_v10 = vmax.f32 %v730_v56, 0.0  ;;  %v732_v16 = vadd.f32 %v3895_v15, %v643_v12  ;;  %v1045_v56 = vrot.slane %v3944_v62, 7  ;;  %v4101_v49 = vsel %vm922_vm0, %v3937_v58, %v921_v35  ;;  %v3288_v58 = vld [vmem:[%s6353_s3 + $0x38] sm:$0xff] }
 0x13f   : > { %v1697_v2 = vrot.slane %v4037_v57, 1  ;;  %6496 = vst [vmem:[#allocation20_spill] sm:$0xff] %v4069_v3  ;;  %v1152_v15 = vrot.slane %v3944_v62, 1  ;;  %v1360_v12 = vrot.slane %v3910_v30, 7  ;;  %v4122_v35 = vsel %vm922_vm0, %v1031_v6, %v3941_v60  ;;  %1011 = vmatpush.msra.mxu2 %v3288_v58  ;;  %3551 = vmatpush.msra.mxu3 %v3288_v58 }
 0x140   : > { %v3972_v25 = vpop.f32.mrf.mxu0  ;;  %6497 = vst [vmem:[#allocation21_spill] sm:$0xff] %v4080_v10  ;;  %v4136_v14 = vmax.f32 %v732_v16, 0.0  ;;  %v4143_v60 = vsel %vm922_vm0, %v1045_v56, %v3952_v0  ;;  %v1374_v58 = vrot.slane %v3920_v36, 7  ;;  %v1584_v16 = vrot.slane %v3910_v30, 1 }
 0x141   : > { %v3974_v26 = vpop.f32.mrf.mxu1  ;;  %6498 = vst [vmem:[#allocation22_spill] sm:$0xff] %v4086_v8  ;;  %v4091_v18 = vsel %vm925_vm1, %v1697_v2, %v1696_v13  ;;  %v4108_v2 = vsel %vm922_vm0, %v3944_v62, %v942_v44  ;;  %v4113_v13 = vrot.slane %v4080_v10, 2  ;;  %v648_v44 = vadd.f32 %v3843_v4, %v3906_v27  ;;  %v3287_v27 = vld [vmem:[%s6353_s3 + $0x30] sm:$0xff] }
 0x142   : > { %6499 = vst [vmem:[#allocation23_spill] sm:$0xff] %v4091_v18  ;;  %v4155_v45 = vrot.slane %v4080_v10, 4  ;;  %1012 = vmatpush.msra.mxu2 %v3287_v27  ;;  %3552 = vmatpush.msra.mxu3 %v3287_v27  ;;  %v6503_v56 = vrot.slane %v3952_v0, 2  ;;  %v735_v6 = vadd.f32 %v3903_v23, %v646_v48  ;;  %v3286_v18 = vld [vmem:[%s6353_s3 + $0x28] sm:$0xff]  ;;  %v4170_v8 = vsel %vm922_vm0, %v1360_v12, %v3913_v31  ;;  %v3285_v31 = vld [vmem:[%s6353_s3 + $0x20] sm:$0xff] }
 0x143   : > { %6500 = vst [vmem:[#allocation24_spill] sm:$0xff] %v4113_v13  ;;  %v1057_v11 = vrot.slane %v4113_v13, 7  ;;  %v1165_v30 = vrot.slane %v4113_v13, 1  ;;  %v737_v27 = vadd.f32 %v3908_v29, %v648_v44  ;;  %v4174_v0 = vrot.slane %v4037_v57, 4 }
 0x144   : > { %6501 = vst [vmem:[#allocation25_spill] sm:$0xff] %v4136_v14  ;;  %v4160_v52 = vsel %vm922_vm0, %v1152_v15, %v6503_v56  ;;  %1013 = vmatpush.msra.mxu2 %v3286_v18  ;;  %3553 = vmatpush.msra.mxu3 %v3286_v18  ;;  %v4179_v15 = vrot.slane %v4136_v14, 2  ;;  %v4182_v56 = vrot.slane %v4136_v14, 4  ;;  %v4190_v12 = vsel %vm922_vm0, %v1374_v58, %v3923_v37 }
 0x145   : > { %v6506_v18 = vrot.slane %v3991_v41, 1  ;;  %v4201_v38 = vmax.f32 %v735_v6, 0.0  ;;  %v4205_v58 = vsel %vm922_vm0, %v1057_v11, %v3991_v41  ;;  %v6508_v29 = vrot.slane %v3991_v41, 2 }
 0x146   : > { %6504 = vst [vmem:[#allocation26_spill] sm:$0xff] %v4179_v15  ;;  %1014 = vmatpush.msra.mxu2 %v3285_v31  ;;  %3554 = vmatpush.msra.mxu3 %v3285_v31  ;;  %v2476_v23 = vrot.slane %v4136_v14, 1  ;;  %v4218_v6 = vsel %vm922_vm0, %v1584_v16, %v3983_v34  ;;  %v1711_v11 = vrot.slane %v4174_v0, 1  ;;  %v6510_v41 = vrot.slane %v3987_v39, 3 }
 0x147   : > { %6505 = vst [vmem:[#allocation27_spill] sm:$0xff] %v4182_v56  ;;  %v4196_v44 = vsel %vm922_vm0, %v4113_v13, %v6506_v18  ;;  %v4210_v43 = vsel %vm922_vm0, %v1165_v30, %v6508_v29  ;;  %v4213_v13 = vmax.f32 %v737_v27, 0.0  ;;  %v2490_v27 = vrot.slane %v4182_v56, 1 }
 0x148   : > { %v4006_v51 = vpop.f32.mrf.mxu0  ;;  %6507 = vst [vmem:[#allocation28_spill] sm:$0xff] %v4201_v38  ;;  %v4226_v30 = vsel %vm922_vm0, %v4179_v15, %v6510_v41  ;;  %v661_v18 = vadd.f32 %v3843_v4, %v3972_v25  ;;  %v2601_v14 = vrot.slane %v4182_v56, 2  ;;  %v1598_v10 = vrot.slane %v3920_v36, 1 }
 0x149   : > { %v4008_v54 = vpop.f32.mrf.mxu1  ;;  %6509 = vst [vmem:[#allocation29_spill] sm:$0xff] %v4213_v13  ;;  %v4239_v39 = vrot.slane %v4201_v38, 4  ;;  %v4245_v29 = vsel %vm925_vm1, %v1711_v11, %v3931_v47  ;;  %v4248_v25 = vrot.slane %v4213_v13, 2  ;;  %v4251_v16 = vmax.f32 %v3935_v53, 0.0 }
 0x14a   : > { %6514 = vst [vmem:[#allocation33_spill] sm:$0xff] %v4245_v29  ;;  %v4255_v56 = vsel %vm922_vm0, %v2476_v23, %v4013_v59  ;;  %v1071_v21 = vrot.slane %v4201_v38, 7  ;;  %v1178_v47 = vrot.slane %v4201_v38, 1  ;;  %v6518_v11 = vrot.slane %v3923_v37, 1 }
 0x14b   : > { %6512 = vst [vmem:[#allocation31_spill] sm:$0xff] %v4239_v39  ;;  %v4272_v23 = vrot.slane %v4213_v13, 4  ;;  %v6520_v55 = vrot.slane %v4016_v61, 3  ;;  %v6522_v15 = vrot.slane %v4035_v42, 1  ;;  %v4328_v59 = vrot.slane %v3946_v1, 2 }
 0x14c   : > { %6515 = vst [vmem:[#allocation34_spill] sm:$0xff] %v4248_v25  ;;  %v4269_v53 = vsel %vm922_vm0, %v3920_v36, %v6518_v11  ;;  %v6523_v11 = vrot.slane %v4004_v50, 1  ;;  %v6529_v13 = vrot.slane %v4041_v7, 3  ;;  %v4367_v7 = vsel %vm925_vm1, %v3946_v1, %v4133_v22 }
 0x14d   : > { %6516 = vst [vmem:[#allocation35_spill] sm:$0xff] %v4251_v16  ;;  %v4278_v29 = vsel %vm922_vm0, %v2601_v14, %v6520_v55  ;;  %v4289_v36 = vsel %vm922_vm0, %v4239_v39, %v6522_v15  ;;  %v2503_v15 = vrot.slane %v4248_v25, 1  ;;  %v2516_v55 = vrot.slane %v4251_v16, 1 }
 0x14e   : > { %6519 = vst [vmem:[#allocation36_spill] sm:$0xff] %v4272_v23  ;;  %v4318_v14 = vsel %vm922_vm0, %v1178_v47, %v4032_v20  ;;  %v1047_v47 = vrot.slane %v3957_v5, 6  ;;  %v4385_v22 = vrot.slane %v4037_v57, 2  ;;  %v4414_v23 = vsel %vm925_vm1, %v3957_v5, %v4160_v52 }
 0x14f   : > { %v6536_v52 = vrot.slane %v3977_v32, 5 }
 0x150   : > { %v4061_v28 = vpop.f32.mrf.mxu0 }
 0x151   : > { %v4063_v40 = vpop.f32.mrf.mxu1 }
 0x158   : > { %v4126_v62 = vpop.f32.mrf.mxu0 }
 0x159   : > { %v4128_v9 = vpop.f32.mrf.mxu1 }
 0x160   : > { %v670_v31 = vpop.f32.mrf.mxu0 }
 0x161   : > { %v759_v48 = vpop.f32.mrf.mxu1  ;;  %v671_v24 = vadd.f32 %v3843_v4, %v670_v31  ;;  %v4236_v31 = vrot.slane %v4201_v38, 2 }
 0x163   : > { %6511 = vst [vmem:[#allocation30_spill] sm:$0xff] %v4236_v31  ;;  %v4241_v41 = vadd.f32 %v759_v48, %v671_v24  ;;  %v6517_v24 = vrot.slane %v4016_v61, 2  ;;  %v4310_v61 = vsel %vm922_vm0, %v1071_v21, %v4004_v50  ;;  %v1033_v50 = vrot.slane %v3946_v1, 6 }
 0x165   : > { %6513 = vst [vmem:[#allocation32_spill] sm:$0xff] %v4241_v41  ;;  %v4262_v48 = vsel %vm922_vm0, %v2490_v27, %v6517_v24  ;;  %v750_v41 = vadd.f32 %v3974_v26, %v661_v18  ;;  %v6521_v27 = vrot.slane %v3923_v37, 2  ;;  %v4295_v26 = vsel %vm922_vm0, %v4201_v38, %v6523_v11 }
 0x166   : > { %v4300_v37 = vrot.slane %v4251_v16, 2  ;;  %v4313_v11 = vrot.slane %v4251_v16, 4  ;;  %v924_v16 = vrot.slane %v3946_v1, 7  ;;  %v663_v38 = vadd.f32 %v3843_v4, %v4006_v51  ;;  %v3419_v51 = vld [vmem:[%s6353_s3 + $0x1f8] sm:$0xff] }
 0x167   : > { %v4283_v24 = vsel %vm922_vm0, %v1598_v10, %v6521_v27  ;;  %v2614_v27 = vrot.slane %v4248_v25, 2  ;;  %v4321_v42 = vmax.f32 %v750_v41, 0.0  ;;  %v6527_v41 = vrot.slane %v4047_v19, 2  ;;  %2668 = vmatpush.msrb.mxu1 %v3419_v51  ;;  %v3418_v51 = vld [vmem:[%s6353_s3 + $0x1f0] sm:$0xff] }
 0x168   : > { %6524 = vst [vmem:[#allocation37_spill] sm:$0xff] %v4300_v37  ;;  %v4302_v10 = vpop.f32.mrf.mxu0  ;;  %v6528_v25 = vrot.slane %v4047_v19, 3  ;;  %v4348_v31 = vsel %vm922_vm0, %v4300_v37, %v6529_v13  ;;  %v944_v13 = vrot.slane %v3957_v5, 7  ;;  %v3410_v19 = vld [vmem:[%s6353_s3 + $0x1d8] sm:$0xff]  ;;  %v4382_v1 = vsel %vm925_vm1, %v1033_v50, %v4122_v35  ;;  %v3409_v50 = vld [vmem:[%s6353_s3 + $0x1d0] sm:$0xff]  ;;  %v3417_v35 = vld [vmem:[%s6353_s3 + $0x1e8] sm:$0xff] }
 0x169   : > { %v4304_v18 = vpop.f32.mrf.mxu1  ;;  %6525 = vst [vmem:[#allocation38_spill] sm:$0xff] %v4313_v11  ;;  %v4337_v39 = vsel %vm922_vm0, %v2503_v15, %v6527_v41  ;;  %v4356_v15 = vsel %vm922_vm0, %v2516_v55, %v4069_v3  ;;  %v1362_v55 = vrot.slane %v4037_v57, 6  ;;  %v926_v41 = vsel %vm925_vm1, %v924_v16, %v4101_v49  ;;  %2557 = vmatpush.msrb.mxu0 %v3410_v19 }
 0x16a   : > { %6526 = vst [vmem:[#allocation39_spill] sm:$0xff] %v4321_v42  ;;  %v4342_v21 = vsel %vm922_vm0, %v2614_v27, %v6528_v25  ;;  %v4361_v27 = vrot.slane %v4321_v42, 2  ;;  %v1474_v11 = vrot.slane %v4037_v57, 7  ;;  %v752_v49 = vadd.f32 %v4008_v54, %v663_v38  ;;  %2669 = vmatpush.msrb.mxu1 %v3418_v51  ;;  %v3408_v38 = vld [vmem:[%s6353_s3 + $0x1c8] sm:$0xff] }
 0x16b   : > { %6530 = vst [vmem:[#allocation40_spill] sm:$0xff] %v4348_v31  ;;  %v1376_v37 = vrot.slane %v4174_v0, 6  ;;  %v4391_v3 = vrot.slane %v4321_v42, 4  ;;  %v4404_v19 = vsel %vm925_vm1, %v944_v13, %v4108_v2  ;;  %2558 = vmatpush.msrb.mxu0 %v3409_v50  ;;  %v3416_v2 = vld [vmem:[%s6353_s3 + $0x1e0] sm:$0xff]  ;;  %v6537_v50 = vrot.slane %v3949_v63, 4 }
 0x16c   : > { %6531 = vst [vmem:[#allocation41_spill] sm:$0xff] %v4361_v27  ;;  %2670 = vmatpush.msrb.mxu1 %v3417_v35  ;;  %v956_v51 = vrot.slane %v4361_v27, 7  ;;  %v1059_v13 = vrot.slane %v4361_v27, 6 }
 0x16d   : > { %2559 = vmatpush.msrb.mxu0 %v3408_v38  ;;  %v4433_v5 = vsel %vm925_vm1, %v1376_v37, %v4190_v12 }
 0x16e   : > { %2671 = vmatpush.msrb.mxu1 %v3416_v2  ;;  %v4448_v35 = vsel %vm925_vm1, %v956_v51, %v4196_v44  ;;  %v4466_v44 = vsel %vm925_vm1, %v1059_v13, %v4205_v58  ;;  %v666_v2 = vadd.f32 %v3843_v4, %v4061_v28 }
 0x170   : > { %v675_v16 = vpop.f32.mrf.mxu0 }
 0x171   : > { %v764_v25 = vpop.f32.mrf.mxu1  ;;  %v676_v31 = vadd.f32 %v3843_v4, %v675_v16  ;;  %v4409_v16 = vsel %vm925_vm1, %v1047_v47, %v4143_v60  ;;  %v4426_v60 = vsel %vm925_vm1, %v1362_v55, %v4170_v8  ;;  %v4428_v47 = vmax.f32 %v752_v49, 0.0  ;;  %v3407_v49 = vld [vmem:[%s6353_s3 + $0x1c0] sm:$0xff] }
 0x172   : > { %2560 = vmatpush.msrb.mxu0 %v3407_v49 }
 0x173   : > { %v765_v54 = vadd.f32 %v764_v25, %v676_v31  ;;  %6532 = vst [vmem:[#allocation42_spill] sm:$0xff] %v4428_v47  ;;  %v4437_v31 = vsel %vm925_vm1, %v1474_v11, %v4151_v46  ;;  %v4454_v46 = vsel %vm925_vm1, %v4361_v27, %v4210_v43  ;;  %v4469_v51 = vrot.slane %v4428_v47, 2 }
 0x174   : > { %6533 = vst [vmem:[#allocation43_spill] sm:$0xff] %v4454_v46  ;;  %v4472_v43 = vrot.slane %v4428_v47, 4  ;;  %v2589_v13 = vrot.slane %v4428_v47, 1  ;;  %v6538_v46 = vrot.slane %v4328_v59, 3 }
 0x175   : > { %v4439_v25 = vmax.f32 %v765_v54, 0.0  ;;  %6534 = vst [vmem:[#allocation44_spill] sm:$0xff] %v4469_v51 }
 0x176   : > { %6535 = vst [vmem:[#allocation45_spill] sm:$0xff] %v4472_v43 }
 0x177   : > { %v4458_v11 = vrot.slane %v4439_v25, 4  ;;  %v4461_v54 = vrot.slane %v4439_v25, 2  ;;  %v927_v38 = vrot.slane %v4439_v25, 6  ;;  %v1253_v12 = vsel %vm928_vm2, %v4439_v25, %v3964_v17 }
 0x178   : > { %v677_v49 = vpop.f32.mrf.mxu0 }
 0x179   : > { %v766_v37 = vpop.f32.mrf.mxu1  ;;  %v678_v55 = vadd.f32 %v3843_v4, %v677_v49  ;;  %v929_v58 = vsel %vm928_vm2, %v927_v38, %v926_v41  ;;  %v939_v17 = vrot.slane %v4461_v54, 2  ;;  %v946_v49 = vrot.slane %v4458_v11, 6 }
 0x17a   : > { %v932_v8 = vsel %vm931_vm3, %v6536_v52, %v929_v58  ;;  %v755_v41 = vadd.f32 %v4063_v40, %v666_v2  ;;  %v668_v38 = vadd.f32 %v3843_v4, %v4126_v62  ;;  %v4506_v40 = vsel %vm925_vm1, %v4037_v57, %v4218_v6  ;;  %v914_v6 = vld [vmem:[%s6353_s3 + $0x10] sm:$0xff] }
 0x17b   : > { %v767_v28 = vadd.f32 %v766_v37, %v678_v55  ;;  %v935_v27 = vsel %vm934_vm4, %v6537_v50, %v932_v8  ;;  %v915_v50 = vld [vmem:[%s6353_s3 + $0x18] sm:$0xff]  ;;  %v4511_v62 = vsel %vm925_vm1, %v2589_v13, %v4226_v30  ;;  %v947_v57 = vsel %vm928_vm2, %v946_v49, %v4404_v19  ;;  %v913_v13 = vld [vmem:[%s6353_s3 + $0x8] sm:$0xff] }
 0x17c   : > { %v938_v52 = vsel %vm937_vm5, %v6538_v46, %v935_v27  ;;  %v4517_v46 = vsel %vm925_vm1, %v4428_v47, %v4255_v56  ;;  %1113 = vmatpush.msrb.mxu3 %v915_v50  ;;  %v3302_v30 = vld [vmem:[%s6353_s3 + $0x58] sm:$0xff]  ;;  %v4531_v2 = vsel %vm925_vm1, %v4472_v43, %v4262_v48  ;;  %v2603_v56 = vrot.slane %v4472_v43, 1 }
 0x17d   : > { %v4496_v58 = vmax.f32 %v767_v28, 0.0  ;;  %v941_v55 = vsel %vm940_vm7, %v939_v17, %v938_v52  ;;  %v4535_v28 = vmax.f32 %v755_v41, 0.0  ;;  %v757_v19 = vadd.f32 %v4128_v9, %v668_v38  ;;  %1219 = vmatpush.msrb.mxu2 %v3302_v30  ;;  %v3301_v9 = vld [vmem:[%s6353_s3 + $0x50] sm:$0xff] }
 0x17e   : > { %3289 = vmatmul.msk.f32.vlgmr.msra.gmra.mxu2 %vm988_vm6, %v941_v55  ;;  %1114 = vmatpush.msrb.mxu3 %v914_v6  ;;  %v6540_v55 = vrot.slane %v3977_v32, 7  ;;  %v6541_v41 = vrot.slane %v3949_v63, 6  ;;  %v1260_v6 = vrot.slane %v4461_v54, 4  ;;  %v1488_v30 = vrot.slane %v4174_v0, 7 }
 0x17f   : > { %6539 = vst [vmem:[#allocation46_spill] sm:$0xff] %v4535_v28  ;;  %v1364_v17 = vrot.slane %v4496_v58, 5  ;;  %1220 = vmatpush.msrb.mxu2 %v3301_v9  ;;  %v6544_v37 = vrot.slane %v4328_v59, 5  ;;  %v4569_v47 = vsel %vm925_vm1, %v2603_v56, %v4278_v29  ;;  %v3300_v29 = vld [vmem:[%s6353_s3 + $0x48] sm:$0xff] }
 0x180   : > { %v680_v49 = vpop.f32.mrf.mxu0  ;;  %v1255_v50 = vsel %vm931_vm3, %v6540_v55, %v1253_v12  ;;  %v4555_v12 = vrot.slane %v4496_v58, 4  ;;  %v6543_v55 = vrot.slane %v3980_v33, 5  ;;  %1115 = vmatpush.msrb.mxu3 %v913_v13  ;;  %v4580_v13 = vrot.slane %v4535_v28, 4 }
 0x181   : > { %v769_v52 = vpop.f32.mrf.mxu1  ;;  %v681_v48 = vadd.f32 %v3843_v4, %v680_v49  ;;  %v1257_v38 = vsel %vm934_vm4, %v6541_v41, %v1255_v50  ;;  %v1476_v49 = vrot.slane %v4496_v58, 6  ;;  %v912_v41 = vld [vmem:[%s6353_s3] sm:$0xff]  ;;  %1221 = vmatpush.msrb.mxu2 %v3300_v29 }
 0x182   : > { %6542 = vst [vmem:[#allocation47_spill] sm:$0xff] %v4555_v12  ;;  %v949_v8 = vsel %vm931_vm3, %v6543_v55, %v947_v57  ;;  %v1259_v27 = vsel %vm937_vm5, %v6544_v37, %v1257_v38  ;;  %v4577_v57 = vsel %vm925_vm1, %v4174_v0, %v4283_v24  ;;  %v4582_v37 = vmax.f32 %v757_v19, 0.0  ;;  %1116 = vmatpush.msrb.mxu3 %v912_v41  ;;  %v3299_v24 = vld [vmem:[%s6353_s3 + $0x40] sm:$0xff]  ;;  %v6550_v38 = vld [vmem:[#allocation19_spill] sm:$0xff] }
 0x183   : > { %v770_v50 = vadd.f32 %v769_v52, %v681_v48  ;;  %v4572_v43 = vsel %vm940_vm7, %v1260_v6, %v1259_v27  ;;  %6546 = vst [vmem:[#allocation49_spill] sm:$0xff] %v4577_v57  ;;  %v970_v52 = vrot.slane %v4535_v28, 7  ;;  %v1365_v27 = vsel %vm928_vm2, %v1364_v17, %v4426_v60  ;;  %v6552_v17 = vld [vmem:[#allocation7_spill] sm:$0xff]  ;;  %1222 = vmatpush.msrb.mxu2 %v3299_v24 }
 0x184   : > { %6545 = vst [vmem:[#allocation48_spill] sm:$0xff] %v4572_v43  ;;  %v950_v0 = vsel %vm934_vm4, %v4155_v45, %v949_v8  ;;  %v4598_v19 = vrot.slane %v4496_v58, 2  ;;  %v6549_v48 = vrot.slane %v3983_v34, 4  ;;  %v6551_v6 = vrot.slane %v6550_v38, 3 }
 0x185   : > { %6547 = vst [vmem:[#allocation50_spill] sm:$0xff] %v4580_v13  ;;  %v4590_v56 = vmax.f32 %v770_v50, 0.0  ;;  %v4609_v8 = vsel %vm928_vm2, %v4458_v11, %v6552_v17  ;;  %v1378_v55 = vrot.slane %v4555_v12, 5  ;;  %v4614_v50 = vsel %vm928_vm2, %v1476_v49, %v4437_v31 }
 0x186   : > { %6548 = vst [vmem:[#allocation51_spill] sm:$0xff] %v4582_v37  ;;  %v1367_v9 = vsel %vm931_vm3, %v6549_v48, %v1365_v27  ;;  %v4617_v41 = vrot.slane %v4535_v28, 2  ;;  %v1073_v27 = vrot.slane %v4535_v28, 6  ;;  %v4625_v48 = vsel %vm925_vm1, %v1488_v30, %v4269_v53 }
 0x187   : > { %v1369_v60 = vsel %vm934_vm4, %v6551_v6, %v1367_v9  ;;  %6553 = vst [vmem:[#allocation19_spill] sm:$0xff] %v4609_v8  ;;  %v4620_v29 = vrot.slane %v4590_v56, 2  ;;  %v6555_v17 = vrot.slane %v4321_v42, 3  ;;  %v4633_v49 = vsel %vm925_vm1, %v4535_v28, %v4318_v14  ;;  %v6560_v42 = vld [vmem:[#allocation10_spill] sm:$0xff] }
 0x188   : > { %6554 = vst [vmem:[#allocation7_spill] sm:$0xff] %v4625_v48  ;;  %v682_v9 = vpop.f32.mrf.mxu0  ;;  %v6556_v8 = vrot.slane %v4385_v22, 2  ;;  %v4640_v43 = vsel %vm928_vm2, %v1378_v55, %v4433_v5  ;;  %v4648_v14 = vrot.slane %v4582_v37, 2  ;;  %v1035_v5 = vrot.slane %v4439_v25, 5 }
 0x189   : > { %v771_v6 = vpop.f32.mrf.mxu1  ;;  %v952_v31 = vsel %vm937_vm5, %v6555_v17, %v950_v0  ;;  %6557 = vst [vmem:[#allocation52_spill] sm:$0xff] %v4640_v43  ;;  %v683_v53 = vadd.f32 %v3843_v4, %v682_v9  ;;  %v958_v0 = vrot.slane %v4620_v29, 6  ;;  %v984_v17 = vrot.slane %v4580_v13, 7 }
 0x18a   : > { %v1371_v24 = vsel %vm937_vm5, %v6556_v8, %v1369_v60  ;;  %v953_v30 = vsel %vm940_vm7, %v4620_v29, %v952_v31  ;;  %6558 = vst [vmem:[#allocation53_spill] sm:$0xff] %v4648_v14  ;;  %v4653_v60 = vsel %vm925_vm1, %v970_v52, %v4295_v26  ;;  %v1372_v8 = vrot.slane %v4598_v19, 1 }
 0x18b   : > { %3290 = vmatmul.msk.f32.gmra.mxu2 %vm988_vm6, %v953_v30  ;;  %v4658_v55 = vrot.slane %v4590_v56, 4  ;;  %v772_v9 = vadd.f32 %v771_v6, %v683_v53  ;;  %v959_v31 = vsel %vm928_vm2, %v958_v0, %v4448_v35  ;;  %v673_v30 = vadd.f32 %v3843_v4, %v4302_v10 }
 0x18c   : > { %v6561_v43 = vrot.slane %v6560_v42, 5  ;;  %v4670_v52 = vsel %vm925_vm1, %v1073_v27, %v4310_v61  ;;  %v4673_v13 = vsel %vm940_vm7, %v1372_v8, %v1371_v24  ;;  %v4676_v6 = vrot.slane %v4582_v37, 4  ;;  %v4717_v27 = vld [vmem:[%s6352_s2] ss:$0 sm:$0xff] }
 0x18d   : > { %6559 = vst [vmem:[#allocation54_spill] sm:$0xff] %v4658_v55  ;;  %v4678_v35 = vmax.f32 %v772_v9, 0.0  ;;  %v6565_v53 = vrot.slane %v4155_v45, 4  ;;  %v4685_v10 = vsel %vm925_vm1, %v984_v17, %v4289_v36  ;;  %v1036_v24 = vsel %vm928_vm2, %v1035_v5, %v4382_v1 }
 0x18e   : > { %v961_v26 = vsel %vm931_vm3, %v6561_v43, %v959_v31  ;;  %6562 = vst [vmem:[#allocation10_spill] sm:$0xff] %v4673_v13  ;;  %v6566_v43 = vrot.slane %v4391_v3, 3  ;;  %v4696_v0 = vsel %vm925_vm1, %v4648_v14, %v4337_v39  ;;  %v966_v17 = vrot.slane %v4658_v55, 2 }
 0x18f   : > { %6563 = vst [vmem:[#allocation55_spill] sm:$0xff] %v4676_v6  ;;  %v963_v4 = vsel %vm934_vm4, %v6565_v53, %v961_v26  ;;  %v4699_v8 = vrot.slane %v4678_v35, 2  ;;  %v4702_v36 = vrot.slane %v4678_v35, 4  ;;  %v2591_v9 = vsel %vm928_vm2, %v4678_v35, %v4511_v62  ;;  %v6569_v26 = vld [vmem:[#allocation12_spill] sm:$0xff] }
 0x190   : > { %6564 = vst [vmem:[#allocation56_spill] sm:$0xff] %v4678_v35  ;;  %v965_v61 = vsel %vm937_vm5, %v6566_v43, %v963_v4  ;;  %v762_v31 = vadd.f32 %v4304_v18, %v673_v30  ;;  %v685_v1 = vpop.f32.mrf.mxu0  ;;  %v6570_v53 = vrot.slane %v6569_v26, 7  ;;  %v2479_v4 = vrot.slane %v4678_v35, 7  ;;  %v6571_v18 = vld [vmem:[#allocation26_spill] sm:$0xff] }
 0x191   : > { %6567 = vst [vmem:[#allocation57_spill] sm:$0xff] %v4699_v8  ;;  %v774_v5 = vpop.f32.mrf.mxu1  ;;  %v2616_v43 = vrot.slane %v4648_v14, 1  ;;  %v686_v28 = vadd.f32 %v4717_v27, %v685_v1  ;;  %v967_v62 = vsel %vm940_vm7, %v966_v17, %v965_v61  ;;  %v6572_v30 = vrot.slane %v6571_v18, 6 }
 0x192   : > { %6568 = vst [vmem:[#allocation58_spill] sm:$0xff] %v4702_v36  ;;  %v2593_v39 = vsel %vm931_vm3, %v6570_v53, %v2591_v9  ;;  %v2598_v57 = vrot.slane %v4699_v8, 4  ;;  %v6573_v9 = vrot.slane %v4469_v51, 5  ;;  %v2480_v14 = vsel %vm928_vm2, %v2479_v4, %v4517_v46 }
 0x193   : > { %v2595_v13 = vsel %vm934_vm4, %v6572_v30, %v2593_v39  ;;  %3291 = vmatmul.msk.f32.gmra.mxu2 %vm988_vm6, %v967_v62  ;;  %v6574_v35 = vrot.slane %v3977_v32, 4  ;;  %v1141_v61 = vrot.slane %v4439_v25, 7  ;;  %v775_v17 = vadd.f32 %v774_v5, %v686_v28 }
 0x194   : > { %v2597_v53 = vsel %vm937_vm5, %v6573_v9, %v2595_v13  ;;  %v6575_v30 = vrot.slane %v6569_v26, 6  ;;  %v2493_v48 = vrot.slane %v4702_v36, 7  ;;  %v4740_v12 = vmax.f32 %v762_v31, 0.0 }
 0x195   : > { %v1038_v1 = vsel %vm931_vm3, %v6574_v35, %v1036_v24  ;;  %v2599_v39 = vsel %vm940_vm7, %v2598_v57, %v2597_v53  ;;  %v6577_v46 = vrot.slane %v6571_v18, 5  ;;  %v2487_v35 = vrot.slane %v4699_v8, 3 }
 0x196   : > { %v2482_v62 = vsel %vm931_vm3, %v6575_v30, %v2480_v14  ;;  %6576 = vst [vmem:[#allocation59_spill] sm:$0xff] %v4740_v12  ;;  %3420 = vmatmul.msk.f32.vlgmr.msrb.gmra.mxu1 %vm988_vm6, %v2599_v39  ;;  %v4748_v28 = vmax.f32 %v775_v17, 0.0  ;;  %v6578_v57 = vrot.slane %v4469_v51, 4  ;;  %v4755_v24 = vsel %vm925_vm1, %v2616_v43, %v4342_v21 }
 0x197   : > { %v2484_v13 = vsel %vm934_vm4, %v6577_v46, %v2482_v62  ;;  %v2605_v4 = vsel %vm928_vm2, %v4702_v36, %v4569_v47  ;;  %v6579_v9 = vrot.slane %v3949_v63, 3  ;;  %v1142_v17 = vsel %vm928_vm2, %v1141_v61, %v4367_v7 }
 0x198   : > { %v2486_v14 = vsel %vm937_vm5, %v6578_v57, %v2484_v13  ;;  %v4768_v39 = vrot.slane %v4748_v28, 2  ;;  %v4771_v21 = vrot.slane %v4748_v28, 4  ;;  %v972_v43 = vrot.slane %v4748_v28, 6  ;;  %v687_v62 = vpop.f32.mrf.mxu0 }
 0x199   : > { %v2488_v5 = vsel %vm940_vm7, %v2487_v35, %v2486_v14  ;;  %v1040_v53 = vsel %vm934_vm4, %v6579_v9, %v1038_v1  ;;  %v2494_v47 = vsel %vm928_vm2, %v2493_v48, %v4531_v2  ;;  %v776_v1 = vpop.f32.mrf.mxu1  ;;  %v1043_v46 = vrot.slane %v4461_v54, 1  ;;  %v6584_v9 = vld [vmem:[#allocation14_spill] sm:$0xff] }
 0x19a   : > { %6580 = vst [vmem:[#allocation60_spill] sm:$0xff] %v4771_v21  ;;  %3411 = vmatmul.msk.f32.vlgmr.msrb.gmra.mxu0 %vm988_vm6, %v2488_v5  ;;  %v1049_v7 = vrot.slane %v4458_v11, 5  ;;  %v4781_v61 = vrot.slane %v4740_v12, 2  ;;  %v688_v13 = vadd.f32 %v4717_v27, %v687_v62  ;;  %v986_v35 = vrot.slane %v4771_v21, 6 }
 0x19b   : > { %v973_v57 = vsel %vm928_vm2, %v972_v43, %v4653_v60  ;;  %v6582_v2 = vrot.slane %v3977_v32, 6  ;;  %v6583_v14 = vrot.slane %v4032_v20, 5  ;;  %v6585_v30 = vrot.slane %v6584_v9, 6  ;;  %v3311_v32 = vld [vmem:[%s6353_s3 + $0x78] sm:$0xff] }
 0x19c   : > { %6581 = vst [vmem:[#allocation61_spill] sm:$0xff] %v4781_v61  ;;  %v6586_v25 = vrot.slane %v6584_v9, 7  ;;  %v6587_v36 = vrot.slane %v4328_v59, 2  ;;  %v987_v43 = vsel %vm928_vm2, %v986_v35, %v4685_v10  ;;  %v1155_v10 = vrot.slane %v4458_v11, 7 }
 0x19d   : > { %v1144_v48 = vsel %vm931_vm3, %v6582_v2, %v1142_v17  ;;  %v975_v5 = vsel %vm931_vm3, %v6583_v14, %v973_v57  ;;  %v2496_v31 = vsel %vm931_vm3, %v6585_v30, %v2494_v47  ;;  %v777_v17 = vadd.f32 %v776_v1, %v688_v13  ;;  %v6588_v57 = vld [vmem:[#allocation30_spill] sm:$0xff]  ;;  %3293 = vmatmul.msk.f32.vlgmr.msra.gmra.mxu3 %vm988_vm6, %v987_v43 }
 0x19e   : > { %v2607_v62 = vsel %vm931_vm3, %v6586_v25, %v2605_v4  ;;  %v1042_v60 = vsel %vm937_vm5, %v6587_v36, %v1040_v53  ;;  %v6589_v2 = vrot.slane %v6588_v57, 4  ;;  %v980_v30 = vrot.slane %v4768_v39, 2  ;;  %v3310_v13 = vld [vmem:[%s6353_s3 + $0x70] sm:$0xff]  ;;  %1330 = vmatpush.msra.mxu3 %v3311_v32 }
 0x19f   : > { %v6590_v25 = vrot.slane %v4617_v41, 3  ;;  %v6591_v4 = vrot.slane %v3949_v63, 5  ;;  %v1050_v1 = vsel %vm928_vm2, %v1049_v7, %v4409_v16  ;;  %v4824_v35 = vmax.f32 %v777_v17, 0.0 }
 0x1a0   : > { %v977_v47 = vsel %vm934_vm4, %v6589_v2, %v975_v5  ;;  %v6593_v5 = vld [vmem:[#allocation29_spill] sm:$0xff]  ;;  %v1044_v16 = vsel %vm940_vm7, %v1043_v46, %v1042_v60  ;;  %v1061_v11 = vrot.slane %v4620_v29, 5  ;;  %v1168_v7 = vrot.slane %v4620_v29, 7  ;;  %1331 = vmatpush.msra.mxu3 %v3310_v13 }
 0x1a1   : > { %v979_v36 = vsel %vm937_vm5, %v6590_v25, %v977_v47  ;;  %v1146_v53 = vsel %vm934_vm4, %v6591_v4, %v1144_v48  ;;  %6592 = vst [vmem:[#allocation30_spill] sm:$0xff] %v4824_v35  ;;  %v6594_v43 = vrot.slane %v6593_v5, 5  ;;  %v6595_v63 = vrot.slane %v6593_v5, 6 }
 0x1a2   : > { %v981_v14 = vsel %vm940_vm7, %v980_v30, %v979_v36  ;;  %v4840_v17 = vsel %vm925_vm1, %v4740_v12, %v4356_v15  ;;  %v4849_v32 = vrot.slane %v4824_v35, 4  ;;  %v2500_v46 = vrot.slane %v4824_v35, 3  ;;  %v690_v30 = vpop.f32.mrf.mxu0  ;;  %v779_v15 = vpop.f32.mrf.mxu1 }
 0x1a3   : > { %v2498_v2 = vsel %vm934_vm4, %v6594_v43, %v2496_v31  ;;  %v2609_v48 = vsel %vm934_vm4, %v6595_v63, %v2607_v62  ;;  %3292 = vmatmul.msk.f32.gmra.mxu2 %vm988_vm6, %v981_v14  ;;  %v3309_v31 = vld [vmem:[%s6353_s3 + $0x68] sm:$0xff]  ;;  %v4846_v62 = vrot.slane %v4824_v35, 2  ;;  %v6598_v60 = vrot.slane %v4328_v59, 4  ;;  %v3308_v59 = vld [vmem:[%s6353_s3 + $0x60] sm:$0xff] }
 0x1a4   : > { %6597 = vst [vmem:[#allocation63_spill] sm:$0xff] %v4849_v32  ;;  %v2499_v25 = vsel %vm937_vm5, %v4676_v6, %v2498_v2  ;;  %v6599_v36 = vrot.slane %v4582_v37, 5  ;;  %v1051_v14 = vsel %vm931_vm3, %v6560_v42, %v1050_v1  ;;  %v1156_v43 = vsel %vm928_vm2, %v1155_v10, %v4414_v23  ;;  %1332 = vmatpush.msra.mxu3 %v3309_v31  ;;  %v6600_v10 = vld [vmem:[#allocation43_spill] sm:$0xff] }
 0x1a5   : > { %6596 = vst [vmem:[#allocation62_spill] sm:$0xff] %v4846_v62  ;;  %v1148_v47 = vsel %vm937_vm5, %v6598_v60, %v1146_v53  ;;  %v691_v53 = vadd.f32 %v4717_v27, %v690_v30  ;;  %v2501_v13 = vsel %vm940_vm7, %v2500_v46, %v2499_v25  ;;  %v2506_v63 = vrot.slane %v4846_v62, 7  ;;  %v6603_v25 = vld [vmem:[#allocation18_spill] sm:$0xff]  ;;  %3294 = vmatmul.msk.f32.vlgmr.msrb.gmra.mxu3 %vm988_vm6, %v1044_v16 }
 0x1a6   : > { %v2611_v4 = vsel %vm937_vm5, %v6599_v36, %v2609_v48  ;;  %3412 = vmatmul.msk.f32.gmra.mxu0 %vm988_vm6, %v2501_v13  ;;  %v2618_v23 = vsel %vm928_vm2, %v4846_v62, %v4755_v24  ;;  %v1062_v1 = vsel %vm928_vm2, %v1061_v11, %v4466_v44  ;;  %v1169_v48 = vsel %vm928_vm2, %v1168_v7, %v6600_v10  ;;  %v6606_v7 = vld [vmem:[#allocation36_spill] sm:$0xff] }
 0x1a7   : > { %v2612_v2 = vsel %vm940_vm7, %v4849_v32, %v2611_v4  ;;  %v4882_v46 = vrot.slane %v4740_v12, 4  ;;  %v4884_v60 = vadd.f32 %v779_v15, %v691_v53  ;;  %v1149_v31 = vrot.slane %v4461_v54, 3  ;;  %1333 = vmatpush.msra.mxu3 %v3308_v59  ;;  %v6608_v53 = vld [vmem:[#allocation21_spill] sm:$0xff] }
 0x1a8   : > { %3421 = vmatmul.msk.f32.gmra.mxu1 %vm988_vm6, %v2612_v2  ;;  %v2507_v30 = vsel %vm928_vm2, %v2506_v63, %v4696_v0  ;;  %v6604_v36 = vrot.slane %v6603_v25, 7  ;;  %v6605_v44 = vrot.slane %v6603_v25, 6  ;;  %v6607_v4 = vrot.slane %v6606_v7, 6 }
 0x1a9   : > { %6601 = vst [vmem:[#allocation43_spill] sm:$0xff] %v4882_v46  ;;  %v6609_v54 = vrot.slane %v6608_v53, 3  ;;  %v6610_v0 = vrot.slane %v3980_v33, 6  ;;  %v1150_v59 = vsel %vm940_vm7, %v1149_v31, %v1148_v47  ;;  %v6611_v16 = vrot.slane %v6606_v7, 5 }
 0x1aa   : > { %6602 = vst [vmem:[#allocation64_spill] sm:$0xff] %v4884_v60  ;;  %v2620_v24 = vsel %vm931_vm3, %v6604_v36, %v2618_v23  ;;  %v2509_v11 = vsel %vm931_vm3, %v6605_v44, %v2507_v30  ;;  %v6612_v23 = vrot.slane %v6560_v42, 4  ;;  %v6613_v30 = vrot.slane %v6560_v42, 6  ;;  %v6616_v44 = vld [vmem:[#allocation40_spill] sm:$0xff] }
 0x1ab   : > { %v2622_v15 = vsel %vm934_vm4, %v6607_v4, %v2620_v24  ;;  %v1053_v13 = vsel %vm934_vm4, %v6609_v54, %v1051_v14  ;;  %v1158_v2 = vsel %vm931_vm3, %v6610_v0, %v1156_v43  ;;  %v2511_v63 = vsel %vm934_vm4, %v6611_v16, %v2509_v11  ;;  %3303 = vmatmul.msk.f32.vlgmr.msrb.gmra.mxu2 %vm988_vm6, %v1150_v59  ;;  %v3319_v4 = vld [vmem:[%s6353_s3 + $0x90] sm:$0xff] }
 0x1ac   : > { %v1064_v10 = vsel %vm931_vm3, %v6612_v23, %v1062_v1  ;;  %v1171_v36 = vsel %vm931_vm3, %v6613_v30, %v1169_v48  ;;  %v6614_v14 = vrot.slane %v4676_v6, 4  ;;  %v6615_v47 = vrot.slane %v4676_v6, 5  ;;  %v3320_v48 = vld [vmem:[%s6353_s3 + $0x98] sm:$0xff]  ;;  %v692_v23 = vpop.f32.mrf.mxu0  ;;  %v781_v30 = vpop.f32.mrf.mxu1 }
 0x1ad   : > { %v1055_v24 = vrot.slane %v4590_v56, 1  ;;  %v6617_v11 = vrot.slane %v4740_v12, 1  ;;  %v2514_v54 = vrot.slane %v4849_v32, 3  ;;  %v2625_v0 = vrot.slane %v4849_v32, 4  ;;  %1442 = vmatpush.msra.mxu2 %v3320_v48 }
 0x1ae   : > { %v2513_v43 = vsel %vm937_vm5, %v6614_v14, %v2511_v63  ;;  %v2624_v31 = vsel %vm937_vm5, %v6615_v47, %v2622_v15  ;;  %v6618_v15 = vld [vmem:[#allocation41_spill] sm:$0xff]  ;;  %v6619_v16 = vrot.slane %v6608_v53, 5  ;;  %v1162_v14 = vrot.slane %v4590_v56, 3 }
 0x1af   : > { %v2630_v1 = vsel %vm925_vm1, %v6617_v11, %v6616_v44  ;;  %v1054_v59 = vsel %vm937_vm5, %v6618_v15, %v1053_v13  ;;  %v6620_v47 = vrot.slane %v4155_v45, 3  ;;  %v6621_v11 = vrot.slane %v4155_v45, 5  ;;  %v3318_v13 = vld [vmem:[%s6353_s3 + $0x88] sm:$0xff]  ;;  %1443 = vmatpush.msra.mxu2 %v3319_v4 }
 0x1b0   : > { %v1160_v63 = vsel %vm934_vm4, %v6619_v16, %v1158_v2  ;;  %v1075_v60 = vrot.slane %v4748_v28, 5  ;;  %v693_v2 = vadd.f32 %v4717_v27, %v692_v23  ;;  %v2515_v48 = vsel %vm940_vm7, %v2514_v54, %v2513_v43 }
 0x1b1   : > { %v1066_v44 = vsel %vm934_vm4, %v6620_v47, %v1064_v10  ;;  %v1173_v12 = vsel %vm934_vm4, %v6621_v11, %v1171_v36  ;;  %v2626_v16 = vsel %vm940_vm7, %v2625_v0, %v2624_v31  ;;  %v6622_v10 = vrot.slane %v3983_v34, 5  ;;  %3413 = vmatmul.msk.f32.gmra.mxu0 %vm988_vm6, %v2515_v48  ;;  %1444 = vmatpush.msra.mxu2 %v3318_v13 }
 0x1b2   : > { %v1587_v36 = vrot.slane %v4496_v58, 7  ;;  %3422 = vmatmul.msk.f32.gmra.mxu1 %vm988_vm6, %v2626_v16  ;;  %v1056_v11 = vsel %vm940_vm7, %v1055_v24, %v1054_v59  ;;  %v1161_v27 = vsel %vm937_vm5, %v4391_v3, %v1160_v63  ;;  %v2636_v43 = vrot.slane %v4781_v61, 5 }
 0x1b3   : > { %v1479_v47 = vsel %vm931_vm3, %v6622_v10, %v4614_v50  ;;  %v782_v31 = vadd.f32 %v781_v30, %v693_v2  ;;  %v6623_v4 = vrot.slane %v4391_v3, 2  ;;  %v1069_v50 = vrot.slane %v4658_v55, 1  ;;  %3295 = vmatmul.msk.f32.gmra.mxu3 %vm988_vm6, %v1056_v11  ;;  %v3329_v30 = vld [vmem:[%s6353_s3 + $0xb8] sm:$0xff] }
 0x1b4   : > { %v6624_v0 = vrot.slane %v4391_v3, 4  ;;  %v1176_v24 = vrot.slane %v4658_v55, 3  ;;  %v1076_v59 = vsel %vm928_vm2, %v1075_v60, %v4670_v52  ;;  %v1181_v63 = vrot.slane %v4748_v28, 7  ;;  %1554 = vmatpush.msrb.mxu3 %v3329_v30 }
 0x1b5   : > { %v1068_v54 = vsel %vm937_vm5, %v6623_v4, %v1066_v44  ;;  %v3317_v44 = vld [vmem:[%s6353_s3 + $0x80] sm:$0xff]  ;;  %v4986_v2 = vmax.f32 %v782_v31, 0.0  ;;  %v1163_v48 = vsel %vm940_vm7, %v1162_v14, %v1161_v27  ;;  %v2525_v52 = vrot.slane %v4781_v61, 4 }
 0x1b6   : > { %v1175_v23 = vsel %vm937_vm5, %v6624_v0, %v1173_v12  ;;  %v6625_v12 = vrot.slane %v6550_v38, 4  ;;  %1445 = vmatpush.msra.mxu2 %v3317_v44  ;;  %v6627_v60 = vrot.slane %v4385_v22, 3  ;;  %v1070_v10 = vsel %vm940_vm7, %v1069_v50, %v1068_v54  ;;  %v6630_v54 = vld [vmem:[#allocation20_spill] sm:$0xff]  ;;  %v6633_v44 = vld [vmem:[#allocation37_spill] sm:$0xff] }
 0x1b7   : > { %6626 = vst [vmem:[#allocation21_spill] sm:$0xff] %v4986_v2  ;;  %3304 = vmatmul.msk.f32.gmra.mxu2 %vm988_vm6, %v1163_v48  ;;  %v1177_v11 = vsel %vm940_vm7, %v1176_v24, %v1175_v23  ;;  %v1588_v31 = vsel %vm928_vm2, %v1587_v36, %v4506_v40  ;;  %v5000_v14 = vrot.slane %v4986_v2, 2  ;;  %v2631_v27 = vsel %vm928_vm2, %v4986_v2, %v2630_v1 }
 0x1b8   : > { %v1481_v13 = vsel %vm934_vm4, %v6625_v12, %v1479_v47  ;;  %v1484_v47 = vrot.slane %v4598_v19, 2  ;;  %v2519_v4 = vrot.slane %v4986_v2, 7  ;;  %v6629_v0 = vrot.slane %v4032_v20, 4 }
 0x1b9   : > { %v1483_v16 = vsel %vm937_vm5, %v6627_v60, %v1481_v13  ;;  %6628 = vst [vmem:[#allocation40_spill] sm:$0xff] %v5000_v14  ;;  %v6631_v50 = vrot.slane %v6630_v54, 7  ;;  %v1182_v24 = vsel %vm928_vm2, %v1181_v63, %v4633_v49  ;;  %v6632_v36 = vrot.slane %v3983_v34, 6 }
 0x1ba   : > { %v1078_v30 = vsel %vm931_vm3, %v6629_v0, %v1076_v59  ;;  %v5014_v40 = vsel %vm940_vm7, %v1484_v47, %v1483_v16  ;;  %v6634_v12 = vrot.slane %v6633_v44, 6  ;;  %v2638_v59 = vrot.slane %v5000_v14, 4 }
 0x1bb   : > { %v2633_v23 = vsel %vm931_vm3, %v6631_v50, %v2631_v27  ;;  %v1590_v1 = vsel %vm931_vm3, %v6632_v36, %v1588_v31  ;;  %v2520_v48 = vsel %vm928_vm2, %v2519_v4, %v4840_v17  ;;  %v2527_v60 = vrot.slane %v5000_v14, 3  ;;  %3296 = vmatmul.msk.f32.gmra.mxu3 %vm988_vm6, %v1070_v10 }
 0x1bc   : > { %v2635_v13 = vsel %vm934_vm4, %v6634_v12, %v2633_v23  ;;  %v6635_v63 = vrot.slane %v6630_v54, 6  ;;  %v6636_v47 = vrot.slane %v6588_v57, 3  ;;  %v1595_v27 = vrot.slane %v4598_v19, 3  ;;  %v6639_v23 = vld [vmem:[#allocation47_spill] sm:$0xff] }
 0x1bd   : > { %v2637_v49 = vsel %vm937_vm5, %v2636_v43, %v2635_v13  ;;  %v6637_v50 = vrot.slane %v6633_v44, 5  ;;  %v6638_v4 = vrot.slane %v6550_v38, 5  ;;  %v1490_v36 = vrot.slane %v6639_v23, 6  ;;  %v6664_v44 = vld [vmem:[#allocation46_spill] sm:$0xff] }
 0x1be   : > { %v2522_v16 = vsel %vm931_vm3, %v6635_v63, %v2520_v48  ;;  %v1080_v31 = vsel %vm934_vm4, %v6636_v47, %v1078_v30  ;;  %v2639_v0 = vsel %vm940_vm7, %v2638_v59, %v2637_v49  ;;  %v6640_v12 = vrot.slane %v4032_v20, 6 }
 0x1bf   : > { %v2524_v17 = vsel %vm934_vm4, %v6637_v50, %v2522_v16  ;;  %v1592_v43 = vsel %vm934_vm4, %v6638_v4, %v1590_v1  ;;  %3423 = vmatmul.msk.f32.gmra.mxu1 %vm988_vm6, %v2639_v0  ;;  %v6641_v59 = vrot.slane %v4385_v22, 4  ;;  %v1601_v49 = vrot.slane %v6639_v23, 7  ;;  %v6643_v16 = vld [vmem:[#allocation7_spill] sm:$0xff]  ;;  %3305 = vmatmul.msk.f32.gmra.mxu2 %vm988_vm6, %v1177_v11  ;;  %v6644_v0 = vld [vmem:[#allocation49_spill] sm:$0xff]  ;;  %v6645_v50 = vld [vmem:[#allocation22_spill] sm:$0xff] }
 0x1c0   : > { %v2526_v30 = vsel %vm937_vm5, %v2525_v52, %v2524_v17  ;;  %v1184_v13 = vsel %vm931_vm3, %v6640_v12, %v1182_v24  ;;  %v5054_v63 = vrot.slane %v4986_v2, 4  ;;  %v5061_v52 = vsel %vm928_vm2, %v1490_v36, %v6643_v16  ;;  %v6665_v2 = vld [vmem:[#allocation11_spill] sm:$0xff] }
 0x1c1   : > { %v1594_v48 = vsel %vm937_vm5, %v6641_v59, %v1592_v43  ;;  %v2528_v1 = vsel %vm940_vm7, %v2527_v60, %v2526_v30  ;;  %v1081_v24 = vrot.slane %v4617_v41, 2  ;;  %v2643_v47 = vrot.slane %v4882_v46, 1  ;;  %v3328_v60 = vld [vmem:[%s6353_s3 + $0xb0] sm:$0xff] }
 0x1c2   : > { %6642 = vst [vmem:[#allocation41_spill] sm:$0xff] %v5054_v63  ;;  %v5057_v10 = vsel %vm940_vm7, %v1595_v27, %v1594_v48  ;;  %3414 = vmatmul.msk.f32.gmra.mxu0 %vm988_vm6, %v2528_v1  ;;  %v5072_v27 = vsel %vm928_vm2, %v1601_v49, %v6644_v0  ;;  %v2640_v17 = vrot.slane %v6645_v50, 3  ;;  %v6646_v4 = vrot.slane %v6588_v57, 5  ;;  %v6647_v43 = vld [vmem:[#allocation38_spill] sm:$0xff]  ;;  %1555 = vmatpush.msrb.mxu3 %v3328_v60 }
 0x1c3   : > { %v2530_v36 = vrot.slane %v6647_v43, 1  ;;  %v1082_v30 = vsel %vm937_vm5, %v1081_v24, %v1080_v31  ;;  %v1187_v12 = vrot.slane %v4617_v41, 4  ;;  %v1083_v59 = vrot.slane %v4768_v39, 1 }
 0x1c4   : > { %v1186_v11 = vsel %vm934_vm4, %v6646_v4, %v1184_v13  ;;  %v6648_v48 = vrot.slane %v6647_v43, 2  ;;  %v2529_v1 = vrot.slane %v6645_v50, 2  ;;  %v2533_v16 = vrot.slane %v5054_v63, 7  ;;  %v3336_v43 = vld [vmem:[%s6353_s3 + $0xc8] sm:$0xff] }
 0x1c5   : > { %v1188_v13 = vsel %vm937_vm5, %v1187_v12, %v1186_v11  ;;  %v1084_v60 = vsel %vm940_vm7, %v1083_v59, %v1082_v30  ;;  %v1189_v24 = vrot.slane %v4768_v39, 3  ;;  %v6649_v12 = vld [vmem:[#allocation31_spill] sm:$0xff]  ;;  %v1700_v59 = vrot.slane %v3983_v34, 7 }
 0x1c6   : > { %v2642_v49 = vsel %vm922_vm0, %v6648_v48, %v2640_v17  ;;  %v2531_v4 = vsel %vm922_vm0, %v2530_v36, %v2529_v1  ;;  %3297 = vmatmul.msk.f32.gmra.mxu3 %vm988_vm6, %v1084_v60  ;;  %v1085_v30 = vrot.slane %v6649_v12, 7  ;;  %v6650_v36 = vld [vmem:[#allocation50_spill] sm:$0xff]  ;;  %v3327_v1 = vld [vmem:[%s6353_s3 + $0xa8] sm:$0xff]  ;;  %v1089_v34 = vrot.slane %v4771_v21, 5 }
 0x1c7   : > { %v2644_v0 = vsel %vm925_vm1, %v2643_v47, %v2642_v49  ;;  %v2532_v17 = vsel %vm925_vm1, %v4882_v46, %v2531_v4  ;;  %v1190_v47 = vsel %vm940_vm7, %v1189_v24, %v1188_v13  ;;  %v1087_v48 = vrot.slane %v6650_v36, 6  ;;  %1556 = vmatpush.msrb.mxu3 %v3327_v1  ;;  %v6652_v4 = vld [vmem:[#allocation15_spill] sm:$0xff] }
 0x1c8   : > { %v2645_v31 = vsel %vm928_vm2, %v5054_v63, %v2644_v0  ;;  %v2534_v11 = vsel %vm928_vm2, %v2533_v16, %v2532_v17  ;;  %3306 = vmatmul.msk.f32.gmra.mxu2 %vm988_vm6, %v1190_v47  ;;  %v1192_v49 = vrot.slane %v6649_v12, 1  ;;  %v6651_v0 = vld [vmem:[#allocation23_spill] sm:$0xff]  ;;  %v1702_v13 = vrot.slane %v6550_v38, 6 }
 0x1c9   : > { %3424 = vmatmul.msk.f32.gmra.mxu1 %vm988_vm6, %v2645_v31  ;;  %v1699_v16 = vsel %vm928_vm2, %v4496_v58, %v6651_v0  ;;  %v1704_v31 = vrot.slane %v4385_v22, 5  ;;  %v1706_v24 = vrot.slane %v4598_v19, 4  ;;  %v1191_v17 = vrot.slane %v6652_v4, 2  ;;  %v6653_v0 = vld [vmem:[#allocation33_spill] sm:$0xff] }
 0x1ca   : > { %3415 = vmatmul.msk.f32.gmra.mxu0 %vm988_vm6, %v2534_v11  ;;  %v1701_v60 = vsel %vm931_vm3, %v1700_v59, %v1699_v16  ;;  %v1086_v11 = vsel %vm922_vm0, %v1085_v30, %v6652_v4  ;;  %v1195_v58 = vrot.slane %v4771_v21, 7  ;;  %v5126_v1 = vsel %vm928_vm2, %v6639_v23, %v6653_v0  ;;  %v3326_v23 = vld [vmem:[%s6353_s3 + $0xa0] sm:$0xff] }
 0x1cb   : > { %v1703_v47 = vsel %vm934_vm4, %v1702_v13, %v1701_v60  ;;  %v1088_v22 = vsel %vm925_vm1, %v1087_v48, %v1086_v11  ;;  %v1193_v16 = vsel %vm922_vm0, %v1192_v49, %v1191_v17  ;;  %1557 = vmatpush.msrb.mxu3 %v3326_v23  ;;  %v6654_v48 = vld [vmem:[#allocation24_spill] sm:$0xff]  ;;  %v1278_v49 = vrot.slane %v6618_v15, 1  ;;  %v6657_v11 = vld [vmem:[#allocation19_spill] sm:$0xff] }
 0x1cc   : > { %v1705_v38 = vsel %vm937_vm5, %v1704_v31, %v1703_v47  ;;  %v1090_v59 = vsel %vm928_vm2, %v1089_v34, %v1088_v22  ;;  %v1194_v30 = vsel %vm925_vm1, %v6650_v36, %v1193_v16  ;;  %v1276_v60 = vrot.slane %v6654_v48, 2  ;;  %v6655_v31 = vld [vmem:[#allocation9_spill] sm:$0xff]  ;;  %v6656_v47 = vld [vmem:[#allocation48_spill] sm:$0xff]  ;;  %v6658_v16 = vld [vmem:[#allocation10_spill] sm:$0xff] }
 0x1cd   : > { %v5130_v19 = vsel %vm940_vm7, %v1706_v24, %v1705_v38  ;;  %v1196_v13 = vsel %vm928_vm2, %v1195_v58, %v1194_v30  ;;  %v1268_v34 = vrot.slane %v3980_v33, 7  ;;  %v1275_v24 = vrot.slane %v6655_v31, 3  ;;  %v6659_v30 = vld [vmem:[#allocation52_spill] sm:$0xff] }
 0x1ce   : > { %3298 = vmatmul.msk.f32.gmra.mxu3 %vm988_vm6, %v1090_v59  ;;  %v1386_v17 = vrot.slane %v6571_v18, 7  ;;  %v1388_v38 = vrot.slane %v4469_v51, 6  ;;  %v1270_v0 = vrot.slane %v6608_v53, 6  ;;  %v1390_v59 = vrot.slane %v4699_v8, 5 }
 0x1cf   : > { %v1269_v58 = vsel %vm931_vm3, %v1268_v34, %v6657_v11  ;;  %v1277_v22 = vsel %vm922_vm0, %v1276_v60, %v1275_v24  ;;  %v3338_v34 = vld [vmem:[%s6353_s3 + $0xd8] sm:$0xff]  ;;  %v3337_v11 = vld [vmem:[%s6353_s3 + $0xd0] sm:$0xff]  ;;  %v6661_v24 = vld [vmem:[#allocation25_spill] sm:$0xff]  ;;  %v1281_v63 = vrot.slane %v6560_v42, 7  ;;  %v1291_v54 = vrot.slane %v6664_v44, 1 }
 0x1d0   : > { %3307 = vmatmul.msk.f32.gmra.mxu2 %vm988_vm6, %v1196_v13  ;;  %v6660_v13 = vld [vmem:[#allocation13_spill] sm:$0xff]  ;;  %v1271_v60 = vsel %vm934_vm4, %v1270_v0, %v1269_v58  ;;  %v1381_v50 = vrot.slane %v6661_v24, 3  ;;  %v6663_v0 = vld [vmem:[#allocation56_spill] sm:$0xff] }
 0x1d1   : > { %v1380_v23 = vsel %vm931_vm3, %v6660_v13, %v6659_v30  ;;  %v1387_v30 = vsel %vm922_vm0, %v1386_v17, %v6569_v26  ;;  %1665 = vmatpush.msrb.mxu2 %v3338_v34  ;;  %v1384_v14 = vrot.slane %v6663_v0, 1  ;;  %v1392_v61 = vrot.slane %v6660_v13, 4 }
 0x1d2   : > { %v1389_v46 = vsel %vm925_vm1, %v1388_v38, %v1387_v30  ;;  %v1382_v58 = vsel %vm934_vm4, %v1381_v50, %v1380_v23  ;;  %v1283_v30 = vrot.slane %v4155_v45, 6  ;;  %v1289_v50 = vrot.slane %v6665_v2, 3  ;;  %v6669_v2 = vld [vmem:[#allocation58_spill] sm:$0xff] }
 0x1d3   : > { %1666 = vmatpush.msrb.mxu2 %v3337_v11  ;;  %v1400_v23 = vrot.slane %v6593_v5, 7 }
 0x1d5   : > { %1667 = vmatpush.msrb.mxu2 %v3336_v43 }
 0x1d6   : > { %3312 = vmatmul.msk.f32.vlgmr.msra.gmra.mxu3 %vm988_vm6, %v6656_v47  ;;  %v1279_v47 = vsel %vm925_vm1, %v1278_v49, %v1277_v22  ;;  %v6662_v49 = vld [vmem:[#allocation39_spill] sm:$0xff] }
 0x1d7   : > { %v1272_v22 = vrot.slane %v6662_v49, 5 }
 0x1d8   : > { %3321 = vmatmul.msk.f32.vlgmr.msra.gmra.mxu2 %vm988_vm6, %v6658_v16  ;;  %v1280_v16 = vsel %vm928_vm2, %v4620_v29, %v1279_v47  ;;  %v1391_v47 = vsel %vm928_vm2, %v1390_v59, %v1389_v46  ;;  %v1383_v46 = vsel %vm937_vm5, %v4469_v51, %v1382_v58  ;;  %v6666_v59 = vld [vmem:[#allocation27_spill] sm:$0xff]  ;;  %v1290_v58 = vsel %vm922_vm0, %v6588_v57, %v1289_v50  ;;  %v6667_v50 = vld [vmem:[#allocation45_spill] sm:$0xff] }
 0x1d9   : > { %v1273_v17 = vsel %vm937_vm5, %v1272_v22, %v1271_v60  ;;  %v1282_v34 = vsel %vm931_vm3, %v1281_v63, %v1280_v16  ;;  %v1393_v63 = vsel %vm931_vm3, %v1392_v61, %v1391_v47  ;;  %v1394_v11 = vrot.slane %v6666_v59, 3  ;;  %v3347_v16 = vld [vmem:[%s6353_s3 + $0xf8] sm:$0xff]  ;;  %v3335_v22 = vld [vmem:[%s6353_s3 + $0xc0] sm:$0xff] }
 0x1da   : > { %v1274_v38 = vsel %vm940_vm7, %v4658_v55, %v1273_v17  ;;  %v1402_v60 = vrot.slane %v4582_v37, 6  ;;  %v1385_v43 = vsel %vm940_vm7, %v1384_v14, %v1383_v46  ;;  %v1284_v17 = vsel %vm934_vm4, %v1283_v30, %v1282_v34  ;;  %1776 = vmatpush.msra.mxu3 %v3347_v16  ;;  %1668 = vmatpush.msrb.mxu2 %v3335_v22 }
 0x1db   : > { %v1404_v61 = vrot.slane %v4824_v35, 5  ;;  %v1285_v47 = vrot.slane %v4391_v3, 5  ;;  %v1395_v44 = vsel %vm934_vm4, %v1394_v11, %v1393_v63  ;;  %v1401_v34 = vsel %vm922_vm0, %v1400_v23, %v6584_v9 }
 0x1dc   : > { %v1396_v46 = vrot.slane %v6667_v50, 2  ;;  %v1294_v16 = vrot.slane %v4032_v20, 7  ;;  %v1403_v22 = vsel %vm925_vm1, %v1402_v60, %v1401_v34 }
 0x1dd   : > { %v1286_v30 = vsel %vm937_vm5, %v1285_v47, %v1284_v17  ;;  %v1398_v17 = vrot.slane %v6669_v2, 1  ;;  %v1296_v47 = vrot.slane %v6588_v57, 6 }
 0x1de   : > { %3313 = vmatmul.msk.f32.gmra.mxu3 %vm988_vm6, %v1274_v38  ;;  %v1292_v38 = vsel %vm925_vm1, %v1291_v54, %v1290_v58  ;;  %v1405_v54 = vsel %vm928_vm2, %v1404_v61, %v1403_v22  ;;  %v1397_v63 = vsel %vm937_vm5, %v1396_v46, %v1395_v44  ;;  %v6668_v58 = vld [vmem:[#allocation17_spill] sm:$0xff]  ;;  %v6670_v22 = vld [vmem:[#allocation34_spill] sm:$0xff]  ;;  %v1300_v46 = vrot.slane %v4768_v39, 4 }
 0x1df   : > { %v1293_v14 = vsel %vm928_vm2, %v4748_v28, %v1292_v38  ;;  %v1406_v38 = vrot.slane %v6668_v58, 4  ;;  %v1399_v34 = vsel %vm940_vm7, %v1398_v17, %v1397_v63  ;;  %v1408_v44 = vrot.slane %v6670_v22, 3 }
 0x1e0   : > { %3322 = vmatmul.msk.f32.gmra.mxu2 %vm988_vm6, %v1385_v43  ;;  %v1287_v43 = vrot.slane %v4658_v55, 4  ;;  %v1295_v11 = vsel %vm931_vm3, %v1294_v16, %v1293_v14  ;;  %v1298_v14 = vrot.slane %v4617_v41, 5 }
 0x1e1   : > { %v1407_v60 = vsel %vm931_vm3, %v1406_v38, %v1405_v54  ;;  %v1297_v61 = vsel %vm934_vm4, %v1296_v47, %v1295_v11  ;;  %v6671_v54 = vld [vmem:[#allocation53_spill] sm:$0xff]  ;;  %v1303_v47 = vrot.slane %v6649_v12, 2 }
 0x1e2   : > { %v1288_v23 = vsel %vm940_vm7, %v1287_v43, %v1286_v30  ;;  %v3346_v30 = vld [vmem:[%s6353_s3 + $0xf0] sm:$0xff]  ;;  %v1409_v16 = vsel %vm934_vm4, %v1408_v44, %v1407_v60  ;;  %v1299_v43 = vsel %vm937_vm5, %v1298_v14, %v1297_v61  ;;  %v1410_v63 = vrot.slane %v6671_v54, 2 }
 0x1e3   : > { %1777 = vmatpush.msra.mxu3 %v3346_v30  ;;  %v1301_v38 = vsel %vm940_vm7, %v1300_v46, %v1299_v43  ;;  %v1305_v60 = vrot.slane %v6650_v36, 1  ;;  %v1302_v61 = vrot.slane %v6652_v4, 3  ;;  %v1414_v44 = vrot.slane %v6606_v7, 7 }
 0x1e4   : > { %v1411_v11 = vsel %vm937_vm5, %v1410_v63, %v1409_v16  ;;  %v1416_v14 = vrot.slane %v4676_v6, 6  ;;  %v1418_v46 = vrot.slane %v4849_v32, 5 }
 0x1e5   : > { %v1304_v30 = vsel %vm922_vm0, %v1303_v47, %v1302_v61  ;;  %v1415_v63 = vsel %vm922_vm0, %v1414_v44, %v6603_v25  ;;  %v1502_v61 = vrot.slane %v4699_v8, 6  ;;  %v1611_v44 = vrot.slane %v6571_v18, 1 }
 0x1e6   : > { %3314 = vmatmul.msk.f32.gmra.mxu3 %vm988_vm6, %v1288_v23  ;;  %v1412_v23 = vrot.slane %v4846_v62, 1  ;;  %v1306_v16 = vsel %vm925_vm1, %v1305_v60, %v1304_v30  ;;  %v1500_v60 = vrot.slane %v4469_v51, 7 }
 0x1e7   : > { %v1307_v43 = vsel %vm928_vm2, %v4771_v21, %v1306_v16  ;;  %v1610_v16 = vrot.slane %v6569_v26, 2  ;;  %v1608_v21 = vrot.slane %v6663_v0, 3 }
 0x1e8   : > { %3323 = vmatmul.msk.f32.gmra.mxu2 %vm988_vm6, %v1399_v34  ;;  %v1413_v17 = vsel %vm940_vm7, %v1412_v23, %v1411_v11  ;;  %v3345_v34 = vld [vmem:[%s6353_s3 + $0xe8] sm:$0xff]  ;;  %v1417_v11 = vsel %vm925_vm1, %v1416_v14, %v1415_v63  ;;  %v3344_v23 = vld [vmem:[%s6353_s3 + $0xe0] sm:$0xff] }
 0x1e9   : > { %1778 = vmatpush.msra.mxu3 %v3345_v34  ;;  %v1498_v34 = vrot.slane %v6569_v26, 1 }
 0x1eb   : > { %1779 = vmatpush.msra.mxu3 %v3344_v23  ;;  %v1605_v23 = vrot.slane %v6661_v24, 5 }
 0x1ee   : > { %3315 = vmatmul.msk.f32.gmra.mxu3 %vm988_vm6, %v1301_v38  ;;  %v1419_v38 = vsel %vm928_vm2, %v1418_v46, %v1417_v11  ;;  %v1499_v46 = vsel %vm922_vm0, %v6571_v18, %v1498_v34  ;;  %v3355_v11 = vld [vmem:[%s6353_s3 + $0x110] sm:$0xff]  ;;  %v1504_v34 = vrot.slane %v6660_v13, 5 }
 0x1f0   : > { %3324 = vmatmul.msk.f32.gmra.mxu2 %vm988_vm6, %v1413_v17  ;;  %v6672_v17 = vld [vmem:[#allocation8_spill] sm:$0xff] }
 0x1f1   : > { %v1492_v47 = vrot.slane %v6672_v17, 5  ;;  %v1603_v30 = vrot.slane %v6672_v17, 6 }
 0x1f3   : > { %v1493_v14 = vsel %vm931_vm3, %v1492_v47, %v5061_v52  ;;  %v1604_v63 = vsel %vm931_vm3, %v1603_v30, %v5072_v27  ;;  %v3356_v52 = vld [vmem:[%s6353_s3 + $0x118] sm:$0xff]  ;;  %v1612_v47 = vsel %vm922_vm0, %v1611_v44, %v1610_v16  ;;  %v6673_v27 = vld [vmem:[#allocation42_spill] sm:$0xff]  ;;  %v1616_v44 = vrot.slane %v6660_v13, 6 }
 0x1f4   : > { %1888 = vmatpush.msra.mxu2 %v3356_v52  ;;  %v1613_v30 = vsel %vm925_vm1, %v4469_v51, %v1612_v47  ;;  %v1512_v52 = vrot.slane %v6584_v9, 1  ;;  %v1514_v47 = vrot.slane %v4582_v37, 7 }
 0x1f6   : > { %3316 = vmatmul.msk.f32.gmra.mxu3 %vm988_vm6, %v1307_v43  ;;  %v1614_v43 = vrot.slane %v4699_v8, 7  ;;  %1889 = vmatpush.msra.mxu2 %v3355_v11 }
 0x1f8   : > { %3325 = vmatmul.msk.f32.gmra.mxu2 %vm988_vm6, %v1419_v38  ;;  %v1494_v38 = vsel %vm934_vm4, %v6666_v59, %v1493_v14  ;;  %v1606_v14 = vsel %vm934_vm4, %v1605_v23, %v1604_v63  ;;  %v1506_v63 = vrot.slane %v6666_v59, 4  ;;  %v1516_v23 = vrot.slane %v4824_v35, 6 }
 0x1f9   : > { %v1607_v11 = vsel %vm937_vm5, %v6667_v50, %v1606_v14  ;;  %v1627_v14 = vrot.slane %v4824_v35, 7 }
 0x1fe   : > { %3330 = vmatmul.msk.f32.vlgmr.msrb.gmra.mxu3 %vm988_vm6, %v5014_v40  ;;  %v1501_v40 = vsel %vm925_vm1, %v1500_v60, %v1499_v46  ;;  %v1495_v60 = vrot.slane %v6673_v27, 3  ;;  %v3354_v46 = vld [vmem:[%s6353_s3 + $0x108] sm:$0xff] }
 0x1ff   : > { %1890 = vmatpush.msra.mxu2 %v3354_v46 }
 0x200   : > { %3339 = vmatmul.msk.f32.vlgmr.msrb.gmra.mxu2 %vm988_vm6, %v5057_v10  ;;  %v1503_v10 = vsel %vm928_vm2, %v1502_v61, %v1501_v40  ;;  %v1615_v61 = vsel %vm928_vm2, %v1614_v43, %v1613_v30  ;;  %v1496_v16 = vsel %vm937_vm5, %v1495_v60, %v1494_v38  ;;  %v1624_v43 = vrot.slane %v6593_v5, 1  ;;  %v3365_v60 = vld [vmem:[%s6353_s3 + $0x138] sm:$0xff] }
 0x201   : > { %v1505_v40 = vsel %vm931_vm3, %v1504_v34, %v1503_v10  ;;  %v1497_v36 = vsel %vm940_vm7, %v4699_v8, %v1496_v16  ;;  %v1617_v38 = vsel %vm931_vm3, %v1616_v44, %v1615_v61  ;;  %v1618_v10 = vrot.slane %v6666_v59, 5  ;;  %v3353_v34 = vld [vmem:[%s6353_s3 + $0x100] sm:$0xff]  ;;  %2000 = vmatpush.msrb.mxu3 %v3365_v60 }
 0x202   : > { %v1609_v30 = vsel %vm940_vm7, %v1608_v21, %v1607_v11  ;;  %v1507_v46 = vsel %vm934_vm4, %v1506_v63, %v1505_v40  ;;  %1891 = vmatpush.msra.mxu2 %v3353_v34  ;;  %v1508_v61 = vrot.slane %v6667_v50, 3  ;;  %v1625_v21 = vsel %vm922_vm0, %v1624_v43, %v6668_v58 }
 0x203   : > { %v1619_v16 = vsel %vm934_vm4, %v1618_v10, %v1617_v38  ;;  %v1518_v63 = vrot.slane %v6668_v58, 5  ;;  %v1626_v11 = vsel %vm925_vm1, %v4582_v37, %v1625_v21  ;;  %v1510_v60 = vrot.slane %v6669_v2, 2 }
 0x204   : > { %v1509_v40 = vsel %vm937_vm5, %v1508_v61, %v1507_v46  ;;  %v1629_v10 = vrot.slane %v6668_v58, 6  ;;  %v1622_v34 = vrot.slane %v6669_v2, 3  ;;  %v1631_v61 = vrot.slane %v6670_v22, 5 }
 0x205   : > { %v1511_v43 = vsel %vm940_vm7, %v1510_v60, %v1509_v40 }
 0x206   : > { %3331 = vmatmul.msk.f32.gmra.mxu3 %vm988_vm6, %v1497_v36  ;;  %v1513_v36 = vsel %vm922_vm0, %v6593_v5, %v1512_v52  ;;  %v1620_v52 = vrot.slane %v6667_v50, 4 }
 0x207   : > { %v1515_v44 = vsel %vm925_vm1, %v1514_v47, %v1513_v36  ;;  %v1628_v47 = vsel %vm928_vm2, %v1627_v14, %v1626_v11 }
 0x208   : > { %3340 = vmatmul.msk.f32.gmra.mxu2 %vm988_vm6, %v1609_v30  ;;  %v1517_v0 = vsel %vm928_vm2, %v1516_v23, %v1515_v44  ;;  %v1621_v38 = vsel %vm937_vm5, %v1620_v52, %v1619_v16  ;;  %v1520_v30 = vrot.slane %v6670_v22, 4  ;;  %v1630_v46 = vsel %vm931_vm3, %v1629_v10, %v1628_v47  ;;  %v3364_v44 = vld [vmem:[%s6353_s3 + $0x130] sm:$0xff]  ;;  %v5366_v16 = vpop.f32.mrf.mxu2 }
 0x209   : > { %v1519_v23 = vsel %vm931_vm3, %v1518_v63, %v1517_v0  ;;  %v1623_v36 = vsel %vm940_vm7, %v1622_v34, %v1621_v38  ;;  %v1522_v0 = vrot.slane %v6671_v54, 3  ;;  %v1632_v21 = vsel %vm934_vm4, %v1631_v61, %v1630_v46  ;;  %2001 = vmatpush.msrb.mxu3 %v3364_v44  ;;  %v3363_v44 = vld [vmem:[%s6353_s3 + $0x128] sm:$0xff] }
 0x20a   : > { %v1521_v14 = vsel %vm934_vm4, %v1520_v30, %v1519_v23  ;;  %v1633_v52 = vrot.slane %v6671_v54, 4  ;;  %v1524_v63 = vrot.slane %v4846_v62, 2  ;;  %v1635_v47 = vrot.slane %v4846_v62, 3 }
 0x20b   : > { %v1523_v40 = vsel %vm937_vm5, %v1522_v0, %v1521_v14  ;;  %v1806_v38 = vrot.slane %v6608_v53, 7  ;;  %v1808_v23 = vrot.slane %v6662_v49, 6  ;;  %v1528_v34 = vrot.slane %v4676_v6, 7  ;;  %2002 = vmatpush.msrb.mxu3 %v3363_v44 }
 0x20c   : > { %v1634_v11 = vsel %vm937_vm5, %v1633_v52, %v1632_v21  ;;  %v1525_v60 = vsel %vm940_vm7, %v1524_v63, %v1523_v40  ;;  %v1526_v46 = vrot.slane %v6603_v25, 1  ;;  %v1638_v14 = vrot.slane %v6606_v7, 1 }
 0x20d   : > { %v1636_v10 = vsel %vm940_vm7, %v1635_v47, %v1634_v11  ;;  %v1807_v61 = vsel %vm922_vm0, %v1806_v38, %v3980_v33  ;;  %v1637_v40 = vrot.slane %v6603_v25, 2  ;;  %v1641_v52 = vrot.slane %v4849_v32, 7 }
 0x20e   : > { %3332 = vmatmul.msk.f32.gmra.mxu3 %vm988_vm6, %v1511_v43  ;;  %v1810_v43 = vrot.slane %v4590_v56, 5  ;;  %v1809_v0 = vsel %vm925_vm1, %v1808_v23, %v1807_v61  ;;  %v1527_v21 = vsel %vm922_vm0, %v6606_v7, %v1526_v46  ;;  %v1820_v61 = vrot.slane %v4155_v45, 7 }
 0x20f   : > { %v1529_v11 = vsel %vm925_vm1, %v1528_v34, %v1527_v21  ;;  %v1639_v38 = vsel %vm922_vm0, %v1638_v14, %v1637_v40  ;;  %v1822_v34 = vrot.slane %v4391_v3, 6  ;;  %v1824_v14 = vrot.slane %v4658_v55, 5 }
 0x210   : > { %3341 = vmatmul.msk.f32.gmra.mxu2 %vm988_vm6, %v1623_v36  ;;  %v5382_v30 = vpop.f32.mrf.mxu2  ;;  %v1530_v36 = vrot.slane %v4849_v32, 6  ;;  %v1811_v63 = vsel %vm928_vm2, %v1810_v43, %v1809_v0  ;;  %v1640_v23 = vsel %vm925_vm1, %v4676_v6, %v1639_v38  ;;  %v1814_v43 = vrot.slane %v6654_v48, 3 }
 0x211   : > { %v1642_v46 = vsel %vm928_vm2, %v1641_v52, %v1640_v23  ;;  %v1816_v0 = vrot.slane %v6618_v15, 2  ;;  %v1821_v21 = vsel %vm922_vm0, %v1820_v61, %v6560_v42  ;;  %v1722_v40 = vrot.slane %v6571_v18, 2 }
 0x212   : > { %v1531_v47 = vsel %vm928_vm2, %v1530_v36, %v1529_v11  ;;  %v1823_v11 = vsel %vm925_vm1, %v1822_v34, %v1821_v21  ;;  %v1818_v38 = vrot.slane %v4620_v29, 1  ;;  %v1834_v61 = vrot.slane %v4617_v41, 6  ;;  %v6674_v21 = vld [vmem:[#allocation5_spill] sm:$0xff] }
 0x213   : > { %v1825_v23 = vsel %vm928_vm2, %v1824_v14, %v1823_v11  ;;  %v1836_v14 = vrot.slane %v4768_v39, 5  ;;  %v5440_v11 = vmax.f32 %v6674_v21, 0.0  ;;  %v1737_v18 = vrot.slane %v4582_v37, 1  ;;  %v3371_v37 = vld [vmem:[%s6353_s3 + $0x140] sm:$0xff] }
 0x216   : > { %3333 = vmatmul.msk.f32.gmra.mxu3 %vm988_vm6, %v1525_v60  ;;  %v1812_v60 = vrot.slane %v6655_v31, 4 }
 0x218   : > { %3342 = vmatmul.msk.f32.gmra.mxu2 %vm988_vm6, %v1636_v10  ;;  %v1813_v10 = vsel %vm931_vm3, %v1812_v60, %v1811_v63  ;;  %v5414_v44 = vpop.f32.mrf.mxu2  ;;  %v1714_v63 = vrot.slane %v6672_v17, 7  ;;  %v1724_v60 = vrot.slane %v4469_v51, 1 }
 0x219   : > { %v1815_v36 = vsel %vm934_vm4, %v1814_v43, %v1813_v10  ;;  %v1721_v10 = vrot.slane %v6569_v26, 3 }
 0x21a   : > { %v1817_v52 = vsel %vm937_vm5, %v1816_v0, %v1815_v36  ;;  %v1715_v43 = vsel %vm931_vm3, %v1714_v63, %v5126_v1  ;;  %v1716_v36 = vrot.slane %v6661_v24, 6  ;;  %v1826_v1 = vsel %vm931_vm3, %v6652_v4, %v1825_v23 }
 0x21b   : > { %v1819_v34 = vsel %vm940_vm7, %v1818_v38, %v1817_v52  ;;  %v1723_v0 = vsel %vm922_vm0, %v1722_v40, %v1721_v10  ;;  %v6676_v40 = vld [vmem:[#allocation28_spill] sm:$0xff]  ;;  %v1727_v23 = vrot.slane %v6660_v13, 7 }
 0x21c   : > { %v1717_v63 = vsel %vm934_vm4, %v1716_v36, %v1715_v43  ;;  %v1827_v38 = vrot.slane %v6676_v40, 3  ;;  %v3374_v43 = vld [vmem:[%s6353_s3 + $0x158] sm:$0xff]  ;;  %v6678_v36 = vld [vmem:[#allocation64_spill] sm:$0xff] }
 0x21d   : > { %2111 = vmatpush.msrb.mxu2 %v3374_v43 }
 0x21e   : > { %3334 = vmatmul.msk.f32.gmra.mxu3 %vm988_vm6, %v1531_v47  ;;  %v3362_v47 = vld [vmem:[%s6353_s3 + $0x120] sm:$0xff] }
 0x21f   : > { %2003 = vmatpush.msrb.mxu3 %v3362_v47  ;;  %v6675_v47 = vld [vmem:[#allocation6_spill] sm:$0xff] }
 0x220   : > { %3343 = vmatmul.msk.f32.gmra.mxu2 %vm988_vm6, %v1642_v46  ;;  %v1832_v46 = vrot.slane %v6588_v57, 7  ;;  %v5443_v5 = vmax.f32 %v6675_v47, 0.0  ;;  %v5449_v52 = vpop.f32.mrf.mxu3  ;;  %v6677_v47 = vld [vmem:[#allocation32_spill] sm:$0xff] }
 0x221   : > { %v5458_v51 = vmax.f32 %v6677_v47, 0.0  ;;  %v1830_v47 = vrot.slane %v4748_v28, 1 }
 0x222   : > { %v1833_v21 = vsel %vm922_vm0, %v1832_v46, %v4032_v20  ;;  %v1828_v46 = vsel %vm934_vm4, %v1827_v38, %v1826_v1  ;;  %v3372_v1 = vld [vmem:[%s6353_s3 + $0x148] sm:$0xff]  ;;  %v1846_v38 = vrot.slane %v5443_v5, 7 }
 0x223   : > { %v1848_v43 = vrot.slane %v5458_v51, 6 }
 0x226   : > { %3348 = vmatmul.msk.f32.vlgmr.msra.gmra.mxu3 %vm988_vm6, %v5130_v19  ;;  %v1725_v19 = vsel %vm925_vm1, %v1724_v60, %v1723_v0  ;;  %v1835_v60 = vsel %vm925_vm1, %v1834_v61, %v1833_v21  ;;  %v5467_v0 = vmax.f32 %v6678_v36, 0.0  ;;  %v1838_v21 = vrot.slane %v6652_v4, 4  ;;  %v3373_v36 = vld [vmem:[%s6353_s3 + $0x150] sm:$0xff] }
 0x227   : > { %v1726_v10 = vsel %vm928_vm2, %v4699_v8, %v1725_v19  ;;  %v5469_v19 = vpop.f32.mrf.mxu2  ;;  %v1837_v8 = vsel %vm928_vm2, %v1836_v14, %v1835_v60  ;;  %2112 = vmatpush.msrb.mxu2 %v3373_v36  ;;  %v1840_v60 = vrot.slane %v6649_v12, 3 }
 0x228   : > { %3357 = vmatmul.msk.f32.vlgmr.msra.gmra.mxu2 %vm988_vm6, %v1819_v34  ;;  %v1718_v34 = vrot.slane %v6673_v27, 5  ;;  %v1728_v61 = vsel %vm931_vm3, %v1727_v23, %v1726_v10  ;;  %v1735_v10 = vrot.slane %v6584_v9, 3  ;;  %v1839_v23 = vsel %vm931_vm3, %v1838_v21, %v1837_v8  ;;  %v1118_v26 = vpop.f32.mrf.mxu3 }
 0x229   : > { %v1850_v8 = vrot.slane %v5467_v0, 5  ;;  %2113 = vmatpush.msrb.mxu2 %v3372_v1  ;;  %v5507_v21 = vrot.slane %v5440_v11, 2  ;;  %v1731_v9 = vrot.slane %v6667_v50, 5  ;;  %v1847_v1 = vsel %vm922_vm0, %v1846_v38, %v5440_v11  ;;  %v6680_v38 = vld [vmem:[#allocation60_spill] sm:$0xff] }
 0x22a   : > { %v1719_v13 = vsel %vm937_vm5, %v1718_v34, %v1717_v63  ;;  %v1729_v63 = vrot.slane %v6666_v59, 6  ;;  %v1829_v34 = vsel %vm937_vm5, %v4617_v41, %v1828_v46  ;;  %v1736_v46 = vsel %vm922_vm0, %v6670_v22, %v1735_v10 }
 0x22b   : > { %v1720_v14 = vsel %vm940_vm7, %v6669_v2, %v1719_v13  ;;  %v3383_v13 = vld [vmem:[%s6353_s3 + $0x178] sm:$0xff]  ;;  %v1831_v36 = vsel %vm940_vm7, %v1830_v47, %v1829_v34  ;;  %v1738_v59 = vsel %vm925_vm1, %v1737_v18, %v1736_v46  ;;  %v1841_v47 = vsel %vm934_vm4, %v1840_v60, %v1839_v23  ;;  %2114 = vmatpush.msrb.mxu2 %v3371_v37 }
 0x22c   : > { %2222 = vmatpush.msra.mxu3 %v3383_v13  ;;  %v1119_v10 = vadd.f32 %v1118_v26, %v5366_v16  ;;  %v6679_v13 = vld [vmem:[#allocation50_spill] sm:$0xff]  ;;  %v1849_v18 = vsel %vm925_vm1, %v1848_v43, %v1847_v1  ;;  %v5523_v46 = vrot.slane %v5443_v5, 2  ;;  %v1844_v43 = vrot.slane %v6680_v38, 1 }
 0x22d   : > { %v1851_v60 = vsel %vm928_vm2, %v1850_v8, %v1849_v18  ;;  %v5537_v1 = vrot.slane %v5458_v51, 2  ;;  %v1746_v18 = vrot.slane %v4846_v62, 4  ;;  %v2035_v62 = vrot.slane %v6655_v31, 6 }
 0x22e   : > { %3349 = vmatmul.msk.f32.gmra.mxu3 %vm988_vm6, %v1720_v14  ;;  %v1730_v14 = vsel %vm934_vm4, %v1729_v63, %v1728_v61  ;;  %v1739_v61 = vsel %vm928_vm2, %v4824_v35, %v1738_v59  ;;  %v1740_v63 = vrot.slane %v6668_v58, 7  ;;  %v1733_v59 = vrot.slane %v6669_v2, 4 }
 0x22f   : > { %v1732_v34 = vsel %vm937_vm5, %v1731_v9, %v1730_v14  ;;  %v1224_v23 = vpop.f32.mrf.mxu2  ;;  %v1852_v9 = vrot.slane %v5507_v21, 4  ;;  %v1742_v14 = vrot.slane %v6670_v22, 6  ;;  %v1920_v58 = vrot.slane %v6662_v49, 7 }
 0x230   : > { %3358 = vmatmul.msk.f32.gmra.mxu2 %vm988_vm6, %v1831_v36  ;;  %v1842_v36 = vrot.slane %v6679_v13, 2  ;;  %v5527_v35 = vadd.f32 %v1224_v23, %v1119_v10  ;;  %v1741_v26 = vsel %vm931_vm3, %v1740_v63, %v1739_v61  ;;  %v1734_v16 = vsel %vm940_vm7, %v1733_v59, %v1732_v34  ;;  %v3382_v34 = vld [vmem:[%s6353_s3 + $0x170] sm:$0xff] }
 0x231   : > { %v1853_v8 = vsel %vm931_vm3, %v1852_v9, %v1851_v60  ;;  %v1854_v61 = vrot.slane %v5523_v46, 3  ;;  %v1744_v63 = vrot.slane %v6671_v54, 5  ;;  %v5550_v23 = vrot.slane %v5467_v0, 2  ;;  %2223 = vmatpush.msra.mxu3 %v3382_v34 }
 0x232   : > { %v1843_v37 = vsel %vm937_vm5, %v1842_v36, %v1841_v47  ;;  %v1743_v47 = vsel %vm934_vm4, %v1742_v14, %v1741_v26  ;;  %v1856_v26 = vrot.slane %v5537_v1, 2  ;;  %v5571_v34 = vrot.slane %v5458_v51, 4 }
 0x233   : > { %v1845_v10 = vsel %vm940_vm7, %v1844_v43, %v1843_v37  ;;  %v1855_v59 = vsel %vm934_vm4, %v1854_v61, %v1853_v8  ;;  %v1745_v37 = vsel %vm937_vm5, %v1744_v63, %v1743_v47  ;;  %v5558_v43 = vrot.slane %v5443_v5, 4 }
 0x234   : > { %v1747_v8 = vsel %vm940_vm7, %v1746_v18, %v1745_v37  ;;  %v1922_v47 = vrot.slane %v4590_v56, 6  ;;  %v2030_v61 = vrot.slane %v6608_v53, 1  ;;  %v1749_v63 = vrot.slane %v6606_v7, 2 }
 0x235   : > { %v1751_v37 = vrot.slane %v4676_v6, 1  ;;  %v1860_v7 = vrot.slane %v5558_v43, 7 }
 0x236   : > { %3350 = vmatmul.msk.f32.gmra.mxu3 %vm988_vm6, %v1734_v16  ;;  %v1121_v36 = vpop.f32.mrf.mxu3  ;;  %v1858_v16 = vrot.slane %v5550_v23, 1 }
 0x237   : > { %v1122_v60 = vadd.f32 %v1121_v36, %v5382_v30  ;;  %v1918_v30 = vrot.slane %v3980_v33, 1 }
 0x238   : > { %3359 = vmatmul.msk.f32.gmra.mxu2 %vm988_vm6, %v1845_v10  ;;  %v1857_v10 = vsel %vm937_vm5, %v1856_v26, %v1855_v59  ;;  %v5575_v59 = vrot.slane %v5467_v0, 4 }
 0x239   : > { %v1859_v36 = vsel %vm940_vm7, %v1858_v16, %v1857_v10  ;;  %v1919_v18 = vsel %vm922_vm0, %v6608_v53, %v1918_v30  ;;  %v2031_v10 = vsel %vm922_vm0, %v2030_v61, %v6655_v31  ;;  %v1862_v30 = vrot.slane %v5571_v34, 6 }
 0x23a   : > { %v1227_v9 = vpop.f32.mrf.mxu2  ;;  %v1921_v26 = vsel %vm925_vm1, %v1920_v58, %v1919_v18  ;;  %v2032_v6 = vsel %vm925_vm1, %v6662_v49, %v2031_v10  ;;  %v3381_v58 = vld [vmem:[%s6353_s3 + $0x168] sm:$0xff]  ;;  %v5597_v18 = vrot.slane %v5440_v11, 4  ;;  %v1864_v61 = vrot.slane %v5575_v59, 5 }
 0x23b   : > { %v5560_v14 = vadd.f32 %v1227_v9, %v1122_v60  ;;  %v2033_v60 = vrot.slane %v4590_v56, 7  ;;  %v1923_v16 = vsel %vm928_vm2, %v1922_v47, %v1921_v26  ;;  %2224 = vmatpush.msra.mxu3 %v3381_v58 }
 0x23c   : > { %v1861_v22 = vsel %vm922_vm0, %v1860_v7, %v5597_v18  ;;  %v1936_v7 = vrot.slane %v4658_v55, 6 }
 0x23e   : > { %3351 = vmatmul.msk.f32.gmra.mxu3 %vm988_vm6, %v1747_v8  ;;  %v1124_v9 = vpop.f32.mrf.mxu3  ;;  %v1748_v8 = vrot.slane %v6603_v25, 3 }
 0x23f   : > { %v1125_v53 = vadd.f32 %v1124_v9, %v5414_v44  ;;  %v2034_v44 = vsel %vm928_vm2, %v2033_v60, %v2032_v6  ;;  %v1863_v6 = vsel %vm925_vm1, %v1862_v30, %v1861_v22 }
 0x240   : > { %3360 = vmatmul.msk.f32.gmra.mxu2 %vm988_vm6, %v1859_v36  ;;  %v1924_v36 = vrot.slane %v6655_v31, 5  ;;  %v1750_v26 = vsel %vm922_vm0, %v1749_v63, %v1748_v8  ;;  %v1926_v63 = vrot.slane %v6654_v48, 4  ;;  %v1932_v8 = vrot.slane %v6560_v42, 1 }
 0x241   : > { %v1752_v25 = vsel %vm925_vm1, %v1751_v37, %v1750_v26  ;;  %v2036_v60 = vsel %vm931_vm3, %v2035_v62, %v2034_v44  ;;  %v2037_v37 = vrot.slane %v6654_v48, 5  ;;  %v6681_v62 = vld [vmem:[#allocation11_spill] sm:$0xff]  ;;  %v2043_v26 = vrot.slane %v6560_v42, 2 }
 0x242   : > { %v1230_v47 = vpop.f32.mrf.mxu2  ;;  %v1925_v10 = vsel %vm931_vm3, %v1924_v36, %v1923_v16  ;;  %v1753_v54 = vsel %vm928_vm2, %v4849_v32, %v1752_v25  ;;  %v1934_v16 = vrot.slane %v4391_v3, 7  ;;  %v2044_v36 = vrot.slane %v4155_v45, 1 }
 0x243   : > { %v5602_v9 = vadd.f32 %v1230_v47, %v1125_v53  ;;  %v1865_v53 = vsel %vm928_vm2, %v1864_v61, %v1863_v6  ;;  %v1927_v25 = vsel %vm934_vm4, %v1926_v63, %v1925_v10  ;;  %v1933_v22 = vsel %vm922_vm0, %v4155_v45, %v1932_v8 }
 0x244   : > { %v1938_v30 = vrot.slane %v6681_v62, 5  ;;  %v2038_v47 = vsel %vm934_vm4, %v2037_v37, %v2036_v60  ;;  %v2047_v61 = vrot.slane %v4658_v55, 7  ;;  %v1944_v44 = vrot.slane %v4032_v20, 1 }
 0x245   : > { %v2039_v6 = vrot.slane %v6618_v15, 4  ;;  %v1930_v32 = vrot.slane %v4620_v29, 2  ;;  %v2045_v60 = vsel %vm922_vm0, %v2044_v36, %v2043_v26  ;;  %v2057_v37 = vrot.slane %v6588_v57, 1 }
 0x246   : > { %3352 = vmatmul.msk.f32.gmra.mxu3 %vm988_vm6, %v1753_v54  ;;  %v1928_v54 = vrot.slane %v6618_v15, 3 }
 0x247   : > { %v2040_v50 = vsel %vm937_vm5, %v2039_v6, %v2038_v47  ;;  %v2049_v47 = vrot.slane %v6681_v62, 6 }
 0x248   : > { %3361 = vmatmul.msk.f32.gmra.mxu2 %vm988_vm6, %v1865_v53  ;;  %v1929_v63 = vsel %vm937_vm5, %v1928_v54, %v1927_v25  ;;  %v1935_v53 = vsel %vm925_vm1, %v1934_v16, %v1933_v22  ;;  %v1946_v25 = vrot.slane %v4617_v41, 7  ;;  %v3380_v16 = vld [vmem:[%s6353_s3 + $0x160] sm:$0xff]  ;;  %v1948_v22 = vrot.slane %v4768_v39, 6 }
 0x249   : > { %v1127_v58 = vpop.f32.mrf.mxu3  ;;  %v1937_v2 = vsel %vm928_vm2, %v1936_v7, %v1935_v53  ;;  %v1931_v54 = vsel %vm940_vm7, %v1930_v32, %v1929_v63  ;;  %v2041_v7 = vrot.slane %v4620_v29, 3  ;;  %2225 = vmatpush.msra.mxu3 %v3380_v16  ;;  %v2056_v32 = vrot.slane %v4032_v20, 2 }
 0x24a   : > { %v1128_v10 = vadd.f32 %v1127_v58, %v5469_v19  ;;  %v2046_v19 = vsel %vm925_vm1, %v4391_v3, %v2045_v60  ;;  %v1939_v58 = vsel %vm931_vm3, %v1938_v30, %v1937_v2  ;;  %v2060_v63 = vrot.slane %v4768_v39, 7 }
 0x24b   : > { %v1233_v8 = vpop.f32.mrf.mxu2  ;;  %v2048_v36 = vsel %vm928_vm2, %v2047_v61, %v2046_v19  ;;  %v2042_v26 = vsel %vm940_vm7, %v2041_v7, %v2040_v50  ;;  %v1958_v61 = vrot.slane %v5440_v11, 1  ;;  %v1940_v30 = vsel %vm934_vm4, %v6649_v12, %v1939_v58  ;;  %v6682_v19 = vld [vmem:[#allocation46_spill] sm:$0xff] }
 0x24c   : > { %v5639_v55 = vadd.f32 %v1233_v8, %v1128_v10  ;;  %v1945_v10 = vsel %vm922_vm0, %v6588_v57, %v1944_v44  ;;  %v2050_v6 = vsel %vm931_vm3, %v2049_v47, %v2048_v36  ;;  %v2051_v50 = vrot.slane %v6676_v40, 5 }
 0x24d   : > { %v1947_v53 = vsel %vm925_vm1, %v1946_v25, %v1945_v10  ;;  %v2058_v8 = vsel %vm922_vm0, %v2057_v37, %v2056_v32  ;;  %v1941_v16 = vrot.slane %v6682_v19, 3  ;;  %v3392_v25 = vld [vmem:[%s6353_s3 + $0x198] sm:$0xff]  ;;  %v1960_v36 = vrot.slane %v5458_v51, 7 }
 0x24e   : > { %3366 = vmatmul.msk.f32.vlgmr.msrb.gmra.mxu3 %vm988_vm6, %v1931_v54  ;;  %v1949_v44 = vsel %vm928_vm2, %v1948_v22, %v1947_v53  ;;  %v1950_v54 = vrot.slane %v6652_v4, 5  ;;  %v2059_v7 = vsel %vm925_vm1, %v4617_v41, %v2058_v8  ;;  %v2052_v22 = vsel %vm934_vm4, %v2051_v50, %v2050_v6  ;;  %2334 = vmatpush.msra.mxu2 %v3392_v25  ;;  %v3391_v53 = vld [vmem:[%s6353_s3 + $0x190] sm:$0xff]  ;;  %v3390_v6 = vld [vmem:[%s6353_s3 + $0x188] sm:$0xff] }
 0x24f   : > { %v2054_v37 = vrot.slane %v4748_v28, 3  ;;  %v2062_v32 = vrot.slane %v6652_v4, 6  ;;  %v2070_v28 = vrot.slane %v5443_v5, 1  ;;  %v1959_v50 = vsel %vm922_vm0, %v5443_v5, %v1958_v61 }
 0x250   : > { %3375 = vmatmul.msk.f32.vlgmr.msrb.gmra.mxu2 %vm988_vm6, %v2042_v26  ;;  %v1942_v26 = vsel %vm937_vm5, %v1941_v16, %v1940_v30  ;;  %v1951_v10 = vsel %vm931_vm3, %v1950_v54, %v1949_v44  ;;  %v1962_v30 = vrot.slane %v5467_v0, 6  ;;  %v2053_v44 = vsel %vm937_vm5, %v6679_v13, %v2052_v22  ;;  %v3389_v16 = vld [vmem:[%s6353_s3 + $0x180] sm:$0xff] }
 0x251   : > { %v1130_v2 = vpop.f32.mrf.mxu3  ;;  %2335 = vmatpush.msra.mxu2 %v3391_v53  ;;  %v2055_v54 = vsel %vm940_vm7, %v2054_v37, %v2053_v44  ;;  %v2064_v5 = vrot.slane %v6649_v12, 5  ;;  %v2073_v61 = vrot.slane %v5467_v0, 7  ;;  %v1954_v25 = vrot.slane %v6679_v13, 3 }
 0x252   : > { %v1131_v60 = vadd.f32 %v1130_v2, %v5449_v52  ;;  %v2061_v52 = vsel %vm928_vm2, %v2060_v63, %v2059_v7  ;;  %v1943_v63 = vsel %vm940_vm7, %v4768_v39, %v1942_v26  ;;  %v1952_v2 = vrot.slane %v6649_v12, 4 }
 0x253   : > { %v1236_v58 = vpop.f32.mrf.mxu2  ;;  %v2063_v8 = vsel %vm931_vm3, %v2062_v32, %v2061_v52  ;;  %2336 = vmatpush.msra.mxu2 %v3390_v6  ;;  %v1964_v37 = vrot.slane %v5507_v21, 5  ;;  %v2066_v6 = vrot.slane %v6679_v13, 4 }
 0x254   : > { %v5681_v47 = vadd.f32 %v1236_v58, %v1131_v60  ;;  %v3401_v60 = vld [vmem:[%s6353_s3 + $0x1b8] sm:$0xff]  ;;  %v1953_v7 = vsel %vm934_vm4, %v1952_v2, %v1951_v10  ;;  %v1961_v58 = vsel %vm925_vm1, %v1960_v36, %v1959_v50  ;;  %v2065_v52 = vsel %vm934_vm4, %v2064_v5, %v2063_v8 }
 0x255   : > { %2446 = vmatpush.msrb.mxu3 %v3401_v60  ;;  %v1963_v26 = vsel %vm928_vm2, %v1962_v30, %v1961_v58  ;;  %v2071_v10 = vsel %vm922_vm0, %v2070_v28, %v5507_v21  ;;  %2337 = vmatpush.msra.mxu2 %v3389_v16  ;;  %v1955_v53 = vsel %vm937_vm5, %v1954_v25, %v1953_v7  ;;  %v1956_v2 = vrot.slane %v6680_v38, 2  ;;  %v6683_v25 = vld [vmem:[#allocation35_spill] sm:$0xff] }
 0x256   : > { %3367 = vmatmul.msk.f32.gmra.mxu3 %vm988_vm6, %v1943_v63  ;;  %v2072_v36 = vsel %vm925_vm1, %v5458_v51, %v2071_v10  ;;  %v2067_v44 = vsel %vm937_vm5, %v2066_v6, %v2065_v52  ;;  %v1965_v28 = vsel %vm931_vm3, %v1964_v37, %v1963_v26  ;;  %v2068_v60 = vrot.slane %v6680_v38, 3  ;;  %v3400_v52 = vld [vmem:[%s6353_s3 + $0x1b0] sm:$0xff]  ;;  %v6684_v26 = vld [vmem:[#allocation16_spill] sm:$0xff]  ;;  %v6685_v10 = vld [vmem:[#allocation59_spill] sm:$0xff] }
 0x257   : > { %v2074_v30 = vsel %vm928_vm2, %v2073_v61, %v2072_v36  ;;  %v1957_v8 = vsel %vm940_vm7, %v1956_v2, %v1955_v53  ;;  %v1966_v16 = vrot.slane %v5523_v46, 4  ;;  %v2077_v61 = vrot.slane %v5523_v46, 5  ;;  %2447 = vmatpush.msrb.mxu3 %v3400_v52  ;;  %v6686_v52 = vld [vmem:[#allocation56_spill] sm:$0xff] }
 0x258   : > { %3376 = vmatmul.msk.f32.gmra.mxu2 %vm988_vm6, %v2055_v54  ;;  %v2069_v7 = vsel %vm940_vm7, %v2068_v60, %v2067_v44  ;;  %v2292_v58 = vrot.slane %v6683_v25, 7  ;;  %v2404_v37 = vrot.slane %v6684_v26, 1  ;;  %v1970_v6 = vrot.slane %v5550_v23, 2 }
 0x259   : > { %v1335_v22 = vpop.f32.mrf.mxu3  ;;  %v1967_v5 = vsel %vm934_vm4, %v1966_v16, %v1965_v28  ;;  %v2079_v44 = vrot.slane %v5537_v1, 4  ;;  %v2143_v16 = vrot.slane %v6662_v49, 1 }
 0x25a   : > { %v1350_v32 = vadd.f32 %v1335_v22, %v5527_v35  ;;  %v2075_v35 = vrot.slane %v5507_v21, 6  ;;  %v1968_v22 = vrot.slane %v5537_v1, 3 }
 0x25b   : > { %v1447_v63 = vpop.f32.mrf.mxu2 }
 0x25c   : > { %v5728_v50 = vadd.f32 %v1447_v63, %v1350_v32  ;;  %v2076_v54 = vsel %vm931_vm3, %v2075_v35, %v2074_v30  ;;  %v2294_v32 = vrot.slane %v6685_v10, 6  ;;  %v2406_v63 = vrot.slane %v6685_v10, 7 }
 0x25d   : > { %v2078_v36 = vsel %vm934_vm4, %v2077_v61, %v2076_v54  ;;  %v1969_v30 = vsel %vm937_vm5, %v1968_v22, %v1967_v5  ;;  %v2081_v35 = vrot.slane %v5550_v23, 3  ;;  %v2293_v54 = vsel %vm922_vm0, %v2292_v58, %v6684_v26 }
 0x25e   : > { %3368 = vmatmul.msk.f32.gmra.mxu3 %vm988_vm6, %v1957_v8  ;;  %v2405_v8 = vsel %vm922_vm0, %v6683_v25, %v2404_v37  ;;  %v2080_v60 = vsel %vm937_vm5, %v2079_v44, %v2078_v36  ;;  %v2252_v5 = vrot.slane %v6661_v24, 7  ;;  %v5770_v61 = vsel %vm925_vm1, %v2294_v32, %v2293_v54 }
 0x25f   : > { %v2254_v25 = vrot.slane %v6673_v27, 6  ;;  %v5775_v22 = vsel %vm925_vm1, %v2406_v63, %v2405_v8  ;;  %v2082_v49 = vsel %vm940_vm7, %v2081_v35, %v2080_v60  ;;  %v2256_v26 = vrot.slane %v6686_v52, 5  ;;  %v3399_v8 = vld [vmem:[%s6353_s3 + $0x1a8] sm:$0xff] }
 0x260   : > { %3377 = vmatmul.msk.f32.gmra.mxu2 %vm988_vm6, %v2069_v7  ;;  %v2141_v7 = vrot.slane %v3980_v33, 3  ;;  %v1972_v33 = vrot.slane %v5597_v18, 1  ;;  %v1974_v37 = vrot.slane %v5571_v34, 7  ;;  %v2253_v63 = vsel %vm922_vm0, %v2252_v5, %v6672_v17  ;;  %2448 = vmatpush.msrb.mxu3 %v3399_v8 }
 0x261   : > { %v1338_v53 = vpop.f32.mrf.mxu3  ;;  %v2146_v44 = vrot.slane %v6655_v31, 7  ;;  %v2255_v35 = vsel %vm925_vm1, %v2254_v25, %v2253_v63  ;;  %v2087_v54 = vrot.slane %v5575_v59, 7 }
 0x262   : > { %v5753_v2 = vadd.f32 %v1338_v53, %v5560_v14  ;;  %v1971_v14 = vsel %vm940_vm7, %v1970_v6, %v1969_v30  ;;  %v2142_v58 = vsel %vm922_vm0, %v6654_v48, %v2141_v7  ;;  %v1976_v53 = vrot.slane %v5575_v59, 6  ;;  %v6687_v7 = vld [vmem:[#allocation12_spill] sm:$0xff] }
 0x263   : > { %v5757_v28 = vpop.f32.mrf.mxu2  ;;  %v2144_v10 = vsel %vm925_vm1, %v2143_v16, %v2142_v58  ;;  %v2084_v6 = vrot.slane %v5558_v43, 1  ;;  %v1973_v16 = vsel %vm922_vm0, %v5558_v43, %v1972_v33  ;;  %v2258_v5 = vrot.slane %v6687_v7, 4 }
 0x264   : > { %v2145_v36 = vsel %vm928_vm2, %v4590_v56, %v2144_v10  ;;  %v2083_v56 = vrot.slane %v5597_v18, 2  ;;  %v1975_v31 = vsel %vm925_vm1, %v1974_v37, %v1973_v16  ;;  %v2148_v58 = vrot.slane %v6654_v48, 6  ;;  %v6689_v48 = vld [vmem:[#allocation27_spill] sm:$0xff] }
 0x265   : > { %v1977_v25 = vsel %vm928_vm2, %v1976_v53, %v1975_v31  ;;  %v2155_v33 = vrot.slane %v4155_v45, 2  ;;  %v2154_v37 = vrot.slane %v6560_v42, 3  ;;  %v2150_v45 = vrot.slane %v6618_v15, 5 }
 0x266   : > { %3369 = vmatmul.msk.f32.gmra.mxu3 %vm988_vm6, %v1971_v14  ;;  %v2147_v14 = vsel %vm931_vm3, %v2146_v44, %v2145_v36  ;;  %v2266_v44 = vrot.slane %v6689_v48, 7 }
 0x267   : > { %v2149_v53 = vsel %vm934_vm4, %v2148_v58, %v2147_v14  ;;  %v6693_v58 = vld [vmem:[#allocation54_spill] sm:$0xff] }
 0x268   : > { %3378 = vmatmul.msk.f32.gmra.mxu2 %vm988_vm6, %v2082_v49  ;;  %v2085_v49 = vsel %vm922_vm0, %v2084_v6, %v2083_v56  ;;  %v6688_v6 = vld [vmem:[#allocation26_spill] sm:$0xff]  ;;  %v2152_v56 = vrot.slane %v4620_v29, 4  ;;  %v2151_v14 = vsel %vm937_vm5, %v2150_v45, %v2149_v53  ;;  %v2167_v53 = vrot.slane %v4032_v20, 3  ;;  %v6697_v20 = vld [vmem:[#allocation53_spill] sm:$0xff] }
 0x269   : > { %v1341_v32 = vpop.f32.mrf.mxu3  ;;  %v2260_v63 = vrot.slane %v6688_v6, 3 }
 0x26a   : > { %v5792_v30 = vadd.f32 %v1341_v32, %v5602_v9  ;;  %v2257_v9 = vsel %vm928_vm2, %v2256_v26, %v2255_v35  ;;  %v2086_v26 = vsel %vm925_vm1, %v5571_v34, %v2085_v49  ;;  %v2157_v32 = vrot.slane %v4391_v3, 1  ;;  %v6690_v35 = vld [vmem:[#allocation45_spill] sm:$0xff] }
 0x26b   : > { %v5799_v60 = vpop.f32.mrf.mxu2  ;;  %v2259_v10 = vsel %vm931_vm3, %v2258_v5, %v2257_v9  ;;  %v2088_v36 = vsel %vm928_vm2, %v2087_v54, %v2086_v26  ;;  %v2268_v8 = vrot.slane %v6690_v35, 6  ;;  %v2156_v3 = vsel %vm922_vm0, %v2155_v33, %v2154_v37  ;;  %v6691_v54 = vld [vmem:[#allocation58_spill] sm:$0xff]  ;;  %v6692_v5 = vld [vmem:[#allocation44_spill] sm:$0xff] }
 0x26c   : > { %v2261_v42 = vsel %vm934_vm4, %v2260_v63, %v2259_v10  ;;  %v2270_v9 = vrot.slane %v6691_v54, 5  ;;  %v2158_v15 = vsel %vm925_vm1, %v2157_v32, %v2156_v3  ;;  %v2160_v26 = vrot.slane %v6681_v62, 7  ;;  %v6694_v10 = vld [vmem:[#allocation13_spill] sm:$0xff]  ;;  %v3398_v63 = vld [vmem:[%s6353_s3 + $0x1a0] sm:$0xff]  ;;  %v6696_v3 = vld [vmem:[#allocation34_spill] sm:$0xff] }
 0x26d   : > { %v2159_v29 = vsel %vm928_vm2, %v6693_v58, %v2158_v15  ;;  %v2267_v33 = vsel %vm922_vm0, %v2266_v44, %v6694_v10  ;;  %v2168_v37 = vrot.slane %v6588_v57, 2  ;;  %v2170_v32 = vrot.slane %v4617_v41, 1  ;;  %v6695_v62 = vld [vmem:[#allocation57_spill] sm:$0xff]  ;;  %2449 = vmatpush.msrb.mxu3 %v3398_v63 }
 0x26e   : > { %3370 = vmatmul.msk.f32.gmra.mxu3 %vm988_vm6, %v1977_v25  ;;  %v2262_v25 = vrot.slane %v6692_v5, 2  ;;  %v2153_v45 = vsel %vm940_vm7, %v2152_v56, %v2151_v14  ;;  %v2278_v57 = vrot.slane %v6696_v3, 7  ;;  %v6698_v56 = vld [vmem:[#allocation62_spill] sm:$0xff] }
 0x26f   : > { %v2169_v15 = vsel %vm922_vm0, %v2168_v37, %v2167_v53  ;;  %v2282_v14 = vrot.slane %v6698_v56, 5 }
 0x270   : > { %3379 = vmatmul.msk.f32.gmra.mxu2 %vm988_vm6, %v2088_v36  ;;  %v2269_v36 = vsel %vm925_vm1, %v2268_v8, %v2267_v33  ;;  %v2161_v8 = vsel %vm931_vm3, %v2160_v26, %v2159_v29  ;;  %v2171_v33 = vsel %vm925_vm1, %v2170_v32, %v2169_v15  ;;  %v6700_v26 = vld [vmem:[#allocation29_spill] sm:$0xff]  ;;  %v2183_v15 = vrot.slane %v5458_v51, 1 }
 0x271   : > { %v1344_v16 = vpop.f32.mrf.mxu3  ;;  %v2271_v44 = vsel %vm928_vm2, %v2270_v9, %v2269_v36  ;;  %v6699_v9 = vld [vmem:[#allocation18_spill] sm:$0xff]  ;;  %v2273_v63 = vrot.slane %v6700_v26, 3 }
 0x272   : > { %v5831_v31 = vadd.f32 %v1344_v16, %v5639_v55  ;;  %v2263_v55 = vsel %vm937_vm5, %v2262_v25, %v2261_v42  ;;  %v2264_v16 = vrot.slane %v6695_v62, 1  ;;  %v2280_v42 = vrot.slane %v6697_v20, 6 }
 0x273   : > { %v5836_v49 = vpop.f32.mrf.mxu2  ;;  %v2162_v25 = vrot.slane %v6676_v40, 6  ;;  %v2272_v58 = vsel %vm931_vm3, %v6699_v9, %v2271_v44  ;;  %v6701_v40 = vld [vmem:[#allocation17_spill] sm:$0xff] }
 0x274   : > { %v2265_v41 = vsel %vm940_vm7, %v2264_v16, %v2263_v55  ;;  %v2172_v55 = vsel %vm928_vm2, %v4768_v39, %v2171_v33  ;;  %v2279_v37 = vsel %vm922_vm0, %v2278_v57, %v6701_v40  ;;  %v2173_v16 = vrot.slane %v6652_v4, 7 }
 0x275   : > { %v2163_v29 = vsel %vm934_vm4, %v2162_v25, %v2161_v8  ;;  %v2281_v32 = vsel %vm925_vm1, %v2280_v42, %v2279_v37  ;;  %v2274_v8 = vsel %vm934_vm4, %v2273_v63, %v2272_v58  ;;  %v2181_v4 = vrot.slane %v5440_v11, 3  ;;  %v6703_v58 = vld [vmem:[#allocation36_spill] sm:$0xff]  ;;  %v6704_v63 = vld [vmem:[#allocation21_spill] sm:$0xff] }
 0x276   : > { %3384 = vmatmul.msk.f32.vlgmr.msra.gmra.mxu3 %vm988_vm6, %v2153_v45  ;;  %v2164_v45 = vrot.slane %v6682_v19, 5  ;;  %v2283_v39 = vsel %vm928_vm2, %v2282_v14, %v2281_v32  ;;  %v2284_v19 = vrot.slane %v6699_v9, 4  ;;  %v2175_v33 = vrot.slane %v6649_v12, 6 }
 0x277   : > { %v2275_v14 = vsel %vm937_vm5, %v6697_v20, %v2274_v8  ;;  %v2182_v11 = vsel %vm922_vm0, %v5523_v46, %v2181_v4  ;;  %v2177_v12 = vrot.slane %v6679_v13, 5 }
 0x278   : > { %3393 = vmatmul.msk.f32.vlgmr.msra.gmra.mxu2 %vm988_vm6, %v2265_v41  ;;  %v6702_v41 = vld [vmem:[#allocation30_spill] sm:$0xff]  ;;  %v2165_v57 = vsel %vm937_vm5, %v2164_v45, %v2163_v29  ;;  %v2285_v51 = vsel %vm931_vm3, %v2284_v19, %v2283_v39  ;;  %v2184_v37 = vsel %vm925_vm1, %v2183_v15, %v2182_v11  ;;  %v2179_v19 = vrot.slane %v6680_v38, 4 }
 0x279   : > { %v1347_v36 = vpop.f32.mrf.mxu3  ;;  %v2276_v25 = vrot.slane %v6702_v41, 1  ;;  %v2166_v42 = vsel %vm940_vm7, %v6680_v38, %v2165_v57  ;;  %v2185_v32 = vsel %vm928_vm2, %v5467_v0, %v2184_v37  ;;  %v2186_v57 = vrot.slane %v5507_v21, 7 }
 0x27a   : > { %v5873_v53 = vadd.f32 %v1347_v36, %v5681_v47  ;;  %v2174_v47 = vsel %vm931_vm3, %v2173_v16, %v2172_v55  ;;  %v2286_v36 = vrot.slane %v6703_v58, 3  ;;  %v2296_v55 = vrot.slane %v6704_v63, 5 }
 0x27b   : > { %v5878_v44 = vpop.f32.mrf.mxu2  ;;  %v2277_v29 = vsel %vm940_vm7, %v2276_v25, %v2275_v14  ;;  %v2176_v26 = vsel %vm934_vm4, %v2175_v33, %v2174_v47  ;;  %v6705_v25 = vld [vmem:[#allocation55_spill] sm:$0xff]  ;;  %v2187_v0 = vsel %vm931_vm3, %v2186_v57, %v2185_v32  ;;  %v2188_v21 = vrot.slane %v5523_v46, 6  ;;  %v6709_v32 = vld [vmem:[#allocation61_spill] sm:$0xff] }
 0x27c   : > { %v2287_v16 = vsel %vm934_vm4, %v2286_v36, %v2285_v51  ;;  %v2178_v41 = vsel %vm937_vm5, %v2177_v12, %v2176_v26  ;;  %v2288_v39 = vrot.slane %v6705_v25, 2  ;;  %v2297_v13 = vsel %vm928_vm2, %v2296_v55, %v5770_v61  ;;  %v6707_v14 = vld [vmem:[#allocation63_spill] sm:$0xff] }
 0x27d   : > { %v2180_v33 = vsel %vm940_vm7, %v2179_v19, %v2178_v41  ;;  %v2290_v51 = vrot.slane %v6707_v14, 1  ;;  %v2189_v36 = vsel %vm934_vm4, %v2188_v21, %v2187_v0  ;;  %v1463_v11 = vadd.f32 %v5757_v28, %v5753_v2 }
 0x27e   : > { %3385 = vmatmul.msk.f32.gmra.mxu3 %vm988_vm6, %v2166_v42  ;;  %v2289_v4 = vsel %vm937_vm5, %v2288_v39, %v2287_v16  ;;  %v6706_v42 = vld [vmem:[#allocation20_spill] sm:$0xff]  ;;  %v2190_v55 = vrot.slane %v5537_v1, 5  ;;  %v2192_v46 = vrot.slane %v5550_v23, 4  ;;  %v2366_v28 = vrot.slane %v6673_v27, 7 }
 0x27f   : > { %v2291_v61 = vsel %vm940_vm7, %v2290_v51, %v2289_v4  ;;  %v6710_v39 = vld [vmem:[#allocation40_spill] sm:$0xff]  ;;  %v2364_v23 = vrot.slane %v6672_v17, 1  ;;  %v2368_v19 = vrot.slane %v6686_v52, 6  ;;  %v2195_v4 = vrot.slane %v5558_v43, 2  ;;  %v6711_v51 = vld [vmem:[#allocation38_spill] sm:$0xff] }
 0x280   : > { %3394 = vmatmul.msk.f32.gmra.mxu2 %vm988_vm6, %v2277_v29  ;;  %v6708_v29 = vld [vmem:[#allocation37_spill] sm:$0xff]  ;;  %v2191_v16 = vsel %vm937_vm5, %v2190_v55, %v2189_v36  ;;  %v2304_v57 = vrot.slane %v6710_v39, 1  ;;  %v2197_v27 = vrot.slane %v5571_v34, 1  ;;  %v2194_v52 = vrot.slane %v5597_v18, 3 }
 0x281   : > { %v1559_v45 = vpop.f32.mrf.mxu3  ;;  %v2300_v26 = vrot.slane %v6708_v29, 3  ;;  %v2193_v1 = vsel %vm940_vm7, %v2192_v46, %v2191_v16  ;;  %v2365_v0 = vsel %vm922_vm0, %v6661_v24, %v2364_v23  ;;  %v2306_v21 = vrot.slane %v6711_v51, 7  ;;  %v6714_v46 = vld [vmem:[#allocation22_spill] sm:$0xff] }
 0x282   : > { %v1574_v8 = vadd.f32 %v1559_v45, %v5728_v50  ;;  %v2298_v50 = vrot.slane %v6706_v42, 4  ;;  %v2367_v17 = vsel %vm925_vm1, %v2366_v28, %v2365_v0  ;;  %v2370_v24 = vrot.slane %v6687_v7, 5 }
 0x283   : > { %v1670_v47 = vpop.f32.mrf.mxu2  ;;  %v2380_v16 = vrot.slane %v6690_v35, 7  ;;  %v2392_v0 = vrot.slane %v6697_v20, 7 }
 0x284   : > { %v5914_v15 = vadd.f32 %v1670_v47, %v1574_v8  ;;  %v2299_v38 = vsel %vm931_vm3, %v2298_v50, %v2297_v13  ;;  %v2302_v8 = vrot.slane %v6709_v32, 2  ;;  %v1464_v50 = vadd.f32 %v5799_v60, %v5792_v30  ;;  %v6713_v60 = vld [vmem:[#allocation41_spill] sm:$0xff] }
 0x285   : > { %v2301_v37 = vsel %vm934_vm4, %v2300_v26, %v2299_v38  ;;  %v2369_v38 = vsel %vm928_vm2, %v2368_v19, %v2367_v17  ;;  %v2196_v30 = vsel %vm922_vm0, %v2195_v4, %v2194_v52  ;;  %v1466_v17 = vadd.f32 %v5878_v44, %v5873_v53 }
 0x286   : > { %3386 = vmatmul.msk.f32.gmra.mxu3 %vm988_vm6, %v2180_v33  ;;  %v2303_v2 = vsel %vm937_vm5, %v2302_v8, %v2301_v37  ;;  %v2198_v55 = vsel %vm925_vm1, %v2197_v27, %v2196_v30  ;;  %v2371_v18 = vsel %vm931_vm3, %v2370_v24, %v2369_v38  ;;  %v2307_v37 = vsel %vm922_vm0, %v2306_v21, %v6714_v46  ;;  %v6716_v38 = vld [vmem:[#allocation51_spill] sm:$0xff] }
 0x287   : > { %v2305_v13 = vsel %vm940_vm7, %v2304_v57, %v2303_v2  ;;  %v2378_v57 = vrot.slane %v6694_v10, 1  ;;  %v2382_v2 = vrot.slane %v6691_v54, 6  ;;  %v2376_v10 = vrot.slane %v6695_v62, 2 }
 0x288   : > { %3395 = vmatmul.msk.f32.gmra.mxu2 %vm988_vm6, %v2291_v61  ;;  %v6712_v61 = vld [vmem:[#allocation43_spill] sm:$0xff]  ;;  %v2398_v44 = vrot.slane %v6703_v58, 4 }
 0x289   : > { %v1562_v12 = vpop.f32.mrf.mxu3  ;;  %v2308_v36 = vrot.slane %v6712_v61, 6 }
 0x28a   : > { %v1575_v45 = vadd.f32 %v1562_v12, %v1463_v11  ;;  %v2310_v11 = vrot.slane %v6713_v60, 5  ;;  %v2199_v12 = vsel %vm928_vm2, %v5575_v59, %v2198_v55  ;;  %v1465_v59 = vadd.f32 %v5836_v49, %v5831_v31  ;;  %v6715_v31 = vld [vmem:[#allocation14_spill] sm:$0xff] }
 0x28b   : > { %v1673_v41 = vpop.f32.mrf.mxu2  ;;  %v2309_v7 = vsel %vm925_vm1, %v2308_v36, %v2307_v37  ;;  %v2384_v49 = vrot.slane %v6715_v31, 5  ;;  %v2396_v36 = vrot.slane %v6699_v9, 5 }
 0x28c   : > { %v5936_v47 = vadd.f32 %v1673_v41, %v1575_v45  ;;  %v2372_v45 = vrot.slane %v6688_v6, 4  ;;  %v2311_v8 = vsel %vm928_vm2, %v2310_v11, %v2309_v7  ;;  %v2374_v6 = vrot.slane %v6692_v5, 3 }
 0x28d   : > { %v2408_v11 = vrot.slane %v6704_v63, 6 }
 0x28e   : > { %3387 = vmatmul.msk.f32.gmra.mxu3 %vm988_vm6, %v2193_v1  ;;  %v2373_v41 = vsel %vm934_vm4, %v2372_v45, %v2371_v18  ;;  %v2379_v1 = vsel %vm922_vm0, %v6689_v48, %v2378_v57  ;;  %v2394_v48 = vrot.slane %v6698_v56, 6  ;;  %v2400_v18 = vrot.slane %v6705_v25, 3 }
 0x28f   : > { %v2375_v23 = vsel %vm937_vm5, %v2374_v6, %v2373_v41  ;;  %v2381_v19 = vsel %vm925_vm1, %v2380_v16, %v2379_v1  ;;  %v2412_v25 = vrot.slane %v6708_v29, 4  ;;  %v2416_v57 = vrot.slane %v6710_v39, 2 }
 0x290   : > { %3396 = vmatmul.msk.f32.gmra.mxu2 %vm988_vm6, %v2305_v13  ;;  %v2383_v54 = vsel %vm928_vm2, %v2382_v2, %v2381_v19  ;;  %v2377_v5 = vsel %vm940_vm7, %v2376_v10, %v2375_v23  ;;  %v2420_v29 = vrot.slane %v6712_v61, 7  ;;  %v2418_v1 = vrot.slane %v6714_v46, 1 }
 0x291   : > { %v1565_v33 = vpop.f32.mrf.mxu3  ;;  %v2385_v27 = vsel %vm931_vm3, %v2384_v49, %v2383_v54 }
 0x292   : > { %v1576_v43 = vadd.f32 %v1565_v33, %v1464_v50  ;;  %v2390_v50 = vrot.slane %v6701_v40, 1  ;;  %v2386_v20 = vsel %vm934_vm4, %v6703_v58, %v2385_v27  ;;  %v2402_v58 = vrot.slane %v6707_v14, 2 }
 0x293   : > { %v1676_v26 = vpop.f32.mrf.mxu2 }
 0x294   : > { %v5960_v34 = vadd.f32 %v1676_v26, %v1576_v43  ;;  %v2391_v62 = vsel %vm922_vm0, %v6696_v3, %v2390_v50  ;;  %v2387_v43 = vrot.slane %v6716_v38, 3  ;;  %v3431_v38 = vld [vmem:[%s6355_s5 + $0x70] sm:$0xff] }
 0x295   : > { %v2393_v33 = vsel %vm925_vm1, %v2392_v0, %v2391_v62 }
 0x296   : > { %3388 = vmatmul.msk.f32.gmra.mxu3 %vm988_vm6, %v2199_v12  ;;  %v2395_v40 = vsel %vm928_vm2, %v2394_v48, %v2393_v33  ;;  %v2388_v3 = vsel %vm937_vm5, %v2387_v43, %v2386_v20  ;;  %v2409_v12 = vsel %vm928_vm2, %v2408_v11, %v5775_v22  ;;  %v2713_v43 = vld [vmem:[%s6355_s5 + $0x30] sm:$0xff]  ;;  %v2710_v11 = vld [vmem:[%s6355_s5 + $0x18] sm:$0xff] }
 0x297   : > { %v2397_v30 = vsel %vm931_vm3, %v2396_v36, %v2395_v40  ;;  %v2389_v53 = vsel %vm940_vm7, %v6698_v56, %v2388_v3  ;;  %v2410_v56 = vrot.slane %v6706_v42, 5  ;;  %v3430_v36 = vld [vmem:[%s6355_s5 + $0x68] sm:$0xff]  ;;  %v2711_v3 = vld [vmem:[%s6355_s5 + $0x20] sm:$0xff] }
 0x298   : > { %3397 = vmatmul.msk.f32.gmra.mxu2 %vm988_vm6, %v2311_v8  ;;  %v2399_v55 = vsel %vm934_vm4, %v2398_v44, %v2397_v30  ;;  %v3428_v30 = vld [vmem:[%s6355_s5 + $0x58] sm:$0xff] }
 0x299   : > { %v1568_v28 = vpop.f32.mrf.mxu3  ;;  %v2401_v45 = vsel %vm937_vm5, %v2400_v18, %v2399_v55  ;;  %v2411_v16 = vsel %vm931_vm3, %v2410_v56, %v2409_v12  ;;  %v3427_v55 = vld [vmem:[%s6355_s5 + $0x50] sm:$0xff]  ;;  %v2708_v12 = vld [vmem:[%s6355_s5 + $0x8] sm:$0xff]  ;;  %v2707_v56 = vld [vmem:[%s6355_s5] sm:$0xff] }
 0x29a   : > { %v1577_v35 = vadd.f32 %v1568_v28, %v1465_v59  ;;  %v2403_v8 = vsel %vm940_vm7, %v2402_v58, %v2401_v45  ;;  %v2413_v22 = vsel %vm934_vm4, %v2412_v25, %v2411_v16  ;;  %v2709_v18 = vld [vmem:[%s6355_s5 + $0x10] sm:$0xff]  ;;  %v3442_v45 = vld [vmem:[%s6355_s5 + $0xb8] sm:$0xff] }
 0x29b   : > { %v1679_v13 = vpop.f32.mrf.mxu2  ;;  %v3441_v25 = vld [vmem:[%s6355_s5 + $0xb0] sm:$0xff] }
 0x29c   : > { %v1688_v4 = vadd.f32 %v1679_v13, %v1577_v35 }
 0x29e   : > { %3402 = vmatmul.msk.f32.vlgmr.msrb.gmra.mxu3 %vm988_vm6, %v2377_v5 }
 0x2a1   : > { %v1571_v52 = vpop.f32.mrf.mxu3 }
 0x2a2   : > { %v1578_v21 = vadd.f32 %v1571_v52, %v1466_v17  ;;  %v2714_v52 = vld [vmem:[%s6355_s5 + $0x38] sm:$0xff] }
 0x2a3   : > { %v1682_v24 = vpop.f32.mrf.mxu2  ;;  %2759 = vmatpush.msra.mxu3 %v2714_v52 }
 0x2a4   : > { %v1689_v26 = vadd.f32 %v1682_v24, %v1578_v21  ;;  %v2712_v24 = vld [vmem:[%s6355_s5 + $0x28] sm:$0xff] }
 0x2a5   : > { %2760 = vmatpush.msra.mxu3 %v2713_v43  ;;  %v3483_v43 = vld [vmem:[%s6355_s5 + $0x1d8] sm:$0xff] }
 0x2a6   : > { %3403 = vmatmul.msk.f32.gmra.mxu3 %vm988_vm6, %v2389_v53 }
 0x2a7   : > { %2761 = vmatpush.msra.mxu3 %v2712_v24 }
 0x2a9   : > { %v1781_v9 = vpop.f32.mrf.mxu3  ;;  %2762 = vmatpush.msra.mxu3 %v2711_v3 }
 0x2aa   : > { %v1796_v37 = vadd.f32 %v1781_v9, %v5914_v15  ;;  %v2414_v15 = vrot.slane %v6709_v32, 3  ;;  %v2422_v32 = vrot.slane %v6713_v60, 6  ;;  %v3426_v9 = vld [vmem:[%s6355_s5 + $0x48] sm:$0xff] }
 0x2ab   : > { %v1893_v7 = vpop.f32.mrf.mxu2  ;;  %2763 = vmatpush.msra.mxu3 %v2710_v11 }
 0x2ac   : > { %v1908_v63 = vadd.f32 %v1893_v7, %v1796_v37  ;;  %v2415_v14 = vsel %vm937_vm5, %v2414_v15, %v2413_v22  ;;  %v3425_v37 = vld [vmem:[%s6355_s5 + $0x40] sm:$0xff]  ;;  %v3451_v7 = vld [vmem:[%s6355_s5 + $0xf8] sm:$0xff]  ;;  %v3450_v22 = vld [vmem:[%s6355_s5 + $0xf0] sm:$0xff] }
 0x2ad   : > { %v2417_v6 = vsel %vm940_vm7, %v2416_v57, %v2415_v14  ;;  %2764 = vmatpush.msra.mxu3 %v2709_v18  ;;  %v3440_v15 = vld [vmem:[%s6355_s5 + $0xa8] sm:$0xff]  ;;  %v3439_v57 = vld [vmem:[%s6355_s5 + $0xa0] sm:$0xff]  ;;  %v3478_v14 = vld [vmem:[%s6355_s5 + $0x1b8] sm:$0xff] }
 0x2ae   : > { %3404 = vmatmul.msk.f32.gmra.mxu3 %vm988_vm6, %v2403_v8  ;;  %2923 = vmatpush.msra.mxu0 %v3478_v14  ;;  %v3458_v14 = vld [vmem:[%s6355_s5 + $0x128] sm:$0xff] }
 0x2af   : > { %2765 = vmatpush.msra.mxu3 %v2708_v12  ;;  %v3472_v12 = vld [vmem:[%s6355_s5 + $0x188] sm:$0xff] }
 0x2b1   : > { %v1784_v41 = vpop.f32.mrf.mxu3  ;;  %2766 = vmatpush.msra.mxu3 %v2707_v56 }
 0x2b2   : > { %v1797_v42 = vadd.f32 %v1784_v41, %v5936_v47  ;;  %v2419_v47 = vsel %vm922_vm0, %v6711_v51, %v2418_v1  ;;  %v3449_v41 = vld [vmem:[%s6355_s5 + $0xe8] sm:$0xff]  ;;  %v3446_v1 = vld [vmem:[%s6355_s5 + $0xd0] sm:$0xff] }
 0x2b3   : > { %v1896_v2 = vpop.f32.mrf.mxu2  ;;  %v2421_v19 = vsel %vm925_vm1, %v2420_v29, %v2419_v47  ;;  %2824 = vmatpush.msrb.mxu3 %v3451_v7  ;;  %v3445_v47 = vld [vmem:[%s6355_s5 + $0xc8] sm:$0xff] }
 0x2b4   : > { %v1909_v59 = vadd.f32 %v1896_v2, %v1797_v42  ;;  %v2423_v13 = vsel %vm928_vm2, %v2422_v32, %v2421_v19  ;;  %v3448_v42 = vld [vmem:[%s6355_s5 + $0xe0] sm:$0xff]  ;;  %v3487_v2 = vld [vmem:[%s6355_s5 + $0x1f8] sm:$0xff]  ;;  %v3436_v32 = vld [vmem:[%s6355_s5 + $0x88] sm:$0xff] }
 0x2b5   : > { %2825 = vmatpush.msrb.mxu3 %v3450_v22  ;;  %2956 = vmatpush.msra.mxu1 %v3487_v2  ;;  %v3486_v19 = vld [vmem:[%s6355_s5 + $0x1f0] sm:$0xff]  ;;  %v3480_v22 = vld [vmem:[%s6355_s5 + $0x1c0] sm:$0xff] }
 0x2b6   : > { %3405 = vmatmul.msk.f32.gmra.mxu3 %vm988_vm6, %v2417_v6  ;;  %v3447_v6 = vld [vmem:[%s6355_s5 + $0xd8] sm:$0xff]  ;;  %v3466_v2 = vld [vmem:[%s6355_s5 + $0x160] sm:$0xff] }
 0x2b7   : > { %2826 = vmatpush.msrb.mxu3 %v3449_v41  ;;  %2957 = vmatpush.msra.mxu1 %v3486_v19  ;;  %v3467_v41 = vld [vmem:[%s6355_s5 + $0x168] sm:$0xff] }
 0x2b9   : > { %v1787_v28 = vpop.f32.mrf.mxu3  ;;  %2827 = vmatpush.msrb.mxu3 %v3448_v42 }
 0x2ba   : > { %v1798_v35 = vadd.f32 %v1787_v28, %v5960_v34  ;;  %v3437_v28 = vld [vmem:[%s6355_s5 + $0x90] sm:$0xff] }
 0x2bb   : > { %v1899_v39 = vpop.f32.mrf.mxu2  ;;  %2828 = vmatpush.msrb.mxu3 %v3447_v6 }
 0x2bc   : > { %v1910_v23 = vadd.f32 %v1899_v39, %v1798_v35  ;;  %v3477_v39 = vld [vmem:[%s6355_s5 + $0x1b0] sm:$0xff] }
 0x2bd   : > { %2829 = vmatpush.msrb.mxu3 %v3446_v1  ;;  %2924 = vmatpush.msra.mxu0 %v3477_v39  ;;  %v3465_v39 = vld [vmem:[%s6355_s5 + $0x158] sm:$0xff] }
 0x2be   : > { %3406 = vmatmul.msk.f32.gmra.mxu3 %vm988_vm6, %v2423_v13  ;;  %v3444_v13 = vld [vmem:[%s6355_s5 + $0xc0] sm:$0xff] }
 0x2bf   : > { %2830 = vmatpush.msrb.mxu3 %v3445_v47 }
 0x2c1   : > { %v1790_v10 = vpop.f32.mrf.mxu3  ;;  %2831 = vmatpush.msrb.mxu3 %v3444_v13 }
 0x2c2   : > { %v1799_v61 = vadd.f32 %v1790_v10, %v1688_v4  ;;  %v3432_v4 = vld [vmem:[%s6355_s5 + $0x78] sm:$0xff]  ;;  %v3476_v10 = vld [vmem:[%s6355_s5 + $0x1a8] sm:$0xff] }
 0x2c3   : > { %v1902_v54 = vpop.f32.mrf.mxu2  ;;  %2737 = vmatpush.msrb.mxu2 %v3432_v4  ;;  %2925 = vmatpush.msra.mxu0 %v3476_v10 }
 0x2c4   : > { %v1911_v31 = vadd.f32 %v1902_v54, %v1799_v61 }
 0x2c5   : > { %2738 = vmatpush.msrb.mxu2 %v3431_v38  ;;  %v3474_v38 = vld [vmem:[%s6355_s5 + $0x198] sm:$0xff] }
 0x2c7   : > { %2739 = vmatpush.msrb.mxu2 %v3430_v36 }
 0x2c9   : > { %v1793_v46 = vpop.f32.mrf.mxu3 }
 0x2ca   : > { %v1800_v49 = vadd.f32 %v1793_v46, %v1689_v26  ;;  %v3429_v26 = vld [vmem:[%s6355_s5 + $0x60] sm:$0xff]  ;;  %v3485_v46 = vld [vmem:[%s6355_s5 + $0x1e8] sm:$0xff] }
 0x2cb   : > { %v1905_v60 = vpop.f32.mrf.mxu2  ;;  %2740 = vmatpush.msrb.mxu2 %v3429_v26  ;;  %2958 = vmatpush.msra.mxu1 %v3485_v46 }
 0x2cc   : > { %v1912_v0 = vadd.f32 %v1905_v60, %v1800_v49  ;;  %v3475_v49 = vld [vmem:[%s6355_s5 + $0x1a0] sm:$0xff]  ;;  %v2562_v60 = vpop.f32.mrf.mxu0 }
 0x2cd   : > { %2741 = vmatpush.msrb.mxu2 %v3428_v30  ;;  %2926 = vmatpush.msra.mxu0 %v3475_v49 }
 0x2cf   : > { %2742 = vmatpush.msrb.mxu2 %v3427_v55  ;;  %2927 = vmatpush.msra.mxu0 %v3474_v38 }
 0x2d1   : > { %v2005_v34 = vpop.f32.mrf.mxu3  ;;  %2743 = vmatpush.msrb.mxu2 %v3426_v9  ;;  %v3469_v9 = vld [vmem:[%s6355_s5 + $0x178] sm:$0xff] }
 0x2d2   : > { %v6038_v5 = vadd.f32 %v2005_v34, %v1908_v63  ;;  %v3484_v34 = vld [vmem:[%s6355_s5 + $0x1e0] sm:$0xff] }
 0x2d3   : > { %v6044_v62 = vpop.f32.mrf.mxu2  ;;  %2744 = vmatpush.msrb.mxu2 %v3425_v37  ;;  %2959 = vmatpush.msra.mxu1 %v3484_v34  ;;  %v3482_v37 = vld [vmem:[%s6355_s5 + $0x1d0] sm:$0xff] }
 0x2d4   : > { %v2131_v54 = vadd.f32 %v6044_v62, %v6038_v5 }
 0x2d5   : > { %2791 = vmatpush.msra.mxu2 %v3442_v45  ;;  %2960 = vmatpush.msra.mxu1 %v3483_v43 }
 0x2d7   : > { %2792 = vmatpush.msra.mxu2 %v3441_v25  ;;  %2961 = vmatpush.msra.mxu1 %v3482_v37  ;;  %v3468_v25 = vld [vmem:[%s6355_s5 + $0x170] sm:$0xff] }
 0x2d8   : > { %v3491_v37 = vld [vmem:[%s6355_s5 + $0x210] sm:$0xff] }
 0x2d9   : > { %v2008_v50 = vpop.f32.mrf.mxu3  ;;  %2793 = vmatpush.msra.mxu2 %v3440_v15 }
 0x2da   : > { %v6040_v51 = vadd.f32 %v2008_v50, %v1909_v59  ;;  %v3438_v59 = vld [vmem:[%s6355_s5 + $0x98] sm:$0xff]  ;;  %v2673_v50 = vpop.f32.mrf.mxu1 }
 0x2db   : > { %v6054_v20 = vpop.f32.mrf.mxu2  ;;  %2794 = vmatpush.msra.mxu2 %v3439_v57 }
 0x2dc   : > { %v2132_v62 = vadd.f32 %v6054_v20, %v6040_v51  ;;  %v3473_v51 = vld [vmem:[%s6355_s5 + $0x190] sm:$0xff]  ;;  %v2565_v20 = vpop.f32.mrf.mxu0 }
 0x2dd   : > { %2795 = vmatpush.msra.mxu2 %v3438_v59  ;;  %2928 = vmatpush.msra.mxu0 %v3473_v51 }
 0x2df   : > { %2796 = vmatpush.msra.mxu2 %v3437_v28  ;;  %2929 = vmatpush.msra.mxu0 %v3472_v12 }
 0x2e1   : > { %v2011_v48 = vpop.f32.mrf.mxu3  ;;  %2797 = vmatpush.msra.mxu2 %v3436_v32 }
 0x2e2   : > { %v6042_v27 = vadd.f32 %v2011_v48, %v1910_v23  ;;  %v3435_v23 = vld [vmem:[%s6355_s5 + $0x80] sm:$0xff]  ;;  %v2676_v24 = vpop.f32.mrf.mxu1 }
 0x2e3   : > { %v6079_v53 = vpop.f32.mrf.mxu2  ;;  %2798 = vmatpush.msra.mxu2 %v3435_v23 }
 0x2e4   : > { %v2133_v11 = vadd.f32 %v6079_v53, %v6042_v27  ;;  %v3471_v27 = vld [vmem:[%s6355_s5 + $0x180] sm:$0xff]  ;;  %v3481_v53 = vld [vmem:[%s6355_s5 + $0x1c8] sm:$0xff]  ;;  %v2568_v59 = vpop.f32.mrf.mxu0 }
 0x2e5   : > { %2930 = vmatpush.msra.mxu0 %v3471_v27  ;;  %2962 = vmatpush.msra.mxu1 %v3481_v53  ;;  %v3490_v53 = vld [vmem:[%s6355_s5 + $0x208] sm:$0xff] }
 0x2e7   : > { %2963 = vmatpush.msra.mxu1 %v3480_v22 }
 0x2e9   : > { %v2014_v17 = vpop.f32.mrf.mxu3 }
 0x2ea   : > { %v6046_v33 = vadd.f32 %v2014_v17, %v1911_v31  ;;  %v2679_v47 = vpop.f32.mrf.mxu1 }
 0x2eb   : > { %v6110_v58 = vpop.f32.mrf.mxu2 }
 0x2ec   : > { %v2134_v28 = vadd.f32 %v6110_v58, %v6046_v33  ;;  %v3456_v33 = vld [vmem:[%s6355_s5 + $0x118] sm:$0xff]  ;;  %v3464_v58 = vld [vmem:[%s6355_s5 + $0x150] sm:$0xff]  ;;  %v2571_v34 = vpop.f32.mrf.mxu0 }
 0x2f1   : > { %v2017_v40 = vpop.f32.mrf.mxu3 }
 0x2f2   : > { %v6056_v21 = vadd.f32 %v2017_v40, %v1912_v0  ;;  %v6194_v40 = vld [vmem:[%s6354_s4] ss:$0 sm:$0xff] }
 0x2f3   : > { %v6114_v8 = vpop.f32.mrf.mxu2 }
 0x2f9   : > { %v6081_v44 = vpop.f32.mrf.mxu3 }
 0x2fa   : > { %v2242_v31 = vadd.f32 %v6081_v44, %v2131_v54 }
 0x2fb   : > { %v2339_v35 = vpop.f32.mrf.mxu2 }
 0x2fc   : > { %v2354_v5 = vadd.f32 %v2339_v35, %v2242_v31  ;;  %v3457_v35 = vld [vmem:[%s6355_s5 + $0x120] sm:$0xff]  ;;  %v3463_v31 = vld [vmem:[%s6355_s5 + $0x148] sm:$0xff] }
 0x301   : > { %v2230_v63 = vpop.f32.mrf.mxu3 }
 0x302   : > { %v2243_v4 = vadd.f32 %v2230_v63, %v2132_v62  ;;  %v3460_v63 = vld [vmem:[%s6355_s5 + $0x138] sm:$0xff] }
 0x303   : > { %v2342_v0 = vpop.f32.mrf.mxu2 }
 0x304   : > { %v2355_v26 = vadd.f32 %v2342_v0, %v2243_v4  ;;  %v3462_v0 = vld [vmem:[%s6355_s5 + $0x140] sm:$0xff]  ;;  %v2682_v4 = vpop.f32.mrf.mxu1 }
 0x309   : > { %v6112_v16 = vpop.f32.mrf.mxu3 }
 0x30a   : > { %v2244_v45 = vadd.f32 %v6112_v16, %v2133_v11  ;;  %v3459_v16 = vld [vmem:[%s6355_s5 + $0x130] sm:$0xff]  ;;  %v2574_v11 = vpop.f32.mrf.mxu0 }
 0x30b   : > { %v2345_v30 = vpop.f32.mrf.mxu2 }
 0x30c   : > { %v2356_v57 = vadd.f32 %v2345_v30, %v2244_v45  ;;  %v2685_v12 = vpop.f32.mrf.mxu1 }
 0x311   : > { %v6146_v29 = vpop.f32.mrf.mxu3 }
 0x312   : > { %v2245_v19 = vadd.f32 %v6146_v29, %v2134_v28  ;;  %v3455_v29 = vld [vmem:[%s6355_s5 + $0x110] sm:$0xff] }
 0x313   : > { %v2348_v23 = vpop.f32.mrf.mxu2 }
 0x314   : > { %v2357_v46 = vadd.f32 %v2348_v23, %v2245_v19 }
 0x319   : > { %v6175_v61 = vpop.f32.mrf.mxu3 }
 0x31b   : > { %v2351_v51 = vpop.f32.mrf.mxu2 }
 0x321   : > { %v2451_v48 = vpop.f32.mrf.mxu3 }
 0x322   : > { %v2466_v17 = vadd.f32 %v2451_v48, %v2354_v5  ;;  %v2135_v5 = vadd.f32 %v6114_v8, %v6056_v21  ;;  %v3495_v21 = vld [vmem:[%s6355_s5 + $0x230] sm:$0xff] }
 0x324   : > { %v2577_v52 = vadd.f32 %v2562_v60, %v2466_v17  ;;  %v3454_v60 = vld [vmem:[%s6355_s5 + $0x108] sm:$0xff]  ;;  %v3453_v17 = vld [vmem:[%s6355_s5 + $0x100] sm:$0xff]  ;;  %v2246_v38 = vadd.f32 %v6175_v61, %v2135_v5 }
 0x326   : > { %v2688_v36 = vadd.f32 %v2673_v50, %v2577_v52  ;;  %v3496_v52 = vld [vmem:[%s6355_s5 + $0x238] sm:$0xff] }
 0x328   : > { %v2697_v3 = vadd.f32 %v6194_v40, %v2688_v36 }
 0x329   : > { %v2454_v44 = vpop.f32.mrf.mxu3 }
 0x32a   : > { %v2702_v55 = vmax.f32 %v2697_v3, 0.0  ;;  %v2467_v18 = vadd.f32 %v2454_v44, %v2355_v26  ;;  %v3493_v3 = vld [vmem:[%s6355_s5 + $0x220] sm:$0xff] }
 0x32c   : > { %v2725_v56 = vrot.slane %v2702_v55, 4  ;;  %v2578_v7 = vadd.f32 %v2565_v20, %v2467_v18  ;;  %3434 = vmatmul.msk.f32.vlgmr.msra.gmra.mxu3 %vm2726_vm8, %v2702_v55  ;;  %v3494_v20 = vld [vmem:[%s6355_s5 + $0x228] sm:$0xff]  ;;  %v3492_v55 = vld [vmem:[%s6355_s5 + $0x218] sm:$0xff] }
 0x32d   : > { %2890 = vmatpush.msra.mxu3 %v3469_v9 }
 0x32e   : > { %v2689_v15 = vadd.f32 %v2676_v24, %v2578_v7  ;;  %3433 = vmatmul.msk.f32.vlgmr.msrb.gmra.mxu2 %vm2726_vm8, %v2725_v56  ;;  %v2358_v24 = vadd.f32 %v2351_v51, %v2246_v38  ;;  %v3489_v56 = vld [vmem:[%s6355_s5 + $0x200] sm:$0xff] }
 0x32f   : > { %2857 = vmatpush.msrb.mxu2 %v3460_v63  ;;  %2891 = vmatpush.msra.mxu3 %v3468_v25 }
 0x330   : > { %v2698_v42 = vadd.f32 %v6194_v40, %v2689_v15 }
 0x331   : > { %2858 = vmatpush.msrb.mxu2 %v3459_v16  ;;  %v2457_v6 = vpop.f32.mrf.mxu3  ;;  %2892 = vmatpush.msra.mxu3 %v3467_v41 }
 0x332   : > { %v2703_v1 = vmax.f32 %v2698_v42, 0.0  ;;  %v2468_v32 = vadd.f32 %v2457_v6, %v2356_v57 }
 0x333   : > { %2859 = vmatpush.msrb.mxu2 %v3458_v14  ;;  %2893 = vmatpush.msra.mxu3 %v3466_v2 }
 0x334   : > { %v2813_v13 = vrot.slane %v2703_v1, 4  ;;  %v2579_v10 = vadd.f32 %v2568_v59, %v2468_v32  ;;  %v3596_v32 = vld [vmem:[%s6356_s6] ss:$0 sm:$0xff] }
 0x335   : > { %2860 = vmatpush.msrb.mxu2 %v3457_v35  ;;  %2894 = vmatpush.msra.mxu3 %v3465_v39 }
 0x336   : > { %v2690_v54 = vadd.f32 %v2679_v47, %v2579_v10  ;;  %3443 = vmatmul.msk.f32.vlgmr.msra.gmra.mxu2 %vm2726_vm8, %v2703_v1  ;;  %3452 = vmatmul.msk.f32.vlgmr.msrb.gmra.mxu3 %vm2726_vm8, %v2813_v13 }
 0x337   : > { %2861 = vmatpush.msrb.mxu2 %v3456_v33  ;;  %2895 = vmatpush.msra.mxu3 %v3464_v58 }
 0x338   : > { %v2699_v49 = vadd.f32 %v6194_v40, %v2690_v54 }
 0x339   : > { %2862 = vmatpush.msrb.mxu2 %v3455_v29  ;;  %v2460_v50 = vpop.f32.mrf.mxu3  ;;  %2896 = vmatpush.msra.mxu3 %v3463_v31 }
 0x33a   : > { %v2704_v48 = vmax.f32 %v2699_v49, 0.0  ;;  %v2469_v62 = vadd.f32 %v2460_v50, %v2357_v46 }
 0x33b   : > { %2863 = vmatpush.msrb.mxu2 %v3454_v60  ;;  %2897 = vmatpush.msra.mxu3 %v3462_v0 }
 0x33c   : > { %v2879_v43 = vrot.slane %v2704_v48, 4  ;;  %v2580_v36 = vadd.f32 %v2571_v34, %v2469_v62 }
 0x33d   : > { %2864 = vmatpush.msrb.mxu2 %v3453_v17 }
 0x33e   : > { %v2691_v8 = vadd.f32 %v2682_v4, %v2580_v36  ;;  %3470 = vmatmul.msk.f32.vlgmr.msra.gmra.mxu3 %vm2726_vm8, %v2879_v43  ;;  %3461 = vmatmul.msk.f32.vlgmr.msrb.gmra.mxu2 %vm2726_vm8, %v2704_v48 }
 0x33f   : > { %2989 = vmatpush.msra.mxu2 %v3496_v52 }
 0x340   : > { %v2700_v61 = vadd.f32 %v6194_v40, %v2691_v8 }
 0x341   : > { %2990 = vmatpush.msra.mxu2 %v3495_v21  ;;  %v2463_v26 = vpop.f32.mrf.mxu3 }
 0x342   : > { %v2705_v30 = vmax.f32 %v2700_v61, 0.0  ;;  %v2470_v44 = vadd.f32 %v2463_v26, %v2358_v24 }
 0x343   : > { %2991 = vmatpush.msra.mxu2 %v3494_v20 }
 0x344   : > { %v2945_v18 = vrot.slane %v2705_v30, 4  ;;  %v2581_v9 = vadd.f32 %v2574_v11, %v2470_v44  ;;  %3479 = vmatmul.msk.f32.vlgmr.msra.gmra.mxu0 %vm2726_vm8, %v2705_v30 }
 0x345   : > { %2992 = vmatpush.msra.mxu2 %v3493_v3 }
 0x346   : > { %v2692_v27 = vadd.f32 %v2685_v12, %v2581_v9  ;;  %3488 = vmatmul.msk.f32.vlgmr.msra.gmra.mxu1 %vm2726_vm8, %v2945_v18 }
 0x347   : > { %2993 = vmatpush.msra.mxu2 %v3492_v55 }
 0x348   : > { %v2701_v45 = vadd.f32 %v6194_v40, %v2692_v27 }
 0x349   : > { %2994 = vmatpush.msra.mxu2 %v3491_v37 }
 0x34a   : > { %v2706_v7 = vmax.f32 %v2701_v45, 0.0 }
 0x34b   : > { %2995 = vmatpush.msra.mxu2 %v3490_v53 }
 0x34d   : > { %2996 = vmatpush.msra.mxu2 %v3489_v56 }
 0x34e   : > { %3497 = vmatmul.msk.f32.vlgmr.msra.gmra.mxu2 %vm2726_vm8, %v2706_v7 }
 0x3af   : > { %v2768_v25 = vpop.f32.mrf.mxu3 }
 0x3b1   : > { %v2746_v63 = vpop.f32.mrf.mxu2 }
 0x3b2   : > { %v2769_v15 = vadd.f32 %v2768_v25, %v2746_v63 }
 0x3b9   : > { %v2800_v22 = vpop.f32.mrf.mxu2  ;;  %v2833_v16 = vpop.f32.mrf.mxu3 }
 0x3ba   : > { %v2803_v41 = vadd.f32 %v2800_v22, %v2769_v15 }
 0x3bc   : > { %v2836_v57 = vadd.f32 %v2833_v16, %v2803_v41 }
 0x3c1   : > { %v2866_v40 = vpop.f32.mrf.mxu2  ;;  %v2899_v14 = vpop.f32.mrf.mxu3 }
 0x3c2   : > { %v2869_v42 = vadd.f32 %v2866_v40, %v2836_v57  ;;  %v2932_v59 = vpop.f32.mrf.mxu0 }
 0x3c3   : > { %v2965_v28 = vpop.f32.mrf.mxu1 }
 0x3c4   : > { %v2902_v2 = vadd.f32 %v2899_v14, %v2869_v42 }
 0x3c6   : > { %v2935_v6 = vadd.f32 %v2932_v59, %v2902_v2 }
 0x3c8   : > { %v2968_v1 = vadd.f32 %v2965_v28, %v2935_v6 }
 0x3d1   : > { %v2998_v35 = vpop.f32.mrf.mxu2 }
 0x3d2   : > { %v3001_v39 = vadd.f32 %v2998_v35, %v2968_v1 }
 0x3d4   : > { %v3006_v47 = vadd.f32 %v3596_v32, %v3001_v39 }
 0x3d6   : > { %v3007_v23 = vmax.f32 %v3006_v47, 0.0 }
 0x3d8   : > { %3009 = vst.msk [vmem:[%s274_s15] sm:$0xf] %vm3008_vm9, %v3007_v23 }
 0x3d9   : > { %3625 = shalt.err (!%p3622_p3)
}
 0x3da   : > { %3555 = dma.vmem_to_hbm [thread:$0]  (%p3740_p5), %s3024_s16, 64, %s3026_s17, %s3011_s28  }
 0x3db PF: > { %p3561_p4 = scmp.ge.s32.totalorder %s3660_s27, 2  ;;  %s3037_s8 = sand.u32 1, %s3648_s24  }
 0x3dc   : > { %s3038_s9 = scalar_lea.sflag [#allocation3], %s3037_s8 }
 0x3dd   : > { %p3558_p7 = pnand %p3561_p4, %p3744_p6 }
 0x3df   : > { %p3559_p8 = pneg %p3558_p7 }
 0x3e1   : > { %3643 = dma.done.wait (%p3559_p8), %s3038_s9, 64  }
 0x3e2   : > { %3645 = vsyncadd (%p3559_p8), %s3038_s9, 4294967232  ;;  %p17_p9 = scmp.ge.s32.totalorder %s3727_s30, 4   ;;  %s6717_s24 = smov %s3652_s25 }
 0x3e3   : > { %s6718_s25 = smov %s3656_s26  ;;  %s6719_s26 = smov %s3738_s10 }
 0x3e4   : > { %s6720_s27 = smov %s3727_s30  ;;  %19 = sbr.rel (!%p17_p9) target bundleno = 3 (0x3), region = 106 }
 0x3e9   :  { %3044 = vsyncpa [#allocation3], 1 }
 0x3ea   :  { %3046 = vsyncpa [#allocation3 + $0x1], 1 }

// kernel: _cnn_forward_unfused.3
= control target key start
LH: loop header
LB: loop body
LE: loop exit
PB: predicated region body
PF: predicated region fallthrough
CT: control target
= control target key end

     0   :  { %s1138_s12 = smov 0   ;;  %s1376_s0 = inlined_call_operand.vmem [shape: bf16[512,256], index: 0, kind: input, shape index: {}]   ;;  %s1377_s1 = inlined_call_operand.vmem [shape: bf16[256,32], index: 1, kind: input, shape index: {}]   ;;  %s1378_s2 = inlined_call_operand.vmem [shape: f32[1,32], index: 2, kind: input, shape index: {}]   ;;  %s1379_s3 = inlined_call_operand.vmem [shape: bf16[512,32], index: 3, kind: output, shape index: {}]  }
   0x1 LB: > { %s832_s13 = sadd.s32 4294967295, %s1116_s12   ;;  %p836_p0 = scmp.ge.s32.totalorder %s1116_s12, 1  ;;  %s1116_s12 = sphi %s1138_s12, %s13_s12  }
   0x2   : > { %p139_p1 = scmp.lt.s32.totalorder %s1116_s12, 3 }
   0x4   : > { %p140_p2 = pnand %p836_p0, %p139_p1 }
   0x5   : > { %s837_s26 = sshll.u32 (!%p140_p2), %s832_s13, 5 }
   0x6   : > { %143 = sbr.rel (%p140_p2) target bundleno = 304 (0x130), region = 32  ;;  %p165_p3 = scmp.lt.s32.totalorder (!%p140_p2), %s837_s26, 63 }
   0xb   : > { %v1076_v0 = vld [vmem:[%s1377_s1 + $0x38] sm:$0xff]  ;;  %v1075_v2 = vld [vmem:[%s1377_s1 + $0x30] sm:$0xff]  ;;  %v1074_v4 = vld [vmem:[%s1377_s1 + $0x28] sm:$0xff]  ;;  %s1381_s26 = smov (!%p165_p3, %s837_s26), 63  ;;  %vm743_vm0 = vcmask 257024  }
   0xc   : > { %v1084_v1 = vld [vmem:[%s1377_s1 + $0x78] sm:$0xff]  ;;  %501 = vmatpush.bf16.msra.mxu0 %v1076_v0  ;;  %1085 = vmatpush.bf16.msra.mxu2 %v1076_v0  ;;  %v1083_v3 = vld [vmem:[%s1377_s1 + $0x70] sm:$0xff]  ;;  %v1082_v5 = vld [vmem:[%s1377_s1 + $0x68] sm:$0xff]  ;;  %s1036_s13 = sshll.u32 %s1381_s26, 3  ;;  %s841_s28 = sshll.u32 %s1381_s26, 2 }
   0xd   : > { %590 = vmatpush.bf16.msra.mxu1 %v1084_v1  ;;  %1093 = vmatpush.bf16.msra.mxu3 %v1084_v1  ;;  %v1073_v6 = vld [vmem:[%s1377_s1 + $0x20] sm:$0xff]  ;;  %v1072_v8 = vld [vmem:[%s1377_s1 + $0x18] sm:$0xff]  ;;  %v1071_v10 = vld [vmem:[%s1377_s1 + $0x10] sm:$0xff]  ;;  %s1191_s18 = scalar_lea.vmem %s1376_s0, %s1036_s13  ;;  %s1276_s4 = scalar_lea.vmem %s1379_s3, %s841_s28 }
   0xe   : > { %v1081_v7 = vld [vmem:[%s1377_s1 + $0x60] sm:$0xff]  ;;  %v1080_v9 = vld [vmem:[%s1377_s1 + $0x58] sm:$0xff]  ;;  %v1079_v11 = vld [vmem:[%s1377_s1 + $0x50] sm:$0xff] }
   0xf   : > { %v1070_v12 = vld [vmem:[%s1377_s1 + $0x8] sm:$0xff]  ;;  %v1069_v14 = vld [vmem:[%s1377_s1] sm:$0xff]  ;;  %v852_v28 = vld [vmem:[%s1191_s18 + $0x10] sm:$0xf] }
  0x10   : > { %502 = vmatpush.bf16.msra.mxu0 %v1075_v2  ;;  %1086 = vmatpush.bf16.msra.mxu2 %v1075_v2  ;;  %v1078_v13 = vld [vmem:[%s1377_s1 + $0x48] sm:$0xff]  ;;  %v1077_v15 = vld [vmem:[%s1377_s1 + $0x40] sm:$0xff]  ;;  %v1040_v29 = vld [vmem:[%s1191_s18 + $0x14] sm:$0xf0] }
  0x11   : > { %591 = vmatpush.bf16.msra.mxu1 %v1083_v3  ;;  %1094 = vmatpush.bf16.msra.mxu3 %v1083_v3  ;;  %v844_v16 = vld [vmem:[%s1191_s18] sm:$0xf]  ;;  %v1038_v17 = vld [vmem:[%s1191_s18 + $0x4] sm:$0xf0]  ;;  %v1037_v20 = vld [vmem:[%s1191_s18 + $0x4] sm:$0xf]  ;;  %v853_v36 = vor.u32 %v1040_v29, %v852_v28 }
  0x12   : > { %v908_v18 = vld [vmem:[%s1191_s18 + $0x80] sm:$0xf]  ;;  %v1054_v19 = vld [vmem:[%s1191_s18 + $0x84] sm:$0xf0]  ;;  %v846_v21 = vld [vmem:[%s1191_s18 + $0x8] sm:$0xf0]  ;;  %v845_v24 = vor.u32 %v1038_v17, %v844_v16 }
  0x13   : > { %v1053_v22 = vld [vmem:[%s1191_s18 + $0x84] sm:$0xf]  ;;  %v910_v23 = vld [vmem:[%s1191_s18 + $0x88] sm:$0xf0]  ;;  %v909_v25 = vor.u32 %v1054_v19, %v908_v18  ;;  %v849_v26 = vor.u32 %v1037_v20, %v846_v21  ;;  %v916_v30 = vld [vmem:[%s1191_s18 + $0x90] sm:$0xf] }
  0x14   : > { %503 = vmatpush.bf16.msra.mxu0 %v1074_v4  ;;  %1087 = vmatpush.bf16.msra.mxu2 %v1074_v4  ;;  %v913_v27 = vor.u32 %v1053_v22, %v910_v23  ;;  %v1056_v31 = vld [vmem:[%s1191_s18 + $0x94] sm:$0xf0]  ;;  %v1039_v32 = vld [vmem:[%s1191_s18 + $0x14] sm:$0xf]  ;;  %v854_v33 = vld [vmem:[%s1191_s18 + $0x18] sm:$0xf0] }
  0x15   : > { %592 = vmatpush.bf16.msra.mxu1 %v1082_v5  ;;  %1095 = vmatpush.bf16.msra.mxu3 %v1082_v5  ;;  %v1055_v34 = vld [vmem:[%s1191_s18 + $0x94] sm:$0xf]  ;;  %v918_v35 = vld [vmem:[%s1191_s18 + $0x98] sm:$0xf0]  ;;  %v917_v37 = vor.u32 %v1056_v31, %v916_v30  ;;  %v857_v38 = vor.u32 %v1039_v32, %v854_v33  ;;  %v860_v40 = vld [vmem:[%s1191_s18 + $0x20] sm:$0xf] }
  0x16   : > { %v921_v39 = vor.u32 %v1055_v34, %v918_v35  ;;  %v1042_v41 = vld [vmem:[%s1191_s18 + $0x24] sm:$0xf0]  ;;  %v924_v42 = vld [vmem:[%s1191_s18 + $0xa0] sm:$0xf]  ;;  %v1041_v44 = vld [vmem:[%s1191_s18 + $0x24] sm:$0xf] }
  0x17   : > { %v1058_v43 = vld [vmem:[%s1191_s18 + $0xa4] sm:$0xf0]  ;;  %v862_v45 = vld [vmem:[%s1191_s18 + $0x28] sm:$0xf0]  ;;  %v1057_v46 = vld [vmem:[%s1191_s18 + $0xa4] sm:$0xf]  ;;  %v861_v48 = vor.u32 %v1042_v41, %v860_v40 }
  0x18   : > { %504 = vmatpush.bf16.msra.mxu0 %v1073_v6  ;;  %1088 = vmatpush.bf16.msra.mxu2 %v1073_v6  ;;  %v926_v47 = vld [vmem:[%s1191_s18 + $0xa8] sm:$0xf0]  ;;  %v925_v49 = vor.u32 %v1058_v43, %v924_v42  ;;  %v865_v50 = vor.u32 %v1041_v44, %v862_v45  ;;  %v868_v52 = vld [vmem:[%s1191_s18 + $0x30] sm:$0xf]  ;;  %v1044_v53 = vld [vmem:[%s1191_s18 + $0x34] sm:$0xf0] }
  0x19   : > { %593 = vmatpush.bf16.msra.mxu1 %v1081_v7  ;;  %1096 = vmatpush.bf16.msra.mxu3 %v1081_v7  ;;  %v929_v51 = vor.u32 %v1057_v46, %v926_v47  ;;  %v932_v54 = vld [vmem:[%s1191_s18 + $0xb0] sm:$0xf]  ;;  %v1060_v55 = vld [vmem:[%s1191_s18 + $0xb4] sm:$0xf0]  ;;  %v1043_v56 = vld [vmem:[%s1191_s18 + $0x34] sm:$0xf]  ;;  %v869_v60 = vor.u32 %v1044_v53, %v868_v52 }
  0x1a   : > { %v870_v57 = vld [vmem:[%s1191_s18 + $0x38] sm:$0xf0]  ;;  %v1059_v58 = vld [vmem:[%s1191_s18 + $0xb4] sm:$0xf]  ;;  %v933_v61 = vor.u32 %v1060_v55, %v932_v54  ;;  %v876_v0 = vld [vmem:[%s1191_s18 + $0x40] sm:$0xf] }
  0x1b   : > { %v934_v59 = vld [vmem:[%s1191_s18 + $0xb8] sm:$0xf0]  ;;  %v873_v62 = vor.u32 %v1043_v56, %v870_v57  ;;  %v1046_v1 = vld [vmem:[%s1191_s18 + $0x44] sm:$0xf0]  ;;  %v940_v2 = vld [vmem:[%s1191_s18 + $0xc0] sm:$0xf] }
  0x1c   : > { %505 = vmatpush.bf16.msra.mxu0 %v1072_v8  ;;  %1089 = vmatpush.bf16.msra.mxu2 %v1072_v8  ;;  %v937_v63 = vor.u32 %v1059_v58, %v934_v59  ;;  %v1062_v3 = vld [vmem:[%s1191_s18 + $0xc4] sm:$0xf0]  ;;  %v1045_v4 = vld [vmem:[%s1191_s18 + $0x44] sm:$0xf]  ;;  %v878_v5 = vld [vmem:[%s1191_s18 + $0x48] sm:$0xf0]  ;;  %v877_v8 = vor.u32 %v1046_v1, %v876_v0 }
  0x1d   : > { %594 = vmatpush.bf16.msra.mxu1 %v1080_v9  ;;  %1097 = vmatpush.bf16.msra.mxu3 %v1080_v9  ;;  %v1061_v6 = vld [vmem:[%s1191_s18 + $0xc4] sm:$0xf]  ;;  %v942_v7 = vld [vmem:[%s1191_s18 + $0xc8] sm:$0xf0]  ;;  %v941_v9 = vor.u32 %v1062_v3, %v940_v2  ;;  %v1047_v16 = vld [vmem:[%s1191_s18 + $0x54] sm:$0xf] }
  0x1e   : > { %v886_v17 = vld [vmem:[%s1191_s18 + $0x58] sm:$0xf0]  ;;  %v1063_v18 = vld [vmem:[%s1191_s18 + $0xd4] sm:$0xf]  ;;  %v1049_v28 = vld [vmem:[%s1191_s18 + $0x64] sm:$0xf] }
  0x1f   : > { %v950_v19 = vld [vmem:[%s1191_s18 + $0xd8] sm:$0xf0]  ;;  %v889_v22 = vor.u32 %v1047_v16, %v886_v17  ;;  %v894_v29 = vld [vmem:[%s1191_s18 + $0x68] sm:$0xf0]  ;;  %v1065_v30 = vld [vmem:[%s1191_s18 + $0xe4] sm:$0xf] }
  0x20   : > { %506 = vmatpush.bf16.msra.mxu0 %v1071_v10  ;;  %1090 = vmatpush.bf16.msra.mxu2 %v1071_v10  ;;  %v881_v10 = vor.u32 %v1045_v4, %v878_v5  ;;  %v953_v23 = vor.u32 %v1063_v18, %v950_v19  ;;  %v958_v31 = vld [vmem:[%s1191_s18 + $0xe8] sm:$0xf0]  ;;  %v897_v34 = vor.u32 %v1049_v28, %v894_v29  ;;  %v1051_v40 = vld [vmem:[%s1191_s18 + $0x74] sm:$0xf]  ;;  %v902_v41 = vld [vmem:[%s1191_s18 + $0x78] sm:$0xf0] }
  0x21   : > { %595 = vmatpush.bf16.msra.mxu1 %v1079_v11  ;;  %1098 = vmatpush.bf16.msra.mxu3 %v1079_v11  ;;  %v945_v11 = vor.u32 %v1061_v6, %v942_v7  ;;  %v961_v35 = vor.u32 %v1065_v30, %v958_v31  ;;  %v1067_v42 = vld [vmem:[%s1191_s18 + $0xf4] sm:$0xf]  ;;  %v966_v43 = vld [vmem:[%s1191_s18 + $0xf8] sm:$0xf0]  ;;  %v905_v46 = vor.u32 %v1051_v40, %v902_v41 }
  0x22   : > { %v969_v47 = vor.u32 %v1067_v42, %v966_v43 }
  0x24   : > { %507 = vmatpush.bf16.msra.mxu0 %v1070_v12  ;;  %1091 = vmatpush.bf16.msra.mxu2 %v1070_v12  ;;  %v884_v12 = vld [vmem:[%s1191_s18 + $0x50] sm:$0xf] }
  0x25   : > { %596 = vmatpush.bf16.msra.mxu1 %v1078_v13  ;;  %1099 = vmatpush.bf16.msra.mxu3 %v1078_v13  ;;  %v1048_v13 = vld [vmem:[%s1191_s18 + $0x54] sm:$0xf0] }
  0x26   : > { %v885_v20 = vor.u32 %v1048_v13, %v884_v12 }
  0x28   : > { %508 = vmatpush.bf16.msra.mxu0 %v1069_v14  ;;  %1092 = vmatpush.bf16.msra.mxu2 %v1069_v14  ;;  %v948_v14 = vld [vmem:[%s1191_s18 + $0xd0] sm:$0xf] }
  0x29   : > { %597 = vmatpush.bf16.msra.mxu1 %v1077_v15  ;;  %1100 = vmatpush.bf16.msra.mxu3 %v1077_v15  ;;  %v1064_v15 = vld [vmem:[%s1191_s18 + $0xd4] sm:$0xf0] }
  0x2a   : > { %v949_v21 = vor.u32 %v1064_v15, %v948_v14 }
  0x2b   : > { %509 = vmatmul.bf16.vlgmr.msra.gmra.mxu0 %v845_v24  ;;  %549 = vmatmul.bf16.vlgmr.msra.gmra.mxu2 %v909_v25  ;;  %v892_v24 = vld [vmem:[%s1191_s18 + $0x60] sm:$0xf]  ;;  %v1050_v25 = vld [vmem:[%s1191_s18 + $0x64] sm:$0xf0] }
  0x2c   : > { %598 = vmatmul.bf16.vlgmr.msra.gmra.mxu1 %v849_v26  ;;  %638 = vmatmul.bf16.vlgmr.msra.gmra.mxu3 %v913_v27  ;;  %v956_v26 = vld [vmem:[%s1191_s18 + $0xe0] sm:$0xf]  ;;  %v1066_v27 = vld [vmem:[%s1191_s18 + $0xe4] sm:$0xf0]  ;;  %v893_v32 = vor.u32 %v1050_v25, %v892_v24 }
  0x2d   : > { %v957_v33 = vor.u32 %v1066_v27, %v956_v26 }
  0x3b   : > { %514 = vmatmul.bf16.gmra.mxu0 %v853_v36  ;;  %554 = vmatmul.bf16.gmra.mxu2 %v917_v37  ;;  %v900_v36 = vld [vmem:[%s1191_s18 + $0x70] sm:$0xf]  ;;  %v1052_v37 = vld [vmem:[%s1191_s18 + $0x74] sm:$0xf0] }
  0x3c   : > { %603 = vmatmul.bf16.gmra.mxu1 %v857_v38  ;;  %643 = vmatmul.bf16.gmra.mxu3 %v921_v39  ;;  %v964_v38 = vld [vmem:[%s1191_s18 + $0xf0] sm:$0xf]  ;;  %v1068_v39 = vld [vmem:[%s1191_s18 + $0xf4] sm:$0xf0]  ;;  %v901_v44 = vor.u32 %v1052_v37, %v900_v36 }
  0x3d   : > { %v965_v45 = vor.u32 %v1068_v39, %v964_v38 }
  0x4b   : > { %519 = vmatmul.bf16.gmra.mxu0 %v861_v48  ;;  %559 = vmatmul.bf16.gmra.mxu2 %v925_v49  ;;  %v1269_v48 = vld [vmem:[%s1378_s2] ss:$0 sm:$0xff] }
  0x4c   : > { %608 = vmatmul.bf16.gmra.mxu1 %v865_v50  ;;  %648 = vmatmul.bf16.gmra.mxu3 %v929_v51 }
  0x5b   : > { %524 = vmatmul.bf16.gmra.mxu0 %v869_v60  ;;  %564 = vmatmul.bf16.gmra.mxu2 %v933_v61 }
  0x5c   : > { %613 = vmatmul.bf16.gmra.mxu1 %v873_v62  ;;  %653 = vmatmul.bf16.gmra.mxu3 %v937_v63 }
  0x6b   : > { %529 = vmatmul.bf16.gmra.mxu0 %v877_v8  ;;  %569 = vmatmul.bf16.gmra.mxu2 %v941_v9 }
  0x6c   : > { %618 = vmatmul.bf16.gmra.mxu1 %v881_v10  ;;  %658 = vmatmul.bf16.gmra.mxu3 %v945_v11 }
  0x7b   : > { %534 = vmatmul.bf16.gmra.mxu0 %v885_v20  ;;  %574 = vmatmul.bf16.gmra.mxu2 %v949_v21 }
  0x7c   : > { %623 = vmatmul.bf16.gmra.mxu1 %v889_v22  ;;  %663 = vmatmul.bf16.gmra.mxu3 %v953_v23 }
  0x8b   : > { %539 = vmatmul.bf16.gmra.mxu0 %v893_v32  ;;  %579 = vmatmul.bf16.gmra.mxu2 %v957_v33 }
  0x8c   : > { %628 = vmatmul.bf16.gmra.mxu1 %v897_v34  ;;  %668 = vmatmul.bf16.gmra.mxu3 %v961_v35 }
  0x9b   : > { %544 = vmatmul.bf16.gmra.mxu0 %v901_v44  ;;  %584 = vmatmul.bf16.gmra.mxu2 %v965_v45 }
  0x9c   : > { %633 = vmatmul.bf16.gmra.mxu1 %v905_v46  ;;  %673 = vmatmul.bf16.gmra.mxu3 %v969_v47 }
  0xa8   : > { %v510_v49 = vpop.f32.mrf.mxu0 }
  0xa9   : > { %v511_v50 = vadd.f32 %v1269_v48, %v510_v49  ;;  %v599_v51 = vpop.f32.mrf.mxu1 }
  0xab   : > { %v600_v52 = vadd.f32 %v599_v51, %v511_v50 }
  0xad   : > { %v679_v53 = vmax.f32 %v600_v52, 0.0 }
  0xae   : > { %v550_v54 = vpop.f32.mrf.mxu2 }
  0xaf   : > { %v711_v55 = vpack.c.bf16 %v679_v53, %v679_v53  ;;  %v551_v56 = vadd.f32 %v1269_v48, %v550_v54  ;;  %v639_v57 = vpop.f32.mrf.mxu3 }
  0xb0   : > { %v512_v58 = vpop.f32.mrf.mxu0 }
  0xb1   : > { %744 = vst.msk [vmem:[%s1276_s4] sm:$0xf] %vm743_vm0, %v711_v55  ;;  %v640_v59 = vadd.f32 %v639_v57, %v551_v56  ;;  %v513_v60 = vadd.f32 %v1269_v48, %v512_v58  ;;  %v601_v61 = vpop.f32.mrf.mxu1 }
  0xb3   : > { %v695_v62 = vmax.f32 %v640_v59, 0.0  ;;  %v602_v63 = vadd.f32 %v601_v61, %v513_v60 }
  0xb5   : > { %v727_v0 = vpack.c.bf16 %v695_v62, %v695_v62  ;;  %v680_v1 = vmax.f32 %v602_v63, 0.0 }
  0xb6   : > { %v552_v2 = vpop.f32.mrf.mxu2 }
  0xb7   : > { %760 = vst.msk [vmem:[%s1276_s4 + $0x40] sm:$0xf] %vm743_vm0, %v727_v0  ;;  %v712_v3 = vpack.c.bf16 %v680_v1, %v680_v1  ;;  %v553_v4 = vadd.f32 %v1269_v48, %v552_v2  ;;  %v641_v5 = vpop.f32.mrf.mxu3 }
  0xb8   : > { %v515_v6 = vpop.f32.mrf.mxu0 }
  0xb9   : > { %745 = vst.msk [vmem:[%s1276_s4 + $0x4] sm:$0xf] %vm743_vm0, %v712_v3  ;;  %v642_v7 = vadd.f32 %v641_v5, %v553_v4  ;;  %v516_v8 = vadd.f32 %v1269_v48, %v515_v6  ;;  %v604_v9 = vpop.f32.mrf.mxu1 }
  0xbb   : > { %v696_v10 = vmax.f32 %v642_v7, 0.0  ;;  %v605_v11 = vadd.f32 %v604_v9, %v516_v8 }
  0xbd   : > { %v728_v12 = vpack.c.bf16 %v696_v10, %v696_v10  ;;  %v681_v13 = vmax.f32 %v605_v11, 0.0 }
  0xbe   : > { %v555_v14 = vpop.f32.mrf.mxu2 }
  0xbf   : > { %761 = vst.msk [vmem:[%s1276_s4 + $0x44] sm:$0xf] %vm743_vm0, %v728_v12  ;;  %v713_v15 = vpack.c.bf16 %v681_v13, %v681_v13  ;;  %v556_v16 = vadd.f32 %v1269_v48, %v555_v14  ;;  %v644_v17 = vpop.f32.mrf.mxu3 }
  0xc0   : > { %v517_v18 = vpop.f32.mrf.mxu0 }
  0xc1   : > { %746 = vst.msk [vmem:[%s1276_s4 + $0x8] sm:$0xf] %vm743_vm0, %v713_v15  ;;  %v645_v19 = vadd.f32 %v644_v17, %v556_v16  ;;  %v518_v20 = vadd.f32 %v1269_v48, %v517_v18  ;;  %v606_v21 = vpop.f32.mrf.mxu1 }
  0xc3   : > { %v697_v22 = vmax.f32 %v645_v19, 0.0  ;;  %v607_v23 = vadd.f32 %v606_v21, %v518_v20 }
  0xc5   : > { %v729_v24 = vpack.c.bf16 %v697_v22, %v697_v22  ;;  %v682_v25 = vmax.f32 %v607_v23, 0.0 }
  0xc6   : > { %v557_v26 = vpop.f32.mrf.mxu2 }
  0xc7   : > { %762 = vst.msk [vmem:[%s1276_s4 + $0x48] sm:$0xf] %vm743_vm0, %v729_v24  ;;  %v714_v27 = vpack.c.bf16 %v682_v25, %v682_v25  ;;  %v558_v28 = vadd.f32 %v1269_v48, %v557_v26  ;;  %v646_v29 = vpop.f32.mrf.mxu3 }
  0xc8   : > { %v520_v30 = vpop.f32.mrf.mxu0 }
  0xc9   : > { %747 = vst.msk [vmem:[%s1276_s4 + $0xc] sm:$0xf] %vm743_vm0, %v714_v27  ;;  %v647_v31 = vadd.f32 %v646_v29, %v558_v28  ;;  %v521_v32 = vadd.f32 %v1269_v48, %v520_v30  ;;  %v609_v33 = vpop.f32.mrf.mxu1 }
  0xcb   : > { %v698_v34 = vmax.f32 %v647_v31, 0.0  ;;  %v610_v35 = vadd.f32 %v609_v33, %v521_v32 }
  0xcd   : > { %v730_v36 = vpack.c.bf16 %v698_v34, %v698_v34  ;;  %v683_v37 = vmax.f32 %v610_v35, 0.0 }
  0xce   : > { %v560_v38 = vpop.f32.mrf.mxu2 }
  0xcf   : > { %763 = vst.msk [vmem:[%s1276_s4 + $0x4c] sm:$0xf] %vm743_vm0, %v730_v36  ;;  %v715_v39 = vpack.c.bf16 %v683_v37, %v683_v37  ;;  %v561_v40 = vadd.f32 %v1269_v48, %v560_v38  ;;  %v649_v41 = vpop.f32.mrf.mxu3 }
  0xd0   : > { %v522_v42 = vpop.f32.mrf.mxu0 }
  0xd1   : > { %748 = vst.msk [vmem:[%s1276_s4 + $0x10] sm:$0xf] %vm743_vm0, %v715_v39  ;;  %v650_v43 = vadd.f32 %v649_v41, %v561_v40  ;;  %v523_v44 = vadd.f32 %v1269_v48, %v522_v42  ;;  %v611_v45 = vpop.f32.mrf.mxu1 }
  0xd3   : > { %v699_v46 = vmax.f32 %v650_v43, 0.0  ;;  %v612_v47 = vadd.f32 %v611_v45, %v523_v44 }
  0xd5   : > { %v731_v49 = vpack.c.bf16 %v699_v46, %v699_v46  ;;  %v684_v50 = vmax.f32 %v612_v47, 0.0 }
  0xd6   : > { %v562_v51 = vpop.f32.mrf.mxu2 }
  0xd7   : > { %764 = vst.msk [vmem:[%s1276_s4 + $0x50] sm:$0xf] %vm743_vm0, %v731_v49  ;;  %v716_v52 = vpack.c.bf16 %v684_v50, %v684_v50  ;;  %v563_v53 = vadd.f32 %v1269_v48, %v562_v51  ;;  %v651_v54 = vpop.f32.mrf.mxu3 }
  0xd8   : > { %v525_v55 = vpop.f32.mrf.mxu0 }
  0xd9   : > { %749 = vst.msk [vmem:[%s1276_s4 + $0x14] sm:$0xf] %vm743_vm0, %v716_v52  ;;  %v652_v56 = vadd.f32 %v651_v54, %v563_v53  ;;  %v526_v57 = vadd.f32 %v1269_v48, %v525_v55  ;;  %v614_v58 = vpop.f32.mrf.mxu1 }
  0xdb   : > { %v700_v59 = vmax.f32 %v652_v56, 0.0  ;;  %v615_v60 = vadd.f32 %v614_v58, %v526_v57 }
  0xdd   : > { %v732_v61 = vpack.c.bf16 %v700_v59, %v700_v59  ;;  %v685_v62 = vmax.f32 %v615_v60, 0.0 }
  0xde   : > { %v565_v63 = vpop.f32.mrf.mxu2 }
  0xdf   : > { %765 = vst.msk [vmem:[%s1276_s4 + $0x54] sm:$0xf] %vm743_vm0, %v732_v61  ;;  %v717_v0 = vpack.c.bf16 %v685_v62, %v685_v62  ;;  %v566_v1 = vadd.f32 %v1269_v48, %v565_v63  ;;  %v654_v2 = vpop.f32.mrf.mxu3 }
  0xe0   : > { %v527_v3 = vpop.f32.mrf.mxu0 }
  0xe1   : > { %750 = vst.msk [vmem:[%s1276_s4 + $0x18] sm:$0xf] %vm743_vm0, %v717_v0  ;;  %v655_v4 = vadd.f32 %v654_v2, %v566_v1  ;;  %v528_v5 = vadd.f32 %v1269_v48, %v527_v3  ;;  %v616_v6 = vpop.f32.mrf.mxu1 }
  0xe3   : > { %v701_v7 = vmax.f32 %v655_v4, 0.0  ;;  %v617_v8 = vadd.f32 %v616_v6, %v528_v5 }
  0xe5   : > { %v733_v9 = vpack.c.bf16 %v701_v7, %v701_v7  ;;  %v686_v10 = vmax.f32 %v617_v8, 0.0 }
  0xe6   : > { %v567_v11 = vpop.f32.mrf.mxu2 }
  0xe7   : > { %766 = vst.msk [vmem:[%s1276_s4 + $0x58] sm:$0xf] %vm743_vm0, %v733_v9  ;;  %v718_v12 = vpack.c.bf16 %v686_v10, %v686_v10  ;;  %v568_v13 = vadd.f32 %v1269_v48, %v567_v11  ;;  %v656_v14 = vpop.f32.mrf.mxu3 }
  0xe8   : > { %v530_v15 = vpop.f32.mrf.mxu0 }
  0xe9   : > { %751 = vst.msk [vmem:[%s1276_s4 + $0x1c] sm:$0xf] %vm743_vm0, %v718_v12  ;;  %v657_v16 = vadd.f32 %v656_v14, %v568_v13  ;;  %v531_v17 = vadd.f32 %v1269_v48, %v530_v15  ;;  %v619_v18 = vpop.f32.mrf.mxu1 }
  0xeb   : > { %v702_v19 = vmax.f32 %v657_v16, 0.0  ;;  %v620_v20 = vadd.f32 %v619_v18, %v531_v17 }
  0xed   : > { %v734_v21 = vpack.c.bf16 %v702_v19, %v702_v19  ;;  %v687_v22 = vmax.f32 %v620_v20, 0.0 }
  0xee   : > { %v570_v23 = vpop.f32.mrf.mxu2 }
  0xef   : > { %767 = vst.msk [vmem:[%s1276_s4 + $0x5c] sm:$0xf] %vm743_vm0, %v734_v21  ;;  %v719_v24 = vpack.c.bf16 %v687_v22, %v687_v22  ;;  %v571_v25 = vadd.f32 %v1269_v48, %v570_v23  ;;  %v659_v26 = vpop.f32.mrf.mxu3 }
  0xf0   : > { %v532_v27 = vpop.f32.mrf.mxu0 }
  0xf1   : > { %752 = vst.msk [vmem:[%s1276_s4 + $0x20] sm:$0xf] %vm743_vm0, %v719_v24  ;;  %v660_v28 = vadd.f32 %v659_v26, %v571_v25  ;;  %v533_v29 = vadd.f32 %v1269_v48, %v532_v27  ;;  %v621_v30 = vpop.f32.mrf.mxu1 }
  0xf3   : > { %v703_v31 = vmax.f32 %v660_v28, 0.0  ;;  %v622_v32 = vadd.f32 %v621_v30, %v533_v29 }
  0xf5   : > { %v735_v33 = vpack.c.bf16 %v703_v31, %v703_v31  ;;  %v688_v34 = vmax.f32 %v622_v32, 0.0 }
  0xf6   : > { %v572_v35 = vpop.f32.mrf.mxu2 }
  0xf7   : > { %768 = vst.msk [vmem:[%s1276_s4 + $0x60] sm:$0xf] %vm743_vm0, %v735_v33  ;;  %v720_v36 = vpack.c.bf16 %v688_v34, %v688_v34  ;;  %v573_v37 = vadd.f32 %v1269_v48, %v572_v35  ;;  %v661_v38 = vpop.f32.mrf.mxu3 }
  0xf8   : > { %v535_v39 = vpop.f32.mrf.mxu0 }
  0xf9   : > { %753 = vst.msk [vmem:[%s1276_s4 + $0x24] sm:$0xf] %vm743_vm0, %v720_v36  ;;  %v662_v40 = vadd.f32 %v661_v38, %v573_v37  ;;  %v536_v41 = vadd.f32 %v1269_v48, %v535_v39  ;;  %v624_v42 = vpop.f32.mrf.mxu1 }
  0xfb   : > { %v704_v43 = vmax.f32 %v662_v40, 0.0  ;;  %v625_v44 = vadd.f32 %v624_v42, %v536_v41 }
  0xfd   : > { %v736_v45 = vpack.c.bf16 %v704_v43, %v704_v43  ;;  %v689_v46 = vmax.f32 %v625_v44, 0.0 }
  0xfe   : > { %v575_v47 = vpop.f32.mrf.mxu2 }
  0xff   : > { %769 = vst.msk [vmem:[%s1276_s4 + $0x64] sm:$0xf] %vm743_vm0, %v736_v45  ;;  %v721_v49 = vpack.c.bf16 %v689_v46, %v689_v46  ;;  %v576_v50 = vadd.f32 %v1269_v48, %v575_v47  ;;  %v664_v51 = vpop.f32.mrf.mxu3 }
 0x100   : > { %v537_v52 = vpop.f32.mrf.mxu0 }
 0x101   : > { %754 = vst.msk [vmem:[%s1276_s4 + $0x28] sm:$0xf] %vm743_vm0, %v721_v49  ;;  %v665_v53 = vadd.f32 %v664_v51, %v576_v50  ;;  %v538_v54 = vadd.f32 %v1269_v48, %v537_v52  ;;  %v626_v55 = vpop.f32.mrf.mxu1 }
 0x103   : > { %v705_v56 = vmax.f32 %v665_v53, 0.0  ;;  %v627_v57 = vadd.f32 %v626_v55, %v538_v54 }
 0x105   : > { %v737_v58 = vpack.c.bf16 %v705_v56, %v705_v56  ;;  %v690_v59 = vmax.f32 %v627_v57, 0.0 }
 0x106   : > { %v577_v60 = vpop.f32.mrf.mxu2 }
 0x107   : > { %770 = vst.msk [vmem:[%s1276_s4 + $0x68] sm:$0xf] %vm743_vm0, %v737_v58  ;;  %v722_v61 = vpack.c.bf16 %v690_v59, %v690_v59  ;;  %v578_v62 = vadd.f32 %v1269_v48, %v577_v60  ;;  %v666_v63 = vpop.f32.mrf.mxu3 }
 0x108   : > { %v540_v0 = vpop.f32.mrf.mxu0 }
 0x109   : > { %755 = vst.msk [vmem:[%s1276_s4 + $0x2c] sm:$0xf] %vm743_vm0, %v722_v61  ;;  %v667_v1 = vadd.f32 %v666_v63, %v578_v62  ;;  %v541_v2 = vadd.f32 %v1269_v48, %v540_v0  ;;  %v629_v3 = vpop.f32.mrf.mxu1 }
 0x10b   : > { %v706_v4 = vmax.f32 %v667_v1, 0.0  ;;  %v630_v5 = vadd.f32 %v629_v3, %v541_v2 }
 0x10d   : > { %v738_v6 = vpack.c.bf16 %v706_v4, %v706_v4  ;;  %v691_v7 = vmax.f32 %v630_v5, 0.0 }
 0x10e   : > { %v580_v8 = vpop.f32.mrf.mxu2 }
 0x10f   : > { %771 = vst.msk [vmem:[%s1276_s4 + $0x6c] sm:$0xf] %vm743_vm0, %v738_v6  ;;  %v723_v9 = vpack.c.bf16 %v691_v7, %v691_v7  ;;  %v581_v10 = vadd.f32 %v1269_v48, %v580_v8  ;;  %v669_v11 = vpop.f32.mrf.mxu3 }
 0x110   : > { %v542_v12 = vpop.f32.mrf.mxu0 }
 0x111   : > { %756 = vst.msk [vmem:[%s1276_s4 + $0x30] sm:$0xf] %vm743_vm0, %v723_v9  ;;  %v670_v13 = vadd.f32 %v669_v11, %v581_v10  ;;  %v543_v14 = vadd.f32 %v1269_v48, %v542_v12  ;;  %v631_v15 = vpop.f32.mrf.mxu1 }
 0x113   : > { %v707_v16 = vmax.f32 %v670_v13, 0.0  ;;  %v632_v17 = vadd.f32 %v631_v15, %v543_v14 }
 0x115   : > { %v739_v18 = vpack.c.bf16 %v707_v16, %v707_v16  ;;  %v692_v19 = vmax.f32 %v632_v17, 0.0 }
 0x116   : > { %v582_v20 = vpop.f32.mrf.mxu2 }
 0x117   : > { %772 = vst.msk [vmem:[%s1276_s4 + $0x70] sm:$0xf] %vm743_vm0, %v739_v18  ;;  %v724_v21 = vpack.c.bf16 %v692_v19, %v692_v19  ;;  %v583_v22 = vadd.f32 %v1269_v48, %v582_v20  ;;  %v671_v23 = vpop.f32.mrf.mxu3 }
 0x118   : > { %v545_v24 = vpop.f32.mrf.mxu0 }
 0x119   : > { %757 = vst.msk [vmem:[%s1276_s4 + $0x34] sm:$0xf] %vm743_vm0, %v724_v21  ;;  %v672_v25 = vadd.f32 %v671_v23, %v583_v22  ;;  %v546_v26 = vadd.f32 %v1269_v48, %v545_v24  ;;  %v634_v27 = vpop.f32.mrf.mxu1 }
 0x11b   : > { %v708_v28 = vmax.f32 %v672_v25, 0.0  ;;  %v635_v29 = vadd.f32 %v634_v27, %v546_v26 }
 0x11d   : > { %v740_v30 = vpack.c.bf16 %v708_v28, %v708_v28  ;;  %v693_v31 = vmax.f32 %v635_v29, 0.0 }
 0x11e   : > { %v585_v32 = vpop.f32.mrf.mxu2 }
 0x11f   : > { %773 = vst.msk [vmem:[%s1276_s4 + $0x74] sm:$0xf] %vm743_vm0, %v740_v30  ;;  %v725_v33 = vpack.c.bf16 %v693_v31, %v693_v31  ;;  %v586_v34 = vadd.f32 %v1269_v48, %v585_v32  ;;  %v674_v35 = vpop.f32.mrf.mxu3 }
 0x120   : > { %v547_v36 = vpop.f32.mrf.mxu0 }
 0x121   : > { %758 = vst.msk [vmem:[%s1276_s4 + $0x38] sm:$0xf] %vm743_vm0, %v725_v33  ;;  %v675_v37 = vadd.f32 %v674_v35, %v586_v34  ;;  %v548_v38 = vadd.f32 %v1269_v48, %v547_v36  ;;  %v636_v39 = vpop.f32.mrf.mxu1 }
 0x123   : > { %v709_v40 = vmax.f32 %v675_v37, 0.0  ;;  %v637_v41 = vadd.f32 %v636_v39, %v548_v38 }
 0x125   : > { %v741_v42 = vpack.c.bf16 %v709_v40, %v709_v40  ;;  %v694_v43 = vmax.f32 %v637_v41, 0.0 }
 0x126   : > { %v587_v44 = vpop.f32.mrf.mxu2 }
 0x127   : > { %774 = vst.msk [vmem:[%s1276_s4 + $0x78] sm:$0xf] %vm743_vm0, %v741_v42  ;;  %v726_v45 = vpack.c.bf16 %v694_v43, %v694_v43  ;;  %v588_v46 = vadd.f32 %v1269_v48, %v587_v44  ;;  %v676_v47 = vpop.f32.mrf.mxu3 }
 0x129   : > { %759 = vst.msk [vmem:[%s1276_s4 + $0x3c] sm:$0xf] %vm743_vm0, %v726_v45  ;;  %v677_v49 = vadd.f32 %v676_v47, %v588_v46 }
 0x12b   : > { %v710_v50 = vmax.f32 %v677_v49, 0.0 }
 0x12d   : > { %v742_v51 = vpack.c.bf16 %v710_v50, %v710_v50 }
 0x12f   : > { %775 = vst.msk [vmem:[%s1276_s4 + $0x7c] sm:$0xf] %vm743_vm0, %v742_v51 }
 0x130 PF: > { %s13_s12 = sadd.s32 1, %s1116_s12  }
 0x131   : > { %p10_p4 = scmp.ge.s32.totalorder %s13_s12, 4  }
 0x133   :  { %12 = sbr.rel (!%p10_p4) target bundleno = 1 (0x1), region = 62 }

// kernel: _cnn_forward_unfused.4
= control target key start
LH: loop header
LB: loop body
LE: loop exit
PB: predicated region body
PF: predicated region fallthrough
CT: control target
= control target key end

     0   :  { %vm550_vm0 = vcmask 519168   ;;  %s1117_s1 = inlined_call_operand.vmem [shape: bf16[512,64], index: 1, kind: input, shape index: {}]   ;;  %s1118_s2 = inlined_call_operand.vmem [shape: f32[1,64], index: 2, kind: input, shape index: {}]   ;;  %s1119_s0 = inlined_call_operand.vmem [shape: bf16[80,512], index: 0, kind: input, shape index: {}]   ;;  %s1120_s3 = inlined_call_operand.vmem [shape: bf16[80,64], index: 3, kind: output, shape index: {}]  }
   0x1   :  { %v800_v0 = vld [vmem:[%s1117_s1 + $0x38] sm:$0xff]  ;;  %v799_v4 = vld [vmem:[%s1117_s1 + $0x30] sm:$0xff]  ;;  %v798_v8 = vld [vmem:[%s1117_s1 + $0x28] sm:$0xff] }
   0x2   :  { %v808_v1 = vld [vmem:[%s1117_s1 + $0x78] sm:$0xff]  ;;  %394 = vmatpush.bf16.msra.mxu0 %v800_v0  ;;  %v807_v5 = vld [vmem:[%s1117_s1 + $0x70] sm:$0xff]  ;;  %v806_v9 = vld [vmem:[%s1117_s1 + $0x68] sm:$0xff] }
   0x3   :  { %v816_v2 = vld [vmem:[%s1117_s1 + $0xb8] sm:$0xff]  ;;  %428 = vmatpush.bf16.msra.mxu1 %v808_v1  ;;  %v815_v6 = vld [vmem:[%s1117_s1 + $0xb0] sm:$0xff]  ;;  %v814_v10 = vld [vmem:[%s1117_s1 + $0xa8] sm:$0xff] }
   0x4   :  { %v824_v3 = vld [vmem:[%s1117_s1 + $0xf8] sm:$0xff]  ;;  %462 = vmatpush.bf16.msra.mxu2 %v816_v2  ;;  %v823_v7 = vld [vmem:[%s1117_s1 + $0xf0] sm:$0xff]  ;;  %v822_v11 = vld [vmem:[%s1117_s1 + $0xe8] sm:$0xff] }
   0x5   :  { %496 = vmatpush.bf16.msra.mxu3 %v824_v3  ;;  %v797_v12 = vld [vmem:[%s1117_s1 + $0x20] sm:$0xff]  ;;  %v796_v16 = vld [vmem:[%s1117_s1 + $0x18] sm:$0xff]  ;;  %v795_v20 = vld [vmem:[%s1117_s1 + $0x10] sm:$0xff] }
   0x6   :  { %395 = vmatpush.bf16.msra.mxu0 %v799_v4  ;;  %v805_v13 = vld [vmem:[%s1117_s1 + $0x60] sm:$0xff]  ;;  %v804_v17 = vld [vmem:[%s1117_s1 + $0x58] sm:$0xff]  ;;  %v803_v21 = vld [vmem:[%s1117_s1 + $0x50] sm:$0xff] }
   0x7   :  { %429 = vmatpush.bf16.msra.mxu1 %v807_v5  ;;  %v813_v14 = vld [vmem:[%s1117_s1 + $0xa0] sm:$0xff]  ;;  %v812_v18 = vld [vmem:[%s1117_s1 + $0x98] sm:$0xff]  ;;  %v811_v22 = vld [vmem:[%s1117_s1 + $0x90] sm:$0xff] }
   0x8   :  { %463 = vmatpush.bf16.msra.mxu2 %v815_v6  ;;  %v821_v15 = vld [vmem:[%s1117_s1 + $0xe0] sm:$0xff]  ;;  %v820_v19 = vld [vmem:[%s1117_s1 + $0xd8] sm:$0xff]  ;;  %v819_v23 = vld [vmem:[%s1117_s1 + $0xd0] sm:$0xff] }
   0x9   :  { %497 = vmatpush.bf16.msra.mxu3 %v823_v7  ;;  %v794_v24 = vld [vmem:[%s1117_s1 + $0x8] sm:$0xff]  ;;  %v793_v28 = vld [vmem:[%s1117_s1] sm:$0xff]  ;;  %v775_v33 = vld [vmem:[%s1119_s0 + $0xc] sm:$0xf0] }
   0xa   :  { %396 = vmatpush.bf16.msra.mxu0 %v798_v8  ;;  %v802_v25 = vld [vmem:[%s1117_s1 + $0x48] sm:$0xff]  ;;  %v801_v29 = vld [vmem:[%s1117_s1 + $0x40] sm:$0xff]  ;;  %v569_v35 = vld [vmem:[%s1119_s0 + $0x10] sm:$0xf0] }
   0xb   :  { %430 = vmatpush.bf16.msra.mxu1 %v806_v9  ;;  %v810_v26 = vld [vmem:[%s1117_s1 + $0x88] sm:$0xff]  ;;  %v809_v30 = vld [vmem:[%s1117_s1 + $0x80] sm:$0xff]  ;;  %v776_v37 = vld [vmem:[%s1119_s0 + $0x14] sm:$0xf0] }
   0xc   :  { %464 = vmatpush.bf16.msra.mxu2 %v814_v10  ;;  %v818_v27 = vld [vmem:[%s1117_s1 + $0xc8] sm:$0xff]  ;;  %v817_v31 = vld [vmem:[%s1117_s1 + $0xc0] sm:$0xff]  ;;  %v577_v39 = vld [vmem:[%s1119_s0 + $0x18] sm:$0xf0] }
   0xd   :  { %498 = vmatpush.bf16.msra.mxu3 %v822_v11  ;;  %v567_v32 = vld [vmem:[%s1119_s0] sm:$0xf]  ;;  %v773_v34 = vld [vmem:[%s1119_s0 + $0x4] sm:$0xf]  ;;  %v575_v36 = vld [vmem:[%s1119_s0 + $0x8] sm:$0xf] }
   0xe   :  { %397 = vmatpush.bf16.msra.mxu0 %v797_v12  ;;  %v774_v38 = vld [vmem:[%s1119_s0 + $0xc] sm:$0xf]  ;;  %v568_v40 = vor.u32 %v775_v33, %v567_v32  ;;  %v572_v41 = vor.u32 %v773_v34, %v569_v35  ;;  %v576_v42 = vor.u32 %v776_v37, %v575_v36  ;;  %v583_v44 = vld [vmem:[%s1119_s0 + $0x20] sm:$0xf]  ;;  %v779_v45 = vld [vmem:[%s1119_s0 + $0x2c] sm:$0xf0] }
   0xf   :  { %431 = vmatpush.bf16.msra.mxu1 %v805_v13  ;;  %v580_v43 = vor.u32 %v774_v38, %v577_v39  ;;  %v777_v46 = vld [vmem:[%s1119_s0 + $0x24] sm:$0xf]  ;;  %v585_v47 = vld [vmem:[%s1119_s0 + $0x30] sm:$0xf0]  ;;  %v591_v48 = vld [vmem:[%s1119_s0 + $0x28] sm:$0xf]  ;;  %v584_v52 = vor.u32 %v779_v45, %v583_v44 }
  0x10   :  { %465 = vmatpush.bf16.msra.mxu2 %v813_v14  ;;  %v780_v49 = vld [vmem:[%s1119_s0 + $0x34] sm:$0xf0]  ;;  %v778_v50 = vld [vmem:[%s1119_s0 + $0x2c] sm:$0xf]  ;;  %v593_v51 = vld [vmem:[%s1119_s0 + $0x38] sm:$0xf0]  ;;  %v588_v53 = vor.u32 %v777_v46, %v585_v47 }
  0x11   :  { %499 = vmatpush.bf16.msra.mxu3 %v821_v15  ;;  %v592_v54 = vor.u32 %v780_v49, %v591_v48  ;;  %v596_v55 = vor.u32 %v778_v50, %v593_v51  ;;  %v599_v56 = vld [vmem:[%s1119_s0 + $0x40] sm:$0xf]  ;;  %v783_v57 = vld [vmem:[%s1119_s0 + $0x4c] sm:$0xf0]  ;;  %v781_v58 = vld [vmem:[%s1119_s0 + $0x44] sm:$0xf] }
  0x12   :  { %398 = vmatpush.bf16.msra.mxu0 %v796_v16  ;;  %v601_v59 = vld [vmem:[%s1119_s0 + $0x50] sm:$0xf0]  ;;  %v607_v60 = vld [vmem:[%s1119_s0 + $0x48] sm:$0xf]  ;;  %v784_v61 = vld [vmem:[%s1119_s0 + $0x54] sm:$0xf0]  ;;  %v600_v0 = vor.u32 %v783_v57, %v599_v56 }
  0x13   :  { %432 = vmatpush.bf16.msra.mxu1 %v804_v17  ;;  %v782_v62 = vld [vmem:[%s1119_s0 + $0x4c] sm:$0xf]  ;;  %v609_v63 = vld [vmem:[%s1119_s0 + $0x58] sm:$0xf0]  ;;  %v604_v1 = vor.u32 %v781_v58, %v601_v59  ;;  %v608_v2 = vor.u32 %v784_v61, %v607_v60  ;;  %v615_v4 = vld [vmem:[%s1119_s0 + $0x60] sm:$0xf] }
  0x14   :  { %466 = vmatpush.bf16.msra.mxu2 %v812_v18  ;;  %v612_v3 = vor.u32 %v782_v62, %v609_v63  ;;  %v787_v5 = vld [vmem:[%s1119_s0 + $0x6c] sm:$0xf0]  ;;  %v785_v6 = vld [vmem:[%s1119_s0 + $0x64] sm:$0xf]  ;;  %v617_v7 = vld [vmem:[%s1119_s0 + $0x70] sm:$0xf0] }
  0x15   :  { %500 = vmatpush.bf16.msra.mxu3 %v820_v19  ;;  %v623_v8 = vld [vmem:[%s1119_s0 + $0x68] sm:$0xf]  ;;  %v788_v9 = vld [vmem:[%s1119_s0 + $0x74] sm:$0xf0]  ;;  %v786_v10 = vld [vmem:[%s1119_s0 + $0x6c] sm:$0xf]  ;;  %v616_v12 = vor.u32 %v787_v5, %v615_v4  ;;  %v620_v13 = vor.u32 %v785_v6, %v617_v7 }
  0x16   :  { %399 = vmatpush.bf16.msra.mxu0 %v795_v20  ;;  %v625_v11 = vld [vmem:[%s1119_s0 + $0x78] sm:$0xf0]  ;;  %v624_v14 = vor.u32 %v788_v9, %v623_v8  ;;  %v631_v16 = vld [vmem:[%s1119_s0 + $0x80] sm:$0xf]  ;;  %v791_v17 = vld [vmem:[%s1119_s0 + $0x8c] sm:$0xf0] }
  0x17   :  { %433 = vmatpush.bf16.msra.mxu1 %v803_v21  ;;  %v628_v15 = vor.u32 %v786_v10, %v625_v11  ;;  %v789_v18 = vld [vmem:[%s1119_s0 + $0x84] sm:$0xf]  ;;  %v633_v19 = vld [vmem:[%s1119_s0 + $0x90] sm:$0xf0]  ;;  %v639_v20 = vld [vmem:[%s1119_s0 + $0x88] sm:$0xf] }
  0x18   :  { %467 = vmatpush.bf16.msra.mxu2 %v811_v22  ;;  %v792_v21 = vld [vmem:[%s1119_s0 + $0x94] sm:$0xf0]  ;;  %v790_v22 = vld [vmem:[%s1119_s0 + $0x8c] sm:$0xf] }
  0x19   :  { %501 = vmatpush.bf16.msra.mxu3 %v819_v23  ;;  %v641_v23 = vld [vmem:[%s1119_s0 + $0x98] sm:$0xf0] }
  0x1a   :  { %400 = vmatpush.bf16.msra.mxu0 %v794_v24  ;;  %v632_v24 = vor.u32 %v791_v17, %v631_v16 }
  0x1b   :  { %434 = vmatpush.bf16.msra.mxu1 %v802_v25  ;;  %v636_v25 = vor.u32 %v789_v18, %v633_v19 }
  0x1c   :  { %468 = vmatpush.bf16.msra.mxu2 %v810_v26  ;;  %v640_v26 = vor.u32 %v792_v21, %v639_v20 }
  0x1d   :  { %502 = vmatpush.bf16.msra.mxu3 %v818_v27  ;;  %v644_v27 = vor.u32 %v790_v22, %v641_v23 }
  0x1e   :  { %401 = vmatpush.bf16.msra.mxu0 %v793_v28  ;;  %v1065_v28 = vld [vmem:[%s1118_s2] ss:$0 sm:$0xff] }
  0x1f   :  { %435 = vmatpush.bf16.msra.mxu1 %v801_v29 }
  0x20   :  { %469 = vmatpush.bf16.msra.mxu2 %v809_v30 }
  0x21   :  { %503 = vmatpush.bf16.msra.mxu3 %v817_v31  ;;  %402 = vmatmul.bf16.vlgmr.msra.gmra.mxu0 %v568_v40 }
  0x22   :  { %436 = vmatmul.bf16.vlgmr.msra.gmra.mxu1 %v572_v41 }
  0x23   :  { %470 = vmatmul.bf16.vlgmr.msra.gmra.mxu2 %v576_v42 }
  0x24   :  { %504 = vmatmul.bf16.vlgmr.msra.gmra.mxu3 %v580_v43 }
  0x31   :  { %407 = vmatmul.bf16.gmra.mxu0 %v584_v52 }
  0x32   :  { %441 = vmatmul.bf16.gmra.mxu1 %v588_v53 }
  0x33   :  { %475 = vmatmul.bf16.gmra.mxu2 %v592_v54 }
  0x34   :  { %509 = vmatmul.bf16.gmra.mxu3 %v596_v55 }
  0x41   :  { %412 = vmatmul.bf16.gmra.mxu0 %v600_v0 }
  0x42   :  { %446 = vmatmul.bf16.gmra.mxu1 %v604_v1 }
  0x43   :  { %480 = vmatmul.bf16.gmra.mxu2 %v608_v2 }
  0x44   :  { %514 = vmatmul.bf16.gmra.mxu3 %v612_v3 }
  0x51   :  { %417 = vmatmul.bf16.gmra.mxu0 %v616_v12 }
  0x52   :  { %451 = vmatmul.bf16.gmra.mxu1 %v620_v13 }
  0x53   :  { %485 = vmatmul.bf16.gmra.mxu2 %v624_v14 }
  0x54   :  { %519 = vmatmul.bf16.gmra.mxu3 %v628_v15 }
  0x61   :  { %422 = vmatmul.bf16.gmra.mxu0 %v632_v24 }
  0x62   :  { %456 = vmatmul.bf16.gmra.mxu1 %v636_v25 }
  0x63   :  { %490 = vmatmul.bf16.gmra.mxu2 %v640_v26 }
  0x64   :  { %524 = vmatmul.bf16.gmra.mxu3 %v644_v27 }
  0x9e   :  { %v403_v29 = vpop.f32.mrf.mxu0 }
  0x9f   :  { %v437_v30 = vpop.f32.mrf.mxu1  ;;  %v404_v31 = vadd.f32 %v1065_v28, %v403_v29 }
  0xa1   :  { %v438_v32 = vadd.f32 %v437_v30, %v404_v31 }
  0xa6   :  { %v471_v33 = vpop.f32.mrf.mxu2  ;;  %v405_v36 = vpop.f32.mrf.mxu0 }
  0xa7   :  { %v505_v34 = vpop.f32.mrf.mxu3  ;;  %v472_v35 = vadd.f32 %v471_v33, %v438_v32  ;;  %v439_v37 = vpop.f32.mrf.mxu1  ;;  %v406_v39 = vadd.f32 %v1065_v28, %v405_v36 }
  0xa9   :  { %v506_v38 = vadd.f32 %v505_v34, %v472_v35  ;;  %v440_v42 = vadd.f32 %v439_v37, %v406_v39 }
  0xab   :  { %v530_v40 = vmax.f32 %v506_v38, 0.0 }
  0xad   :  { %v540_v41 = vpack.c.bf16 %v530_v40, %v530_v40 }
  0xae   :  { %v473_v43 = vpop.f32.mrf.mxu2  ;;  %v408_v46 = vpop.f32.mrf.mxu0 }
  0xaf   :  { %v507_v44 = vpop.f32.mrf.mxu3  ;;  %551 = vst.msk [vmem:[%s1120_s3] sm:$0xf] %vm550_vm0, %v540_v41  ;;  %v474_v45 = vadd.f32 %v473_v43, %v440_v42  ;;  %v442_v47 = vpop.f32.mrf.mxu1  ;;  %v409_v48 = vadd.f32 %v1065_v28, %v408_v46 }
  0xb1   :  { %v508_v49 = vadd.f32 %v507_v44, %v474_v45  ;;  %v443_v51 = vadd.f32 %v442_v47, %v409_v48 }
  0xb3   :  { %v531_v50 = vmax.f32 %v508_v49, 0.0 }
  0xb5   :  { %v541_v52 = vpack.c.bf16 %v531_v50, %v531_v50 }
  0xb6   :  { %v476_v53 = vpop.f32.mrf.mxu2  ;;  %v410_v56 = vpop.f32.mrf.mxu0 }
  0xb7   :  { %v510_v54 = vpop.f32.mrf.mxu3  ;;  %552 = vst.msk [vmem:[%s1120_s3 + $0x4] sm:$0xf] %vm550_vm0, %v541_v52  ;;  %v477_v55 = vadd.f32 %v476_v53, %v443_v51  ;;  %v444_v57 = vpop.f32.mrf.mxu1  ;;  %v411_v59 = vadd.f32 %v1065_v28, %v410_v56 }
  0xb9   :  { %v511_v58 = vadd.f32 %v510_v54, %v477_v55  ;;  %v445_v62 = vadd.f32 %v444_v57, %v411_v59 }
  0xbb   :  { %v532_v60 = vmax.f32 %v511_v58, 0.0 }
  0xbd   :  { %v542_v61 = vpack.c.bf16 %v532_v60, %v532_v60 }
  0xbe   :  { %v478_v63 = vpop.f32.mrf.mxu2  ;;  %v413_v2 = vpop.f32.mrf.mxu0 }
  0xbf   :  { %v512_v0 = vpop.f32.mrf.mxu3  ;;  %553 = vst.msk [vmem:[%s1120_s3 + $0x8] sm:$0xf] %vm550_vm0, %v542_v61  ;;  %v479_v1 = vadd.f32 %v478_v63, %v445_v62  ;;  %v447_v3 = vpop.f32.mrf.mxu1  ;;  %v414_v4 = vadd.f32 %v1065_v28, %v413_v2 }
  0xc1   :  { %v513_v5 = vadd.f32 %v512_v0, %v479_v1  ;;  %v448_v7 = vadd.f32 %v447_v3, %v414_v4 }
  0xc3   :  { %v533_v6 = vmax.f32 %v513_v5, 0.0 }
  0xc5   :  { %v543_v8 = vpack.c.bf16 %v533_v6, %v533_v6 }
  0xc6   :  { %v481_v9 = vpop.f32.mrf.mxu2  ;;  %v415_v12 = vpop.f32.mrf.mxu0 }
  0xc7   :  { %v515_v10 = vpop.f32.mrf.mxu3  ;;  %554 = vst.msk [vmem:[%s1120_s3 + $0xc] sm:$0xf] %vm550_vm0, %v543_v8  ;;  %v482_v11 = vadd.f32 %v481_v9, %v448_v7  ;;  %v449_v13 = vpop.f32.mrf.mxu1  ;;  %v416_v15 = vadd.f32 %v1065_v28, %v415_v12 }
  0xc9   :  { %v516_v14 = vadd.f32 %v515_v10, %v482_v11  ;;  %v450_v18 = vadd.f32 %v449_v13, %v416_v15 }
  0xcb   :  { %v534_v16 = vmax.f32 %v516_v14, 0.0 }
  0xcd   :  { %v544_v17 = vpack.c.bf16 %v534_v16, %v534_v16 }
  0xce   :  { %v483_v19 = vpop.f32.mrf.mxu2  ;;  %v418_v22 = vpop.f32.mrf.mxu0 }
  0xcf   :  { %v517_v20 = vpop.f32.mrf.mxu3  ;;  %555 = vst.msk [vmem:[%s1120_s3 + $0x10] sm:$0xf] %vm550_vm0, %v544_v17  ;;  %v484_v21 = vadd.f32 %v483_v19, %v450_v18  ;;  %v452_v23 = vpop.f32.mrf.mxu1  ;;  %v419_v24 = vadd.f32 %v1065_v28, %v418_v22 }
  0xd1   :  { %v518_v25 = vadd.f32 %v517_v20, %v484_v21  ;;  %v453_v27 = vadd.f32 %v452_v23, %v419_v24 }
  0xd3   :  { %v535_v26 = vmax.f32 %v518_v25, 0.0 }
  0xd5   :  { %v545_v29 = vpack.c.bf16 %v535_v26, %v535_v26 }
  0xd6   :  { %v486_v30 = vpop.f32.mrf.mxu2  ;;  %v420_v33 = vpop.f32.mrf.mxu0 }
  0xd7   :  { %v520_v31 = vpop.f32.mrf.mxu3  ;;  %556 = vst.msk [vmem:[%s1120_s3 + $0x14] sm:$0xf] %vm550_vm0, %v545_v29  ;;  %v487_v32 = vadd.f32 %v486_v30, %v453_v27  ;;  %v454_v34 = vpop.f32.mrf.mxu1  ;;  %v421_v36 = vadd.f32 %v1065_v28, %v420_v33 }
  0xd9   :  { %v521_v35 = vadd.f32 %v520_v31, %v487_v32  ;;  %v455_v39 = vadd.f32 %v454_v34, %v421_v36 }
  0xdb   :  { %v536_v37 = vmax.f32 %v521_v35, 0.0 }
  0xdd   :  { %v546_v38 = vpack.c.bf16 %v536_v37, %v536_v37 }
  0xde   :  { %v488_v40 = vpop.f32.mrf.mxu2  ;;  %v423_v43 = vpop.f32.mrf.mxu0 }
  0xdf   :  { %v522_v41 = vpop.f32.mrf.mxu3  ;;  %557 = vst.msk [vmem:[%s1120_s3 + $0x18] sm:$0xf] %vm550_vm0, %v546_v38  ;;  %v489_v42 = vadd.f32 %v488_v40, %v455_v39  ;;  %v424_v44 = vadd.f32 %v1065_v28, %v423_v43  ;;  %v457_v46 = vpop.f32.mrf.mxu1 }
  0xe1   :  { %v523_v45 = vadd.f32 %v522_v41, %v489_v42  ;;  %v458_v48 = vadd.f32 %v457_v46, %v424_v44 }
  0xe3   :  { %v537_v47 = vmax.f32 %v523_v45, 0.0 }
  0xe5   :  { %v547_v49 = vpack.c.bf16 %v537_v47, %v537_v47 }
  0xe6   :  { %v491_v50 = vpop.f32.mrf.mxu2  ;;  %v425_v53 = vpop.f32.mrf.mxu0 }
  0xe7   :  { %v525_v51 = vpop.f32.mrf.mxu3  ;;  %558 = vst.msk [vmem:[%s1120_s3 + $0x1c] sm:$0xf] %vm550_vm0, %v547_v49  ;;  %v492_v52 = vadd.f32 %v491_v50, %v458_v48  ;;  %v426_v55 = vadd.f32 %v1065_v28, %v425_v53  ;;  %v459_v57 = vpop.f32.mrf.mxu1 }
  0xe9   :  { %v526_v54 = vadd.f32 %v525_v51, %v492_v52  ;;  %v460_v59 = vadd.f32 %v459_v57, %v426_v55 }
  0xeb   :  { %v538_v56 = vmax.f32 %v526_v54, 0.0 }
  0xed   :  { %v548_v58 = vpack.c.bf16 %v538_v56, %v538_v56 }
  0xee   :  { %v493_v60 = vpop.f32.mrf.mxu2 }
  0xef   :  { %559 = vst.msk [vmem:[%s1120_s3 + $0x20] sm:$0xf] %vm550_vm0, %v548_v58  ;;  %v494_v61 = vadd.f32 %v493_v60, %v460_v59  ;;  %v527_v62 = vpop.f32.mrf.mxu3 }
  0xf1   :  { %v528_v63 = vadd.f32 %v527_v62, %v494_v61 }
  0xf3   :  { %v539_v0 = vmax.f32 %v528_v63, 0.0 }
  0xf5   :  { %v549_v1 = vpack.c.bf16 %v539_v0, %v539_v0 }
  0xf7   :  { %560 = vst.msk [vmem:[%s1120_s3 + $0x24] sm:$0xf] %vm550_vm0, %v549_v1 }

// kernel: _cnn_forward_unfused.5
= control target key start
LH: loop header
LB: loop body
LE: loop exit
PB: predicated region body
PF: predicated region fallthrough
CT: control target
= control target key end

     0   :  { %vm338_vm0 = vcmask 523264   ;;  %s797_s1 = inlined_call_operand.vmem [shape: bf16[576,64], index: 1, kind: input, shape index: {}]   ;;  %s798_s2 = inlined_call_operand.vmem [shape: f32[1,64], index: 2, kind: input, shape index: {}]   ;;  %s799_s0 = inlined_call_operand.vmem [shape: bf16[16,576], index: 0, kind: input, shape index: {}]   ;;  %s800_s3 = inlined_call_operand.vmem [shape: f32[16,64], index: 3, kind: output, shape index: {}]  }
   0x1   :  { %v597_v0 = vld [vmem:[%s797_s1 + $0x38] sm:$0xff]  ;;  %v596_v4 = vld [vmem:[%s797_s1 + $0x30] sm:$0xff]  ;;  %v595_v8 = vld [vmem:[%s797_s1 + $0x28] sm:$0xff] }
   0x2   :  { %v613_v1 = vld [vmem:[%s797_s1 + $0xb8] sm:$0xff]  ;;  %342 = vmatpush.bf16.msra.mxu0 %v597_v0  ;;  %v612_v5 = vld [vmem:[%s797_s1 + $0xb0] sm:$0xff]  ;;  %v611_v9 = vld [vmem:[%s797_s1 + $0xa8] sm:$0xff] }
   0x3   :  { %v621_v2 = vld [vmem:[%s797_s1 + $0xf8] sm:$0xff]  ;;  %370 = vmatpush.bf16.msra.mxu2 %v613_v1  ;;  %v620_v6 = vld [vmem:[%s797_s1 + $0xf0] sm:$0xff]  ;;  %v619_v10 = vld [vmem:[%s797_s1 + $0xe8] sm:$0xff] }
   0x4   :  { %v605_v3 = vld [vmem:[%s797_s1 + $0x78] sm:$0xff]  ;;  %384 = vmatpush.bf16.msra.mxu3 %v621_v2  ;;  %v604_v7 = vld [vmem:[%s797_s1 + $0x70] sm:$0xff]  ;;  %v603_v11 = vld [vmem:[%s797_s1 + $0x68] sm:$0xff] }
   0x5   :  { %356 = vmatpush.bf16.msra.mxu1 %v605_v3  ;;  %v594_v12 = vld [vmem:[%s797_s1 + $0x20] sm:$0xff]  ;;  %v593_v16 = vld [vmem:[%s797_s1 + $0x18] sm:$0xff]  ;;  %v592_v20 = vld [vmem:[%s797_s1 + $0x10] sm:$0xff] }
   0x6   :  { %343 = vmatpush.bf16.msra.mxu0 %v596_v4  ;;  %v610_v13 = vld [vmem:[%s797_s1 + $0xa0] sm:$0xff]  ;;  %v609_v17 = vld [vmem:[%s797_s1 + $0x98] sm:$0xff]  ;;  %v608_v21 = vld [vmem:[%s797_s1 + $0x90] sm:$0xff] }
   0x7   :  { %371 = vmatpush.bf16.msra.mxu2 %v612_v5  ;;  %v618_v14 = vld [vmem:[%s797_s1 + $0xe0] sm:$0xff]  ;;  %v617_v18 = vld [vmem:[%s797_s1 + $0xd8] sm:$0xff]  ;;  %v616_v22 = vld [vmem:[%s797_s1 + $0xd0] sm:$0xff] }
   0x8   :  { %385 = vmatpush.bf16.msra.mxu3 %v620_v6  ;;  %v602_v15 = vld [vmem:[%s797_s1 + $0x60] sm:$0xff]  ;;  %v601_v19 = vld [vmem:[%s797_s1 + $0x58] sm:$0xff]  ;;  %v600_v23 = vld [vmem:[%s797_s1 + $0x50] sm:$0xff] }
   0x9   :  { %357 = vmatpush.bf16.msra.mxu1 %v604_v7  ;;  %v591_v24 = vld [vmem:[%s797_s1 + $0x8] sm:$0xff]  ;;  %v590_v28 = vld [vmem:[%s797_s1] sm:$0xff]  ;;  %v587_v33 = vld [vmem:[%s799_s0 + $0x10] sm:$0xf0] }
   0xa   :  { %344 = vmatpush.bf16.msra.mxu0 %v595_v8  ;;  %v607_v25 = vld [vmem:[%s797_s1 + $0x88] sm:$0xff]  ;;  %v606_v29 = vld [vmem:[%s797_s1 + $0x80] sm:$0xff]  ;;  %v588_v35 = vld [vmem:[%s799_s0 + $0x18] sm:$0xf0] }
   0xb   :  { %372 = vmatpush.bf16.msra.mxu2 %v611_v9  ;;  %v615_v26 = vld [vmem:[%s797_s1 + $0xc8] sm:$0xff]  ;;  %v614_v30 = vld [vmem:[%s797_s1 + $0xc0] sm:$0xff]  ;;  %v424_v39 = vld [vmem:[%s799_s0 + $0x14] sm:$0xf0] }
   0xc   :  { %386 = vmatpush.bf16.msra.mxu3 %v619_v10  ;;  %v599_v27 = vld [vmem:[%s797_s1 + $0x48] sm:$0xff]  ;;  %v598_v31 = vld [vmem:[%s797_s1 + $0x40] sm:$0xff]  ;;  %v625_v40 = vld [vmem:[%s797_s1 + $0x118] sm:$0xff] }
   0xd   :  { %358 = vmatpush.bf16.msra.mxu1 %v603_v11  ;;  %v422_v32 = vld [vmem:[%s799_s0] sm:$0xf]  ;;  %v430_v34 = vld [vmem:[%s799_s0 + $0x8] sm:$0xf]  ;;  %v586_v36 = vld [vmem:[%s799_s0 + $0xc] sm:$0xf] }
   0xe   :  { %345 = vmatpush.bf16.msra.mxu0 %v594_v12  ;;  %v432_v37 = vld [vmem:[%s799_s0 + $0x1c] sm:$0xf0]  ;;  %v585_v38 = vld [vmem:[%s799_s0 + $0x4] sm:$0xf]  ;;  %v423_v41 = vor.u32 %v587_v33, %v422_v32  ;;  %v431_v42 = vor.u32 %v588_v35, %v430_v34  ;;  %v624_v45 = vld [vmem:[%s797_s1 + $0x110] sm:$0xff] }
   0xf   :  { %373 = vmatpush.bf16.msra.mxu2 %v610_v13  ;;  %v435_v43 = vor.u32 %v586_v36, %v432_v37  ;;  %v427_v44 = vor.u32 %v585_v38, %v424_v39  ;;  %v623_v46 = vld [vmem:[%s797_s1 + $0x108] sm:$0xff]  ;;  %v622_v47 = vld [vmem:[%s797_s1 + $0x100] sm:$0xff]  ;;  %v438_v48 = vld [vmem:[%s799_s0 + $0x10] sm:$0xf] }
  0x10   :  { %387 = vmatpush.bf16.msra.mxu3 %v618_v14  ;;  %v589_v49 = vld [vmem:[%s799_s0 + $0x20] sm:$0xf0]  ;;  %v626_v52 = vld [vmem:[%s798_s2] ss:$0 sm:$0xff] }
  0x11   :  { %359 = vmatpush.bf16.msra.mxu1 %v602_v15  ;;  %v439_v50 = vor.u32 %v589_v49, %v438_v48 }
  0x12   :  { %346 = vmatpush.bf16.msra.mxu0 %v593_v16 }
  0x13   :  { %374 = vmatpush.bf16.msra.mxu2 %v609_v17 }
  0x14   :  { %388 = vmatpush.bf16.msra.mxu3 %v617_v18 }
  0x15   :  { %360 = vmatpush.bf16.msra.mxu1 %v601_v19 }
  0x16   :  { %347 = vmatpush.bf16.msra.mxu0 %v592_v20 }
  0x17   :  { %375 = vmatpush.bf16.msra.mxu2 %v608_v21 }
  0x18   :  { %389 = vmatpush.bf16.msra.mxu3 %v616_v22 }
  0x19   :  { %361 = vmatpush.bf16.msra.mxu1 %v600_v23 }
  0x1a   :  { %348 = vmatpush.bf16.msra.mxu0 %v591_v24 }
  0x1b   :  { %376 = vmatpush.bf16.msra.mxu2 %v607_v25 }
  0x1c   :  { %390 = vmatpush.bf16.msra.mxu3 %v615_v26 }
  0x1d   :  { %362 = vmatpush.bf16.msra.mxu1 %v599_v27 }
  0x1e   :  { %349 = vmatpush.bf16.msra.mxu0 %v590_v28 }
  0x1f   :  { %377 = vmatpush.bf16.msra.mxu2 %v606_v29 }
  0x20   :  { %391 = vmatpush.bf16.msra.mxu3 %v614_v30 }
  0x21   :  { %363 = vmatpush.bf16.msra.mxu1 %v598_v31  ;;  %350 = vmatmul.bf16.vlgmr.msra.gmra.mxu0 %v423_v41 }
  0x22   :  { %402 = vmatpush.bf16.msrb.mxu0 %v625_v40  ;;  %378 = vmatmul.bf16.vlgmr.msra.gmra.mxu2 %v431_v42 }
  0x23   :  { %392 = vmatmul.bf16.vlgmr.msra.gmra.mxu3 %v435_v43 }
  0x24   :  { %364 = vmatmul.bf16.vlgmr.msra.gmra.mxu1 %v427_v44 }
  0x26   :  { %403 = vmatpush.bf16.msrb.mxu0 %v624_v45 }
  0x2a   :  { %404 = vmatpush.bf16.msrb.mxu0 %v623_v46 }
  0x2e   :  { %405 = vmatpush.bf16.msrb.mxu0 %v622_v47 }
  0x31   :  { %584 = vmatmul.msk.bf16.vlgmr.msrb.gmra.mxu0 %vm338_vm0, %v439_v50 }
  0x9e   :  { %v351_v51 = vpop.f32.mrf.mxu0 }
  0x9f   :  { %v352_v54 = vadd.f32 %v626_v52, %v351_v51 }
  0xa1   :  { %v365_v53 = vpop.f32.mrf.mxu1 }
  0xa2   :  { %v366_v57 = vadd.f32 %v365_v53, %v352_v54 }
  0xa5   :  { %v379_v55 = vpop.f32.mrf.mxu2 }
  0xa6   :  { %v353_v56 = vpop.f32.mrf.mxu0  ;;  %v380_v58 = vadd.f32 %v379_v55, %v366_v57  ;;  %v393_v59 = vpop.f32.mrf.mxu3 }
  0xa7   :  { %v354_v60 = vadd.f32 %v626_v52, %v353_v56 }
  0xa8   :  { %v394_v62 = vadd.f32 %v393_v59, %v380_v58 }
  0xa9   :  { %v367_v61 = vpop.f32.mrf.mxu1 }
  0xaa   :  { %v368_v1 = vadd.f32 %v367_v61, %v354_v60 }
  0xad   :  { %v381_v63 = vpop.f32.mrf.mxu2 }
  0xae   :  { %v407_v0 = vpop.f32.mrf.mxu0  ;;  %v382_v3 = vadd.f32 %v381_v63, %v368_v1  ;;  %v395_v5 = vpop.f32.mrf.mxu3 }
  0xaf   :  { %v408_v2 = vadd.f32 %v407_v0, %v394_v62 }
  0xb0   :  { %v396_v6 = vadd.f32 %v395_v5, %v382_v3 }
  0xb1   :  { %v412_v4 = vmax.f32 %v408_v2, 0.0 }
  0xb3   :  { %414 = vst.msk [vmem:[%s800_s3] sm:$0xff] %vm338_vm0, %v412_v4 }
  0xb6   :  { %v409_v7 = vpop.f32.mrf.mxu0 }
  0xb7   :  { %v410_v8 = vadd.f32 %v409_v7, %v396_v6 }
  0xb9   :  { %v413_v9 = vmax.f32 %v410_v8, 0.0 }
  0xbb   :  { %415 = vst.msk [vmem:[%s800_s3 + $0x8] sm:$0xff] %vm338_vm0, %v413_v9 }

</bundles_post_ra>
